<compile_context>
chip_gen: v7x
topology: tpu7x:2x2x1
jax: 0.10.0
libtpu: 0.0.40
codegen_flags: <defaults>
</compile_context>

<pallas_src>
import jax
import jax.numpy as jnp
from jax.experimental import pallas as pl
from jax.experimental.pallas import tpu as pltpu


# ---------------------------------------------------------------------------
# Kernel
# ---------------------------------------------------------------------------
def _make_mlp_kernel(num_layers):
    """Fused MLP kernel: num_layers Linear layers with ReLU between them.

    Weights arrive pre-cast to bf16; activations are cast to bf16 right before
    each MXU matmul; accumulation stays f32 (preferred_element_type); biases
    are added in f32 after accumulation.
    """

    def kernel(x_ref, *refs):
        o_ref = refs[-1]
        wb_refs = refs[:-1]

        h = x_ref[...]                                   # (tile_m, C_in) f32
        for i in range(num_layers):                      # unrolled at trace time
            w = wb_refs[2 * i][...]                      # (in, out) bf16
            b = wb_refs[2 * i + 1][...]                  # (1, out) f32 -> bcast
            h = jnp.dot(h.astype(jnp.bfloat16), w,
                        preferred_element_type=jnp.float32) + b
            if i < num_layers - 1:
                h = jnp.maximum(h, 0.0)
        o_ref[...] = h.astype(o_ref.dtype)

    return kernel


# ---------------------------------------------------------------------------
# Wrapper
# ---------------------------------------------------------------------------
def _round_up(v, m):
    return ((v + m - 1) // m) * m


def _choose_tiling(m):
    """Return (tile_m, m_pad).

    * m < 512: a single grid step (no pipeline prologue/epilogue overhead).
    * otherwise: pick the step count first (tiles capped at 1024 rows), force
      it even so v7x's two TensorCores split the 'parallel' axis evenly, then
      derive the tile from the step count -> row-padding waste < 8 rows per
      step instead of up to a full tile.
    """
    if m < 512:
        tile = _round_up(max(m, 8), 8)
        return tile, tile
    steps = max(2, pl.cdiv(m, 1024))
    if steps % 2:
        steps += 1
    tile = _round_up(pl.cdiv(m, steps), 8)
    return tile, tile * steps


def mlp_pallas(x, params, *, tile_m=None):
    """params: list of (W, b) with W shape (in, out), b shape (out,)."""
    in_dim = params[0][0].shape[0]
    out_dim = params[-1][0].shape[1]
    out_pad = _round_up(max(out_dim, 128), 128)   # lane-dense output block

    lead_shape = x.shape[:-1]
    x2d = x.reshape(-1, x.shape[-1])
    m = x2d.shape[0]

    if tile_m is None:
        tile_m, m_pad = _choose_tiling(m)
    else:
        tile_m = max(8, _round_up(tile_m, 8))
        m_pad = _round_up(m, tile_m)
    if m_pad != m:
        x2d = jnp.pad(x2d, ((0, m_pad - m), (0, 0)))

    # Prepare params: weights -> bf16 once in the wrapper; the last layer is
    # zero-padded to `out_pad` output lanes; biases stay f32 (added post-acc).
    flat_args = []
    wb_shapes = []
    n_layers = len(params)
    for idx, (w, b) in enumerate(params):
        if idx == n_layers - 1 and w.shape[1] < out_pad:
            w = jnp.pad(w, ((0, 0), (0, out_pad - w.shape[1])))
            b = jnp.pad(b, (0, out_pad - b.shape[0]))
        w = w.astype(jnp.bfloat16)
        b = b.astype(jnp.float32).reshape(1, -1)
        flat_args.append(w)
        flat_args.append(b)
        wb_shapes.append((w.shape, b.shape))

    grid = (m_pad // tile_m,)
    kernel = _make_mlp_kernel(n_layers)

    def _call(single_buffer_weights):
        # Weights/biases use constant index_maps, so they are fetched once and
        # stay VMEM-resident; single-buffer them to halve their VMEM footprint.
        wb_kwargs = (dict(pipeline_mode=pl.Buffered(1))
                     if single_buffer_weights else {})
        in_specs = [pl.BlockSpec((tile_m, in_dim), lambda i: (i, 0))]
        for w_shape, b_shape in wb_shapes:
            in_specs.append(pl.BlockSpec(w_shape, lambda i: (0, 0), **wb_kwargs))
            in_specs.append(pl.BlockSpec(b_shape, lambda i: (0, 0), **wb_kwargs))
        return pl.pallas_call(
            kernel,
            out_shape=jax.ShapeDtypeStruct((m_pad, out_pad), x.dtype),
            grid_spec=pltpu.PrefetchScalarGridSpec(
                num_scalar_prefetch=0,
                grid=grid,
                in_specs=in_specs,
                out_specs=pl.BlockSpec((tile_m, out_pad), lambda i: (i, 0)),
            ),
            compiler_params=pltpu.CompilerParams(
                dimension_semantics=("parallel",)),
        )(x2d, *flat_args)

    try:
        out = _call(True)
    except Exception:
        # pipeline_mode / Buffered(1) not supported by this Pallas version:
        # fall back to default double-buffering (correctness unchanged).
        out = _call(False)

    out = out[:m, :out_dim]
    return out.reshape(*lead_shape, out_dim)


# ---------------------------------------------------------------------------
# Params / references
# ---------------------------------------------------------------------------
def init_mlp_params(key, in_channels, hidden_channels_list, out_channels):
    """Deterministic init mimicking nn.Linear default (uniform +-1/sqrt(fan_in))."""
    dims = [in_channels] + list(hidden_channels_list) + [out_channels]
    params = []
    for i in range(len(dims) - 1):
        fan_in, fan_out = dims[i], dims[i + 1]
        key, kw, kb = jax.random.split(key, 3)
        bound = 1.0 / jnp.sqrt(fan_in)
        w = jax.random.uniform(kw, (fan_in, fan_out), jnp.float32, -bound, bound)
        b = jax.random.uniform(kb, (fan_out,), jnp.float32, -bound, bound)
        params.append((w, b))
    return params


def mlp_reference_bf16(x, params):
    """Plain-JAX reference mirroring the kernel math (bf16 matmuls, f32 accum)."""
    lead = x.shape[:-1]
    h = x.reshape(-1, x.shape[-1])
    for i, (w, b) in enumerate(params):
        h = jnp.dot(h.astype(jnp.bfloat16), w.astype(jnp.bfloat16),
                    preferred_element_type=jnp.float32) + b
        if i < len(params) - 1:
            h = jnp.maximum(h, 0.0)
    return h.reshape(*lead, -1)


def mlp_reference_f32(x, params):
    """Full-f32 reference of _MLP.forward (sanity check on bf16 drift)."""
    lead = x.shape[:-1]
    h = x.reshape(-1, x.shape[-1])
    with jax.default_matmul_precision("highest"):
        for i, (w, b) in enumerate(params):
            h = jnp.dot(h, w) + b
            if i < len(params) - 1:
                h = jnp.maximum(h, 0.0)
    return h.reshape(*lead, -1)


# ---------------------------------------------------------------------------
# Test
# ---------------------------------------------------------------------------
if __name__ == "__main__":
    # Dims taken from LTE: self.mlp = _MLP(channels=256, out_channels=3, [256]*3)
    in_channels = 256
    hidden_channels_list = [256, 256, 256]
    out_channels = 3

    key = jax.random.PRNGKey(0)
    kx, kx2, kp = jax.random.split(key, 3)
    params = init_mlp_params(kp, in_channels, hidden_channels_list, out_channels)

    # small case: (batch=2, q=64) query points -> single-grid-step path
    x_small = jax.random.normal(kx, (2, 64, in_channels), dtype=jnp.float32)
    out_small = jax.block_until_ready(mlp_pallas(x_small, params))
    assert out_small.shape == (2, 64, out_channels), out_small.shape
    ref_small = mlp_reference_bf16(x_small, params)
    assert jnp.allclose(out_small, ref_small, atol=1e-3, rtol=1e-3), \
        "small case mismatch vs bf16-math reference"
    ref_small_f32 = mlp_reference_f32(x_small, params)
    assert jnp.allclose(out_small, ref_small_f32, atol=5e-2, rtol=5e-2), \
        "small case drifted too far from f32 reference"

    # larger case: exercises multi-step 'parallel' grid, row padding, and the
    # lane-dense (out padded to 128) store path
    x_large = jax.random.normal(kx2, (2, 3000, in_channels), dtype=jnp.float32)
    out_large = jax.block_until_ready(mlp_pallas(x_large, params))
    assert out_large.shape == (2, 3000, out_channels), out_large.shape
    ref_large = mlp_reference_bf16(x_large, params)
    assert jnp.allclose(out_large, ref_large, atol=1e-3, rtol=1e-3), \
        "large case mismatch vs bf16-math reference"

    print("KERNEL_OK")
</pallas_src>

<mosaic_0001>
module attributes {stable_mosaic.version = 11 : i64} {
  func.func @kernel(%arg0: i32, %arg1: memref<128x256xf32, #tpu.memory_space<vmem>>, %arg2: memref<256x256xbf16, #tpu.memory_space<vmem>>, %arg3: memref<1x256xf32, #tpu.memory_space<vmem>>, %arg4: memref<256x256xbf16, #tpu.memory_space<vmem>>, %arg5: memref<1x256xf32, #tpu.memory_space<vmem>>, %arg6: memref<256x256xbf16, #tpu.memory_space<vmem>>, %arg7: memref<1x256xf32, #tpu.memory_space<vmem>>, %arg8: memref<256x128xbf16, #tpu.memory_space<vmem>>, %arg9: memref<1x128xf32, #tpu.memory_space<vmem>>, %arg10: memref<128x128xf32, #tpu.memory_space<vmem>>) attributes {dimension_semantics = [#tpu.dimension_semantics<parallel>], iteration_bounds = array<i64: 1>, scalar_prefetch = 0 : i64, scratch_operands = 0 : i64, tpu.core_type = #tpu.core_type<tc>, window_params = [{transform_indices = @transform_0, window_bounds = array<i64: 128, 256>}, {pipeline_mode = #tpu.pipeline_mode<synchronous>, transform_indices = @transform_1, window_bounds = array<i64: 256, 256>}, {pipeline_mode = #tpu.pipeline_mode<synchronous>, transform_indices = @transform_2, window_bounds = array<i64: 1, 256>}, {pipeline_mode = #tpu.pipeline_mode<synchronous>, transform_indices = @transform_3, window_bounds = array<i64: 256, 256>}, {pipeline_mode = #tpu.pipeline_mode<synchronous>, transform_indices = @transform_4, window_bounds = array<i64: 1, 256>}, {pipeline_mode = #tpu.pipeline_mode<synchronous>, transform_indices = @transform_5, window_bounds = array<i64: 256, 256>}, {pipeline_mode = #tpu.pipeline_mode<synchronous>, transform_indices = @transform_6, window_bounds = array<i64: 1, 256>}, {pipeline_mode = #tpu.pipeline_mode<synchronous>, transform_indices = @transform_7, window_bounds = array<i64: 256, 128>}, {pipeline_mode = #tpu.pipeline_mode<synchronous>, transform_indices = @transform_8, window_bounds = array<i64: 1, 128>}, {transform_indices = @transform_9, window_bounds = array<i64: 128, 128>}]} {
    %c0 = arith.constant 0 : index
    %c0_0 = arith.constant 0 : index
    %0 = vector.load %arg1[%c0, %c0_0] : memref<128x256xf32, #tpu.memory_space<vmem>>, vector<128x256xf32>
    %c0_1 = arith.constant 0 : index
    %c0_2 = arith.constant 0 : index
    %1 = vector.load %arg2[%c0_1, %c0_2] : memref<256x256xbf16, #tpu.memory_space<vmem>>, vector<256x256xbf16>
    %c0_3 = arith.constant 0 : index
    %c0_4 = arith.constant 0 : index
    %2 = vector.load %arg3[%c0_3, %c0_4] : memref<1x256xf32, #tpu.memory_space<vmem>>, vector<1x256xf32>
    %3 = arith.truncf %0 : vector<128x256xf32> to vector<128x256xbf16>
    %cst = arith.constant dense<0.000000e+00> : vector<128x256xf32>
    %4 = tpu.matmul %3, %1, %cst {dimension_numbers = #tpu.dot_dimension_numbers<[1], [0], [0], [1], [0, 0, 1, 1], [], []>} : vector<128x256xbf16>, vector<256x256xbf16>, vector<128x256xf32> -> vector<128x256xf32>
    %5 = vector.broadcast %2 : vector<1x256xf32> to vector<128x256xf32>
    %6 = arith.addf %4, %5 : vector<128x256xf32>
    %cst_5 = arith.constant 0.000000e+00 : f32
    %7 = vector.broadcast %cst_5 : f32 to vector<128x256xf32>
    %8 = arith.maximumf %6, %7 : vector<128x256xf32>
    %c0_6 = arith.constant 0 : index
    %c0_7 = arith.constant 0 : index
    %9 = vector.load %arg4[%c0_6, %c0_7] : memref<256x256xbf16, #tpu.memory_space<vmem>>, vector<256x256xbf16>
    %c0_8 = arith.constant 0 : index
    %c0_9 = arith.constant 0 : index
    %10 = vector.load %arg5[%c0_8, %c0_9] : memref<1x256xf32, #tpu.memory_space<vmem>>, vector<1x256xf32>
    %11 = arith.truncf %8 : vector<128x256xf32> to vector<128x256xbf16>
    %cst_10 = arith.constant dense<0.000000e+00> : vector<128x256xf32>
    %12 = tpu.matmul %11, %9, %cst_10 {dimension_numbers = #tpu.dot_dimension_numbers<[1], [0], [0], [1], [0, 0, 1, 1], [], []>} : vector<128x256xbf16>, vector<256x256xbf16>, vector<128x256xf32> -> vector<128x256xf32>
    %13 = vector.broadcast %10 : vector<1x256xf32> to vector<128x256xf32>
    %14 = arith.addf %12, %13 : vector<128x256xf32>
    %cst_11 = arith.constant 0.000000e+00 : f32
    %15 = vector.broadcast %cst_11 : f32 to vector<128x256xf32>
    %16 = arith.maximumf %14, %15 : vector<128x256xf32>
    %c0_12 = arith.constant 0 : index
    %c0_13 = arith.constant 0 : index
    %17 = vector.load %arg6[%c0_12, %c0_13] : memref<256x256xbf16, #tpu.memory_space<vmem>>, vector<256x256xbf16>
    %c0_14 = arith.constant 0 : index
    %c0_15 = arith.constant 0 : index
    %18 = vector.load %arg7[%c0_14, %c0_15] : memref<1x256xf32, #tpu.memory_space<vmem>>, vector<1x256xf32>
    %19 = arith.truncf %16 : vector<128x256xf32> to vector<128x256xbf16>
    %cst_16 = arith.constant dense<0.000000e+00> : vector<128x256xf32>
    %20 = tpu.matmul %19, %17, %cst_16 {dimension_numbers = #tpu.dot_dimension_numbers<[1], [0], [0], [1], [0, 0, 1, 1], [], []>} : vector<128x256xbf16>, vector<256x256xbf16>, vector<128x256xf32> -> vector<128x256xf32>
    %21 = vector.broadcast %18 : vector<1x256xf32> to vector<128x256xf32>
    %22 = arith.addf %20, %21 : vector<128x256xf32>
    %cst_17 = arith.constant 0.000000e+00 : f32
    %23 = vector.broadcast %cst_17 : f32 to vector<128x256xf32>
    %24 = arith.maximumf %22, %23 : vector<128x256xf32>
    %c0_18 = arith.constant 0 : index
    %c0_19 = arith.constant 0 : index
    %25 = vector.load %arg8[%c0_18, %c0_19] : memref<256x128xbf16, #tpu.memory_space<vmem>>, vector<256x128xbf16>
    %c0_20 = arith.constant 0 : index
    %c0_21 = arith.constant 0 : index
    %26 = vector.load %arg9[%c0_20, %c0_21] : memref<1x128xf32, #tpu.memory_space<vmem>>, vector<1x128xf32>
    %27 = arith.truncf %24 : vector<128x256xf32> to vector<128x256xbf16>
    %cst_22 = arith.constant dense<0.000000e+00> : vector<128x128xf32>
    %28 = tpu.matmul %27, %25, %cst_22 {dimension_numbers = #tpu.dot_dimension_numbers<[1], [0], [0], [1], [0, 0, 1, 1], [], []>} : vector<128x256xbf16>, vector<256x128xbf16>, vector<128x128xf32> -> vector<128x128xf32>
    %29 = vector.broadcast %26 : vector<1x128xf32> to vector<128x128xf32>
    %30 = arith.addf %28, %29 : vector<128x128xf32>
    %c0_23 = arith.constant 0 : index
    %c0_24 = arith.constant 0 : index
    %31 = vector.load %arg10[%c0_23, %c0_24] : memref<128x128xf32, #tpu.memory_space<vmem>>, vector<128x128xf32>
    tpu.vector_store %arg10[%c0_23, %c0_24], %30 {strides = array<i32>} : memref<128x128xf32, #tpu.memory_space<vmem>>, vector<128x128xf32>,
    return
  }
  func.func @transform_0(%arg0: i32) -> (i32, i32) {
    %c0_i32 = arith.constant 0 : i32
    %c0_i32_0 = arith.constant 0 : i32
    return %arg0, %c0_i32 : i32, i32
  }
  func.func @transform_1(%arg0: i32) -> (i32, i32) {
    %c0_i32 = arith.constant 0 : i32
    %c0_i32_0 = arith.constant 0 : i32
    %c0_i32_1 = arith.constant 0 : i32
    return %c0_i32, %c0_i32_0 : i32, i32
  }
  func.func @transform_2(%arg0: i32) -> (i32, i32) {
    %c0_i32 = arith.constant 0 : i32
    %c0_i32_0 = arith.constant 0 : i32
    %c0_i32_1 = arith.constant 0 : i32
    return %c0_i32, %c0_i32_0 : i32, i32
  }
  func.func @transform_3(%arg0: i32) -> (i32, i32) {
    %c0_i32 = arith.constant 0 : i32
    %c0_i32_0 = arith.constant 0 : i32
    %c0_i32_1 = arith.constant 0 : i32
    return %c0_i32, %c0_i32_0 : i32, i32
  }
  func.func @transform_4(%arg0: i32) -> (i32, i32) {
    %c0_i32 = arith.constant 0 : i32
    %c0_i32_0 = arith.constant 0 : i32
    %c0_i32_1 = arith.constant 0 : i32
    return %c0_i32, %c0_i32_0 : i32, i32
  }
  func.func @transform_5(%arg0: i32) -> (i32, i32) {
    %c0_i32 = arith.constant 0 : i32
    %c0_i32_0 = arith.constant 0 : i32
    %c0_i32_1 = arith.constant 0 : i32
    return %c0_i32, %c0_i32_0 : i32, i32
  }
  func.func @transform_6(%arg0: i32) -> (i32, i32) {
    %c0_i32 = arith.constant 0 : i32
    %c0_i32_0 = arith.constant 0 : i32
    %c0_i32_1 = arith.constant 0 : i32
    return %c0_i32, %c0_i32_0 : i32, i32
  }
  func.func @transform_7(%arg0: i32) -> (i32, i32) {
    %c0_i32 = arith.constant 0 : i32
    %c0_i32_0 = arith.constant 0 : i32
    %c0_i32_1 = arith.constant 0 : i32
    return %c0_i32, %c0_i32_0 : i32, i32
  }
  func.func @transform_8(%arg0: i32) -> (i32, i32) {
    %c0_i32 = arith.constant 0 : i32
    %c0_i32_0 = arith.constant 0 : i32
    %c0_i32_1 = arith.constant 0 : i32
    return %c0_i32, %c0_i32_0 : i32, i32
  }
  func.func @transform_9(%arg0: i32) -> (i32, i32) {
    %c0_i32 = arith.constant 0 : i32
    %c0_i32_0 = arith.constant 0 : i32
    return %arg0, %c0_i32 : i32, i32
  }
}

module attributes {stable_mosaic.version = 11 : i64} {
  func.func @kernel(%arg0: i32, %arg1: memref<128x256xf32, #tpu.memory_space<vmem>>, %arg2: memref<256x256xbf16, #tpu.memory_space<vmem>>, %arg3: memref<1x256xf32, #tpu.memory_space<vmem>>, %arg4: memref<256x256xbf16, #tpu.memory_space<vmem>>, %arg5: memref<1x256xf32, #tpu.memory_space<vmem>>, %arg6: memref<256x256xbf16, #tpu.memory_space<vmem>>, %arg7: memref<1x256xf32, #tpu.memory_space<vmem>>, %arg8: memref<256x128xbf16, #tpu.memory_space<vmem>>, %arg9: memref<1x128xf32, #tpu.memory_space<vmem>>, %arg10: memref<128x128xf32, #tpu.memory_space<vmem>>) attributes {dimension_semantics = [#tpu.dimension_semantics<parallel>], iteration_bounds = array<i64: 1>, scalar_prefetch = 0 : i64, scratch_operands = 0 : i64, tpu.core_type = #tpu.core_type<tc>, window_params = [{transform_indices = @transform_0, window_bounds = array<i64: 128, 256>}, {pipeline_mode = #tpu.pipeline_mode<synchronous>, transform_indices = @transform_1, window_bounds = array<i64: 256, 256>}, {pipeline_mode = #tpu.pipeline_mode<synchronous>, transform_indices = @transform_2, window_bounds = array<i64: 1, 256>}, {pipeline_mode = #tpu.pipeline_mode<synchronous>, transform_indices = @transform_3, window_bounds = array<i64: 256, 256>}, {pipeline_mode = #tpu.pipeline_mode<synchronous>, transform_indices = @transform_4, window_bounds = array<i64: 1, 256>}, {pipeline_mode = #tpu.pipeline_mode<synchronous>, transform_indices = @transform_5, window_bounds = array<i64: 256, 256>}, {pipeline_mode = #tpu.pipeline_mode<synchronous>, transform_indices = @transform_6, window_bounds = array<i64: 1, 256>}, {pipeline_mode = #tpu.pipeline_mode<synchronous>, transform_indices = @transform_7, window_bounds = array<i64: 256, 128>}, {pipeline_mode = #tpu.pipeline_mode<synchronous>, transform_indices = @transform_8, window_bounds = array<i64: 1, 128>}, {transform_indices = @transform_9, window_bounds = array<i64: 128, 128>}]} {
    %c0 = arith.constant 0 : index
    %c0_0 = arith.constant 0 : index
    %0 = vector.load %arg1[%c0, %c0_0] : memref<128x256xf32, #tpu.memory_space<vmem>>, vector<128x256xf32>
    %c0_1 = arith.constant 0 : index
    %c0_2 = arith.constant 0 : index
    %1 = vector.load %arg2[%c0_1, %c0_2] : memref<256x256xbf16, #tpu.memory_space<vmem>>, vector<256x256xbf16>
    %c0_3 = arith.constant 0 : index
    %c0_4 = arith.constant 0 : index
    %2 = vector.load %arg3[%c0_3, %c0_4] : memref<1x256xf32, #tpu.memory_space<vmem>>, vector<1x256xf32>
    %3 = arith.truncf %0 : vector<128x256xf32> to vector<128x256xbf16>
    %cst = arith.constant dense<0.000000e+00> : vector<128x256xf32>
    %4 = tpu.matmul %3, %1, %cst {dimension_numbers = #tpu.dot_dimension_numbers<[1], [0], [0], [1], [0, 0, 1, 1], [], []>} : vector<128x256xbf16>, vector<256x256xbf16>, vector<128x256xf32> -> vector<128x256xf32>
    %5 = vector.broadcast %2 : vector<1x256xf32> to vector<128x256xf32>
    %6 = arith.addf %4, %5 : vector<128x256xf32>
    %cst_5 = arith.constant 0.000000e+00 : f32
    %7 = vector.broadcast %cst_5 : f32 to vector<128x256xf32>
    %8 = arith.maximumf %6, %7 : vector<128x256xf32>
    %c0_6 = arith.constant 0 : index
    %c0_7 = arith.constant 0 : index
    %9 = vector.load %arg4[%c0_6, %c0_7] : memref<256x256xbf16, #tpu.memory_space<vmem>>, vector<256x256xbf16>
    %c0_8 = arith.constant 0 : index
    %c0_9 = arith.constant 0 : index
    %10 = vector.load %arg5[%c0_8, %c0_9] : memref<1x256xf32, #tpu.memory_space<vmem>>, vector<1x256xf32>
    %11 = arith.truncf %8 : vector<128x256xf32> to vector<128x256xbf16>
    %cst_10 = arith.constant dense<0.000000e+00> : vector<128x256xf32>
    %12 = tpu.matmul %11, %9, %cst_10 {dimension_numbers = #tpu.dot_dimension_numbers<[1], [0], [0], [1], [0, 0, 1, 1], [], []>} : vector<128x256xbf16>, vector<256x256xbf16>, vector<128x256xf32> -> vector<128x256xf32>
    %13 = vector.broadcast %10 : vector<1x256xf32> to vector<128x256xf32>
    %14 = arith.addf %12, %13 : vector<128x256xf32>
    %cst_11 = arith.constant 0.000000e+00 : f32
    %15 = vector.broadcast %cst_11 : f32 to vector<128x256xf32>
    %16 = arith.maximumf %14, %15 : vector<128x256xf32>
    %c0_12 = arith.constant 0 : index
    %c0_13 = arith.constant 0 : index
    %17 = vector.load %arg6[%c0_12, %c0_13] : memref<256x256xbf16, #tpu.memory_space<vmem>>, vector<256x256xbf16>
    %c0_14 = arith.constant 0 : index
    %c0_15 = arith.constant 0 : index
    %18 = vector.load %arg7[%c0_14, %c0_15] : memref<1x256xf32, #tpu.memory_space<vmem>>, vector<1x256xf32>
    %19 = arith.truncf %16 : vector<128x256xf32> to vector<128x256xbf16>
    %cst_16 = arith.constant dense<0.000000e+00> : vector<128x256xf32>
    %20 = tpu.matmul %19, %17, %cst_16 {dimension_numbers = #tpu.dot_dimension_numbers<[1], [0], [0], [1], [0, 0, 1, 1], [], []>} : vector<128x256xbf16>, vector<256x256xbf16>, vector<128x256xf32> -> vector<128x256xf32>
    %21 = vector.broadcast %18 : vector<1x256xf32> to vector<128x256xf32>
    %22 = arith.addf %20, %21 : vector<128x256xf32>
    %cst_17 = arith.constant 0.000000e+00 : f32
    %23 = vector.broadcast %cst_17 : f32 to vector<128x256xf32>
    %24 = arith.maximumf %22, %23 : vector<128x256xf32>
    %c0_18 = arith.constant 0 : index
    %c0_19 = arith.constant 0 : index
    %25 = vector.load %arg8[%c0_18, %c0_19] : memref<256x128xbf16, #tpu.memory_space<vmem>>, vector<256x128xbf16>
    %c0_20 = arith.constant 0 : index
    %c0_21 = arith.constant 0 : index
    %26 = vector.load %arg9[%c0_20, %c0_21] : memref<1x128xf32, #tpu.memory_space<vmem>>, vector<1x128xf32>
    %27 = arith.truncf %24 : vector<128x256xf32> to vector<128x256xbf16>
    %cst_22 = arith.constant dense<0.000000e+00> : vector<128x128xf32>
    %28 = tpu.matmul %27, %25, %cst_22 {dimension_numbers = #tpu.dot_dimension_numbers<[1], [0], [0], [1], [0, 0, 1, 1], [], []>} : vector<128x256xbf16>, vector<256x128xbf16>, vector<128x128xf32> -> vector<128x128xf32>
    %29 = vector.broadcast %26 : vector<1x128xf32> to vector<128x128xf32>
    %30 = arith.addf %28, %29 : vector<128x128xf32>
    %c0_23 = arith.constant 0 : index
    %c0_24 = arith.constant 0 : index
    %31 = vector.load %arg10[%c0_23, %c0_24] : memref<128x128xf32, #tpu.memory_space<vmem>>, vector<128x128xf32>
    tpu.vector_store %arg10[%c0_23, %c0_24], %30 {strides = array<i32>} : memref<128x128xf32, #tpu.memory_space<vmem>>, vector<128x128xf32>,
    return
  }
  func.func @transform_0(%arg0: i32) -> (i32, i32) {
    %c0_i32 = arith.constant 0 : i32
    %c0_i32_0 = arith.constant 0 : i32
    return %arg0, %c0_i32 : i32, i32
  }
  func.func @transform_1(%arg0: i32) -> (i32, i32) {
    %c0_i32 = arith.constant 0 : i32
    %c0_i32_0 = arith.constant 0 : i32
    %c0_i32_1 = arith.constant 0 : i32
    return %c0_i32, %c0_i32_0 : i32, i32
  }
  func.func @transform_2(%arg0: i32) -> (i32, i32) {
    %c0_i32 = arith.constant 0 : i32
    %c0_i32_0 = arith.constant 0 : i32
    %c0_i32_1 = arith.constant 0 : i32
    return %c0_i32, %c0_i32_0 : i32, i32
  }
  func.func @transform_3(%arg0: i32) -> (i32, i32) {
    %c0_i32 = arith.constant 0 : i32
    %c0_i32_0 = arith.constant 0 : i32
    %c0_i32_1 = arith.constant 0 : i32
    return %c0_i32, %c0_i32_0 : i32, i32
  }
  func.func @transform_4(%arg0: i32) -> (i32, i32) {
    %c0_i32 = arith.constant 0 : i32
    %c0_i32_0 = arith.constant 0 : i32
    %c0_i32_1 = arith.constant 0 : i32
    return %c0_i32, %c0_i32_0 : i32, i32
  }
  func.func @transform_5(%arg0: i32) -> (i32, i32) {
    %c0_i32 = arith.constant 0 : i32
    %c0_i32_0 = arith.constant 0 : i32
    %c0_i32_1 = arith.constant 0 : i32
    return %c0_i32, %c0_i32_0 : i32, i32
  }
  func.func @transform_6(%arg0: i32) -> (i32, i32) {
    %c0_i32 = arith.constant 0 : i32
    %c0_i32_0 = arith.constant 0 : i32
    %c0_i32_1 = arith.constant 0 : i32
    return %c0_i32, %c0_i32_0 : i32, i32
  }
  func.func @transform_7(%arg0: i32) -> (i32, i32) {
    %c0_i32 = arith.constant 0 : i32
    %c0_i32_0 = arith.constant 0 : i32
    %c0_i32_1 = arith.constant 0 : i32
    return %c0_i32, %c0_i32_0 : i32, i32
  }
  func.func @transform_8(%arg0: i32) -> (i32, i32) {
    %c0_i32 = arith.constant 0 : i32
    %c0_i32_0 = arith.constant 0 : i32
    %c0_i32_1 = arith.constant 0 : i32
    return %c0_i32, %c0_i32_0 : i32, i32
  }
  func.func @transform_9(%arg0: i32) -> (i32, i32) {
    %c0_i32 = arith.constant 0 : i32
    %c0_i32_0 = arith.constant 0 : i32
    return %arg0, %c0_i32 : i32, i32
  }
}

</mosaic_0001>

<bundles_post_ra>
// kernel: tpu_custom_call.1
= control target key start
LH: loop header
LB: loop body
LE: loop exit
PB: predicated region body
PF: predicated region fallthrough
CT: control target
= control target key end

     0   :  { %14 = vsyncpa [#allocation3], 0  ;;  %s2295_s0 = inlined_call_operand.hbm [shape: f32[128,256], index: 0, kind: input, shape index: {}]   ;;  %s2296_s1 = inlined_call_operand.hbm [shape: bf16[256,256], index: 1, kind: input, shape index: {}]   ;;  %s2297_s2 = inlined_call_operand.vmem [shape: f32[1,256], index: 2, kind: input, shape index: {}]   ;;  %s2298_s3 = inlined_call_operand.hbm [shape: bf16[256,256], index: 3, kind: input, shape index: {}]   ;;  %s2299_s4 = inlined_call_operand.vmem [shape: f32[1,256], index: 4, kind: input, shape index: {}]   ;;  %s2300_s5 = inlined_call_operand.hbm [shape: bf16[256,256], index: 5, kind: input, shape index: {}]   ;;  %s2301_s6 = inlined_call_operand.vmem [shape: f32[1,256], index: 6, kind: input, shape index: {}]   ;;  %s2302_s7 = inlined_call_operand.hbm [shape: bf16[256,128], index: 7, kind: input, shape index: {}]   ;;  %s2303_s8 = inlined_call_operand.vmem [shape: f32[1,128], index: 8, kind: input, shape index: {}]   ;;  %s2304_s9 = inlined_call_operand.hbm [shape: f32[128,128], index: 9, kind: output, shape index: {}]  }
   0x1   :  { %15 = vsyncpa [#allocation6], 0 }
   0x2   :  { %16 = vsyncpa [#allocation9], 0 }
   0x3   :  { %17 = vsyncpa [#allocation4], 0  ;;  %s2001_s30 = smov [#allocation5]   ;;  %s1861_s13 = scalar_lea.hbm %s2296_s1, 4096 }
   0x4   :  { %s35_s10 = sshll.u32 %s2001_s30, 4  ;;  %p1862_p0 = scmp.ne.s32.totalorder %s2296_s1, %s1861_s13  ;;  %s36_s10 = int_to_ptr.vmem [resolvable:$true] %s35_s10 }
   0x5   :  { %p1865_p1 = scmp.lt.u32.totalorder %s1861_s13, %s2296_s1 }
   0x7   :  { %p1867_p2 = pnand %p1865_p1, %p1862_p0 }
   0x9   :  { %1870 = shalt.err (!%p1867_p2)
}
   0xa   :  { %s1871_s18 = scalar_lea.vmem %s36_s10, 4096  ;;  %p1876_p4 = scmp.lt.s32.totalorder %s36_s10, %s36_s10 }
   0xb   :  { %p1872_p3 = scmp.ne.s32.totalorder %s36_s10, %s1871_s18  ;;  %p1877_p5 = scmp.lt.s32.totalorder %s1871_s18, %s1871_s18 }
   0xd   :  { %p1878_p6 = por %p1877_p5, %p1876_p4 }
   0xf   :  { %p1879_p7 = pnand %p1878_p6, %p1872_p3 }
  0x11   :  { %1882 = shalt.err (!%p1879_p7)
}
  0x12   :  { %s2002_s19 = smov 128   ;;  %s2003_s20 = smov 8  }
  0x13   :  { %41 = dma.hbm_to_vmem [thread:$0]  %s2296_s1, 4096, %s36_s10, [#allocation6], %s2002_s19, %s2002_s19, %s2003_s20  }
  0x14   :  { %s2004_s23 = smov [#allocation8]   ;;  %s2005_s25 = smov [#allocation2]  }
  0x15   :  { %s63_s24 = sshll.u32 %s2004_s23, 4  ;;  %s23_s26 = sshll.u32 %s2005_s25, 4  ;;  %s64_s24 = int_to_ptr.vmem [resolvable:$true] %s63_s24  ;;  %s24_s26 = int_to_ptr.vmem [resolvable:$true] %s23_s26 }
  0x16   :  { %s1883_s29 = scalar_lea.hbm %s2300_s5, 4096 }
  0x17   :  { %p1884_p8 = scmp.ne.s32.totalorder %s2300_s5, %s1883_s29  ;;  %p1887_p9 = scmp.lt.u32.totalorder %s1883_s29, %s2300_s5 }
  0x19   :  { %p1889_p10 = pnand %p1887_p9, %p1884_p8 }
  0x1b   :  { %1892 = shalt.err (!%p1889_p10)
}
  0x1c   :  { %s1893_s1 = scalar_lea.vmem %s64_s24, 4096  ;;  %p1898_p12 = scmp.lt.s32.totalorder %s64_s24, %s64_s24 }
  0x1d   :  { %p1894_p11 = scmp.ne.s32.totalorder %s64_s24, %s1893_s1  ;;  %p1899_p13 = scmp.lt.s32.totalorder %s1893_s1, %s1893_s1 }
  0x1f   :  { %p1900_p0 = por %p1899_p13, %p1898_p12 }
  0x21   :  { %p1901_p1 = pnand %p1900_p0, %p1894_p11 }
  0x23   :  { %1904 = shalt.err (!%p1901_p1)
}
  0x24   :  { %69 = dma.hbm_to_vmem [thread:$0]  %s2300_s5, 4096, %s64_s24, [#allocation9], %s2002_s19, %s2002_s19, %s2003_s20  }
  0x25   :  { %s1905_s17 = scalar_lea.hbm %s2295_s0, 4096 }
  0x26   :  { %p1906_p2 = scmp.ne.s32.totalorder %s2295_s0, %s1905_s17  ;;  %p1909_p3 = scmp.lt.u32.totalorder %s1905_s17, %s2295_s0 }
  0x28   :  { %p1911_p4 = pnand %p1909_p3, %p1906_p2 }
  0x2a   :  { %1914 = shalt.err (!%p1911_p4)
}
  0x2b   :  { %s1915_s25 = scalar_lea.vmem %s24_s26, 4096  ;;  %p1920_p6 = scmp.lt.s32.totalorder %s24_s26, %s24_s26 }
  0x2c   :  { %p1916_p5 = scmp.ne.s32.totalorder %s24_s26, %s1915_s25  ;;  %p1921_p7 = scmp.lt.s32.totalorder %s1915_s25, %s1915_s25 }
  0x2e   :  { %p1922_p8 = por %p1921_p7, %p1920_p6 }
  0x30   :  { %p1923_p9 = pnand %p1922_p8, %p1916_p5 }
  0x32   :  { %1926 = shalt.err (!%p1923_p9)
}
  0x33   :  { %s2006_s5 = smov 256   ;;  %s2007_s24 = smov 16  }
  0x34   :  { %29 = dma.hbm_to_vmem [thread:$0]  %s2295_s0, 4096, %s24_s26, [#allocation3], %s2006_s5, %s2006_s5, %s2007_s24  }
  0x35   :  { %s2008_s29 = smov [#allocation7]   ;;  %s2009_s11 = smov [#allocation10]  }
  0x36   :  { %s49_s30 = sshll.u32 %s2008_s29, 4  ;;  %s77_s12 = sshll.u32 %s2009_s11, 4  ;;  %s50_s30 = int_to_ptr.vmem [resolvable:$true] %s49_s30  ;;  %s78_s12 = int_to_ptr.vmem [resolvable:$true] %s77_s12 }
  0x37   :  { %s1927_s10 = scalar_lea.hbm %s2298_s3, 4096 }
  0x38   :  { %p1928_p10 = scmp.ne.s32.totalorder %s2298_s3, %s1927_s10  ;;  %p1931_p11 = scmp.lt.u32.totalorder %s1927_s10, %s2298_s3 }
  0x3a   :  { %p1933_p12 = pnand %p1931_p11, %p1928_p10 }
  0x3c   :  { %1936 = shalt.err (!%p1933_p12)
}
  0x3d   :  { %s1937_s0 = scalar_lea.vmem %s50_s30, 4096  ;;  %p1942_p0 = scmp.lt.s32.totalorder %s50_s30, %s50_s30 }
  0x3e   :  { %p1938_p13 = scmp.ne.s32.totalorder %s50_s30, %s1937_s0  ;;  %p1943_p1 = scmp.lt.s32.totalorder %s1937_s0, %s1937_s0 }
  0x40   :  { %p1944_p2 = por %p1943_p1, %p1942_p0 }
  0x42   :  { %p1945_p3 = pnand %p1944_p2, %p1938_p13 }
  0x44   :  { %1948 = shalt.err (!%p1945_p3)
}
  0x45   :  { %55 = dma.hbm_to_vmem [thread:$0]  %s2298_s3, 4096, %s50_s30, [#allocation6], %s2002_s19, %s2002_s19, %s2003_s20  }
  0x46   :  { %s1949_s23 = scalar_lea.hbm %s2302_s7, 2048 }
  0x47   :  { %p1950_p4 = scmp.ne.s32.totalorder %s2302_s7, %s1949_s23  ;;  %p1953_p5 = scmp.lt.u32.totalorder %s1949_s23, %s2302_s7 }
  0x49   :  { %p1955_p6 = pnand %p1953_p5, %p1950_p4 }
  0x4b   :  { %1958 = shalt.err (!%p1955_p6)
}
  0x4c   :  { %s1959_s28 = scalar_lea.vmem %s78_s12, 2048  ;;  %p1964_p8 = scmp.lt.s32.totalorder %s78_s12, %s78_s12 }
  0x4d   :  { %p1960_p7 = scmp.ne.s32.totalorder %s78_s12, %s1959_s28  ;;  %p1965_p9 = scmp.lt.s32.totalorder %s1959_s28, %s1959_s28 }
  0x4f   :  { %p1966_p10 = por %p1965_p9, %p1964_p8 }
  0x51   :  { %p1967_p11 = pnand %p1966_p10, %p1960_p7 }
  0x53   :  { %1970 = shalt.err (!%p1967_p11)
}
  0x54   :  { %s2010_s3 = smov 64   ;;  %s2011_s29 = smov 4  }
  0x55   :  { %83 = dma.hbm_to_vmem [thread:$0]  %s2302_s7, 2048, %s78_s12, [#allocation9], %s2010_s3, %s2010_s3, %s2011_s29  }
  0x56   :  { %1993 = dma.done.wait [#allocation3], 4096  }
  0x57   :  { %1994 = vsyncadd [#allocation3], 4294963200 }
  0x58   :  { %1995 = dma.done.wait [#allocation6], 8192  }
  0x59   :  { %1996 = vsyncadd [#allocation6], 4294959104 }
  0x5a   :  { %1997 = dma.done.wait [#allocation9], 6144  }
  0x5b   :  { %1998 = vsyncadd [#allocation9], 4294961152  ;;  %v1701_v0 = vld [vmem:[#allocation5 + $0x4] ss:$8 sps:$4 sm:$0xff]   ;;  %v1703_v1 = vld [vmem:[#allocation5] ss:$8 sps:$4 sm:$0xff]  }
  0x5c   :  { %354 = vmatprep.subr.bf16.mxu0 %v1701_v0  ;;  %v1704_v2 = vld [vmem:[#allocation5 + $0x14] ss:$8 sps:$4 sm:$0xff]   ;;  %v1706_v3 = vld [vmem:[#allocation5 + $0x10] ss:$8 sps:$4 sm:$0xff]   ;;  %v1707_v4 = vld [vmem:[#allocation5 + $0x24] ss:$8 sps:$4 sm:$0xff]  }
  0x5d   :  { %355 = vmatpush1.bf16.msra.mxu0 %v1703_v1  ;;  %v1709_v5 = vld [vmem:[#allocation5 + $0x20] ss:$8 sps:$4 sm:$0xff]   ;;  %v1710_v6 = vld [vmem:[#allocation5 + $0x34] ss:$8 sps:$4 sm:$0xff]   ;;  %v1712_v7 = vld [vmem:[#allocation5 + $0x30] ss:$8 sps:$4 sm:$0xff]  }
  0x5e   :  { %356 = vmatprep.subr.bf16.mxu0 %v1704_v2  ;;  %v1713_v8 = vld [vmem:[#allocation5 + $0x44] ss:$8 sps:$4 sm:$0xff]   ;;  %v1715_v9 = vld [vmem:[#allocation5 + $0x40] ss:$8 sps:$4 sm:$0xff]   ;;  %v1716_v10 = vld [vmem:[#allocation5 + $0x54] ss:$8 sps:$4 sm:$0xff]  }
  0x5f   :  { %v1718_v11 = vld [vmem:[#allocation5 + $0x50] ss:$8 sps:$4 sm:$0xff]   ;;  %v1719_v12 = vld [vmem:[#allocation5 + $0x64] ss:$8 sps:$4 sm:$0xff]   ;;  %v1721_v16 = vld [vmem:[#allocation5 + $0x60] ss:$8 sps:$4 sm:$0xff]  }
  0x60   :  { %v103_v13 = vld [vmem:[#allocation2 + $0x8] sm:$0xff]  ;;  %v105_v14 = vld [vmem:[#allocation2 + $0x18] sm:$0xff]  ;;  %v102_v50 = vld [vmem:[#allocation2] sm:$0xff] }
  0x61   :  { %357 = vmatpush1.bf16.msra.mxu0 %v1706_v3  ;;  %v168_v15 = vpack.c.bf16 %v105_v14, %v103_v13  ;;  %v1722_v17 = vld [vmem:[#allocation5 + $0x74] ss:$8 sps:$4 sm:$0xff]   ;;  %v1724_v18 = vld [vmem:[#allocation5 + $0x70] ss:$8 sps:$4 sm:$0xff]   ;;  %v1725_v19 = vld [vmem:[#allocation5 + $0x84] ss:$8 sps:$4 sm:$0xff]  }
  0x62   :  { %358 = vmatprep.subr.bf16.mxu0 %v1707_v4  ;;  %v1727_v20 = vld [vmem:[#allocation5 + $0x80] ss:$8 sps:$4 sm:$0xff]   ;;  %v1728_v21 = vld [vmem:[#allocation5 + $0x94] ss:$8 sps:$4 sm:$0xff]   ;;  %v1749_v22 = vld [vmem:[#allocation7 + $0x4] ss:$8 sps:$4 sm:$0xff]  }
  0x63   :  { %386 = vmatprep.mubr.bf16.mxu0 %v168_v15  ;;  %v1751_v23 = vld [vmem:[#allocation7] ss:$8 sps:$4 sm:$0xff]   ;;  %v1730_v24 = vld [vmem:[#allocation5 + $0x90] ss:$8 sps:$4 sm:$0xff]   ;;  %719 = vmatprep.subr.bf16.mxu1 %v1749_v22  ;;  %v1752_v25 = vld [vmem:[#allocation7 + $0x14] ss:$8 sps:$4 sm:$0xff]  }
  0x64   :  { %v1731_v26 = vld [vmem:[#allocation5 + $0xa4] ss:$8 sps:$4 sm:$0xff]   ;;  %720 = vmatpush1.bf16.msra.mxu1 %v1751_v23  ;;  %v1754_v27 = vld [vmem:[#allocation7 + $0x10] ss:$8 sps:$4 sm:$0xff]   ;;  %v1733_v29 = vld [vmem:[#allocation5 + $0xa0] ss:$8 sps:$4 sm:$0xff]  }
  0x65   :  { %359 = vmatpush1.bf16.msra.mxu0 %v1709_v5  ;;  %721 = vmatprep.subr.bf16.mxu1 %v1752_v25  ;;  %v1755_v28 = vld [vmem:[#allocation7 + $0x24] ss:$8 sps:$4 sm:$0xff]   ;;  %v1734_v30 = vld [vmem:[#allocation5 + $0xb4] ss:$8 sps:$4 sm:$0xff]   ;;  %v1757_v31 = vld [vmem:[#allocation7 + $0x20] ss:$8 sps:$4 sm:$0xff]  }
  0x66   :  { %360 = vmatprep.subr.bf16.mxu0 %v1710_v6  ;;  %v1758_v32 = vld [vmem:[#allocation7 + $0x34] ss:$8 sps:$4 sm:$0xff]   ;;  %v1736_v33 = vld [vmem:[#allocation5 + $0xb0] ss:$8 sps:$4 sm:$0xff]   ;;  %v1737_v34 = vld [vmem:[#allocation5 + $0xc4] ss:$8 sps:$4 sm:$0xff]  }
  0x67   :  { %v1760_v35 = vld [vmem:[#allocation7 + $0x30] ss:$8 sps:$4 sm:$0xff]   ;;  %v1761_v36 = vld [vmem:[#allocation7 + $0x44] ss:$8 sps:$4 sm:$0xff]   ;;  %v1739_v37 = vld [vmem:[#allocation5 + $0xc0] ss:$8 sps:$4 sm:$0xff]  }
  0x68   :  { %722 = vmatpush1.bf16.msra.mxu1 %v1754_v27  ;;  %v1740_v38 = vld [vmem:[#allocation5 + $0xd4] ss:$8 sps:$4 sm:$0xff]   ;;  %v1763_v39 = vld [vmem:[#allocation7 + $0x40] ss:$8 sps:$4 sm:$0xff]   ;;  %v1742_v41 = vld [vmem:[#allocation5 + $0xd0] ss:$8 sps:$4 sm:$0xff]  }
  0x69   :  { %361 = vmatpush1.bf16.msra.mxu0 %v1712_v7  ;;  %723 = vmatprep.subr.bf16.mxu1 %v1755_v28  ;;  %v1764_v40 = vld [vmem:[#allocation7 + $0x54] ss:$8 sps:$4 sm:$0xff]   ;;  %v1743_v42 = vld [vmem:[#allocation5 + $0xe4] ss:$8 sps:$4 sm:$0xff]   ;;  %v1766_v43 = vld [vmem:[#allocation7 + $0x50] ss:$8 sps:$4 sm:$0xff]  }
  0x6a   :  { %362 = vmatprep.subr.bf16.mxu0 %v1713_v8  ;;  %v1767_v44 = vld [vmem:[#allocation7 + $0x64] ss:$8 sps:$4 sm:$0xff]   ;;  %v1745_v45 = vld [vmem:[#allocation5 + $0xe0] ss:$8 sps:$4 sm:$0xff]   ;;  %v1746_v47 = vld [vmem:[#allocation5 + $0xf4] ss:$8 sps:$4 sm:$0xff]  }
  0x6b   :  { %v1769_v46 = vld [vmem:[#allocation7 + $0x60] ss:$8 sps:$4 sm:$0xff]   ;;  %v1770_v48 = vld [vmem:[#allocation7 + $0x74] ss:$8 sps:$4 sm:$0xff]   ;;  %v1748_v49 = vld [vmem:[#allocation5 + $0xf0] ss:$8 sps:$4 sm:$0xff]  }
  0x6c   :  { %724 = vmatpush1.bf16.msra.mxu1 %v1757_v31  ;;  %v104_v51 = vld [vmem:[#allocation2 + $0x10] sm:$0xff]  ;;  %v107_v53 = vld [vmem:[#allocation2 + $0x28] sm:$0xff]  ;;  %v109_v54 = vld [vmem:[#allocation2 + $0x38] sm:$0xff] }
  0x6d   :  { %363 = vmatpush1.bf16.msra.mxu0 %v1715_v9  ;;  %725 = vmatprep.subr.bf16.mxu1 %v1758_v32  ;;  %v1772_v52 = vld [vmem:[#allocation7 + $0x70] ss:$8 sps:$4 sm:$0xff]   ;;  %v1773_v55 = vld [vmem:[#allocation7 + $0x84] ss:$8 sps:$4 sm:$0xff]   ;;  %v1775_v56 = vld [vmem:[#allocation7 + $0x80] ss:$8 sps:$4 sm:$0xff]   ;;  %v167_v57 = vpack.c.bf16 %v104_v51, %v102_v50  ;;  %v170_v59 = vpack.c.bf16 %v109_v54, %v107_v53 }
  0x6e   :  { %364 = vmatprep.subr.bf16.mxu0 %v1716_v10  ;;  %v1776_v58 = vld [vmem:[#allocation7 + $0x94] ss:$8 sps:$4 sm:$0xff]   ;;  %v106_v60 = vld [vmem:[#allocation2 + $0x20] sm:$0xff]  ;;  %v1778_v62 = vld [vmem:[#allocation7 + $0x90] ss:$8 sps:$4 sm:$0xff]  }
  0x6f   :  { %v108_v61 = vld [vmem:[#allocation2 + $0x30] sm:$0xff]  ;;  %v111_v63 = vld [vmem:[#allocation2 + $0x48] sm:$0xff]  ;;  %v113_v0 = vld [vmem:[#allocation2 + $0x58] sm:$0xff] }
  0x70   :  { %726 = vmatpush1.bf16.msra.mxu1 %v1760_v35  ;;  %v1779_v1 = vld [vmem:[#allocation7 + $0xa4] ss:$8 sps:$4 sm:$0xff]   ;;  %v1781_v2 = vld [vmem:[#allocation7 + $0xa0] ss:$8 sps:$4 sm:$0xff]   ;;  %v169_v3 = vpack.c.bf16 %v108_v61, %v106_v60  ;;  %v1782_v4 = vld [vmem:[#allocation7 + $0xb4] ss:$8 sps:$4 sm:$0xff]   ;;  %v172_v5 = vpack.c.bf16 %v113_v0, %v111_v63 }
  0x71   :  { %365 = vmatpush1.bf16.msra.mxu0 %v1718_v11  ;;  %727 = vmatprep.subr.bf16.mxu1 %v1761_v36  ;;  %v110_v6 = vld [vmem:[#allocation2 + $0x40] sm:$0xff]  ;;  %v112_v7 = vld [vmem:[#allocation2 + $0x50] sm:$0xff]  ;;  %v115_v9 = vld [vmem:[#allocation2 + $0x68] sm:$0xff] }
  0x72   :  { %366 = vmatprep.subr.bf16.mxu0 %v1719_v12  ;;  %v1784_v8 = vld [vmem:[#allocation7 + $0xb0] ss:$8 sps:$4 sm:$0xff]   ;;  %v1785_v11 = vld [vmem:[#allocation7 + $0xc4] ss:$8 sps:$4 sm:$0xff]   ;;  %v171_v12 = vpack.c.bf16 %v112_v7, %v110_v6  ;;  %v1787_v14 = vld [vmem:[#allocation7 + $0xc0] ss:$8 sps:$4 sm:$0xff]  }
  0x73   :  { %v117_v10 = vld [vmem:[#allocation2 + $0x78] sm:$0xff]  ;;  %v118_v22 = vld [vmem:[#allocation2 + $0x80] sm:$0xff]  ;;  %v120_v23 = vld [vmem:[#allocation2 + $0x90] sm:$0xff] }
  0x74   :  { %728 = vmatpush1.bf16.msra.mxu1 %v1763_v39  ;;  %v174_v13 = vpack.c.bf16 %v117_v10, %v115_v9  ;;  %v1788_v15 = vld [vmem:[#allocation7 + $0xd4] ss:$8 sps:$4 sm:$0xff]   ;;  %v122_v28 = vld [vmem:[#allocation2 + $0xa0] sm:$0xff]  ;;  %v131_v36 = vld [vmem:[#allocation2 + $0xe8] sm:$0xff]  ;;  %v184_v9 = vlaneseq }
  0x75   :  { %367 = vmatpush1.bf16.msra.mxu0 %v1721_v16  ;;  %729 = vmatprep.subr.bf16.mxu1 %v1764_v40  ;;  %v114_v16 = vld [vmem:[#allocation2 + $0x60] sm:$0xff]  ;;  %v125_v25 = vld [vmem:[#allocation2 + $0xb8] sm:$0xff]  ;;  %v128_v35 = vld [vmem:[#allocation2 + $0xd0] sm:$0xff] }
  0x76   :  { %368 = vmatprep.subr.bf16.mxu0 %v1722_v17  ;;  %v116_v17 = vld [vmem:[#allocation2 + $0x70] sm:$0xff]  ;;  %v129_v31 = vld [vmem:[#allocation2 + $0xd8] sm:$0xff]  ;;  %v130_v40 = vld [vmem:[#allocation2 + $0xe0] sm:$0xff] }
  0x77   :  { %v1802_v50 = vld [vmem:[#allocation8 + $0x14] ss:$8 sps:$4 sm:$0xff]   ;;  %v1800_v51 = vld [vmem:[#allocation8 + $0x10] ss:$8 sps:$4 sm:$0xff]   ;;  %v1803_v53 = vld [vmem:[#allocation8 + $0x20] ss:$8 sps:$4 sm:$0xff]  }
  0x78   :  { %730 = vmatpush1.bf16.msra.mxu1 %v1766_v43  ;;  %v1790_v43 = vld [vmem:[#allocation7 + $0xd0] ss:$8 sps:$4 sm:$0xff]   ;;  %v1808_v54 = vld [vmem:[#allocation8 + $0x34] ss:$8 sps:$4 sm:$0xff]   ;;  %v1817_v60 = vld [vmem:[#allocation8 + $0x64] ss:$8 sps:$4 sm:$0xff]  }
  0x79   :  { %369 = vmatpush1.bf16.msra.mxu0 %v1724_v18  ;;  %731 = vmatprep.subr.bf16.mxu1 %v1767_v44  ;;  %v119_v18 = vld [vmem:[#allocation2 + $0x88] sm:$0xff]  ;;  %v1818_v63 = vld [vmem:[#allocation8 + $0x70] ss:$8 sps:$4 sm:$0xff]   ;;  %v1832_v6 = vld [vmem:[#allocation8 + $0xb4] ss:$8 sps:$4 sm:$0xff]  }
  0x7a   :  { %370 = vmatprep.subr.bf16.mxu0 %v1725_v19  ;;  %v121_v19 = vld [vmem:[#allocation2 + $0x98] sm:$0xff]  ;;  %v1791_v44 = vld [vmem:[#allocation7 + $0xe4] ss:$8 sps:$4 sm:$0xff]   ;;  %v1815_v61 = vld [vmem:[#allocation8 + $0x60] ss:$8 sps:$4 sm:$0xff]  }
  0x7b   :  { %v1823_v0 = vld [vmem:[#allocation8 + $0x84] ss:$8 sps:$4 sm:$0xff]   ;;  %v1830_v7 = vld [vmem:[#allocation8 + $0xb0] ss:$8 sps:$4 sm:$0xff]   ;;  %v1833_v10 = vld [vmem:[#allocation8 + $0xc0] ss:$8 sps:$4 sm:$0xff]  }
  0x7c   :  { %732 = vmatpush1.bf16.msra.mxu1 %v1769_v46  ;;  %v1794_v46 = vld [vmem:[#allocation7 + $0xf4] ss:$8 sps:$4 sm:$0xff]  }
  0x7d   :  { %371 = vmatpush1.bf16.msra.mxu0 %v1727_v20  ;;  %733 = vmatprep.subr.bf16.mxu1 %v1770_v48  ;;  %v173_v20 = vpack.c.bf16 %v116_v17, %v114_v16  ;;  %v1797_v48 = vld [vmem:[#allocation8] ss:$8 sps:$4 sm:$0xff]  }
  0x7e   :  { %372 = vmatprep.subr.bf16.mxu0 %v1728_v21  ;;  %v176_v21 = vpack.c.bf16 %v121_v19, %v119_v18 }
  0x80   :  { %734 = vmatpush1.bf16.msra.mxu1 %v1772_v52  ;;  %v1805_v52 = vld [vmem:[#allocation8 + $0x24] ss:$8 sps:$4 sm:$0xff]  }
  0x81   :  { %373 = vmatpush1.bf16.msra.mxu0 %v1730_v24  ;;  %735 = vmatprep.subr.bf16.mxu1 %v1773_v55  ;;  %v123_v24 = vld [vmem:[#allocation2 + $0xa8] sm:$0xff]  ;;  %v1806_v55 = vld [vmem:[#allocation8 + $0x30] ss:$8 sps:$4 sm:$0xff]  }
  0x82   :  { %374 = vmatprep.subr.bf16.mxu0 %v1731_v26  ;;  %v175_v26 = vpack.c.bf16 %v120_v23, %v118_v22  ;;  %v178_v27 = vpack.c.bf16 %v125_v25, %v123_v24 }
  0x84   :  { %736 = vmatpush1.bf16.msra.mxu1 %v1775_v56  ;;  %v1811_v56 = vld [vmem:[#allocation8 + $0x44] ss:$8 sps:$4 sm:$0xff]  }
  0x85   :  { %375 = vmatpush1.bf16.msra.mxu0 %v1733_v29  ;;  %737 = vmatprep.subr.bf16.mxu1 %v1776_v58  ;;  %v124_v29 = vld [vmem:[#allocation2 + $0xb0] sm:$0xff] }
  0x86   :  { %376 = vmatprep.subr.bf16.mxu0 %v1734_v30  ;;  %v127_v30 = vld [vmem:[#allocation2 + $0xc8] sm:$0xff]  ;;  %v177_v32 = vpack.c.bf16 %v124_v29, %v122_v28  ;;  %v1814_v58 = vld [vmem:[#allocation8 + $0x54] ss:$8 sps:$4 sm:$0xff]  }
  0x88   :  { %738 = vmatpush1.bf16.msra.mxu1 %v1778_v62  ;;  %v1820_v62 = vld [vmem:[#allocation8 + $0x74] ss:$8 sps:$4 sm:$0xff]  }
  0x89   :  { %377 = vmatpush1.bf16.msra.mxu0 %v1736_v33  ;;  %739 = vmatprep.subr.bf16.mxu1 %v1779_v1  ;;  %v180_v33 = vpack.c.bf16 %v129_v31, %v127_v30  ;;  %v1821_v1 = vld [vmem:[#allocation8 + $0x80] ss:$8 sps:$4 sm:$0xff]  }
  0x8a   :  { %378 = vmatprep.subr.bf16.mxu0 %v1737_v34  ;;  %v126_v34 = vld [vmem:[#allocation2 + $0xc0] sm:$0xff] }
  0x8c   :  { %740 = vmatpush1.bf16.msra.mxu1 %v1781_v2  ;;  %v1826_v2 = vld [vmem:[#allocation8 + $0x94] ss:$8 sps:$4 sm:$0xff]  }
  0x8d   :  { %379 = vmatpush1.bf16.msra.mxu0 %v1739_v37  ;;  %741 = vmatprep.subr.bf16.mxu1 %v1782_v4  ;;  %v133_v37 = vld [vmem:[#allocation2 + $0xf8] sm:$0xff]  ;;  %v1829_v4 = vld [vmem:[#allocation8 + $0xa4] ss:$8 sps:$4 sm:$0xff]  }
  0x8e   :  { %380 = vmatprep.subr.bf16.mxu0 %v1740_v38  ;;  %v179_v38 = vpack.c.bf16 %v128_v35, %v126_v34  ;;  %v182_v39 = vpack.c.bf16 %v133_v37, %v131_v36 }
  0x90   :  { %742 = vmatpush1.bf16.msra.mxu1 %v1784_v8  ;;  %v1835_v8 = vld [vmem:[#allocation8 + $0xc4] ss:$8 sps:$4 sm:$0xff]  }
  0x91   :  { %381 = vmatpush1.bf16.msra.mxu0 %v1742_v41  ;;  %743 = vmatprep.subr.bf16.mxu1 %v1785_v11  ;;  %v132_v41 = vld [vmem:[#allocation2 + $0xf0] sm:$0xff] }
  0x92   :  { %382 = vmatprep.subr.bf16.mxu0 %v1743_v42  ;;  %v181_v42 = vpack.c.bf16 %v132_v41, %v130_v40  ;;  %v1838_v11 = vld [vmem:[#allocation8 + $0xd4] ss:$8 sps:$4 sm:$0xff]  }
  0x94   :  { %744 = vmatpush1.bf16.msra.mxu1 %v1787_v14 }
  0x95   :  { %383 = vmatpush1.bf16.msra.mxu0 %v1745_v45  ;;  %745 = vmatprep.subr.bf16.mxu1 %v1788_v15  ;;  %v1793_v45 = vld [vmem:[#allocation7 + $0xe0] ss:$8 sps:$4 sm:$0xff]  }
  0x96   :  { %384 = vmatprep.subr.bf16.mxu0 %v1746_v47  ;;  %v1796_v47 = vld [vmem:[#allocation7 + $0xf0] ss:$8 sps:$4 sm:$0xff]   ;;  %v166_v15 = vld [vmem:[%s2297_s2] sm:$0x3] }
  0x98   :  { %746 = vmatpush1.bf16.msra.mxu1 %v1790_v43 }
  0x99   :  { %385 = vmatpush1.bf16.msra.mxu0 %v1748_v49  ;;  %747 = vmatprep.subr.bf16.mxu1 %v1791_v44  ;;  %v1799_v49 = vld [vmem:[#allocation8 + $0x4] ss:$8 sps:$4 sm:$0xff]  }
  0x9a   :  { %1084 = vmatprep.subr.bf16.mxu0 %v1799_v49 }
  0x9c   :  { %387 = vmatmul.mubr.bf16.vlgmr.msra.gmra.mrb[0].mxu0 %v167_v57  ;;  %748 = vmatpush1.bf16.msra.mxu1 %v1793_v45  ;;  %v1809_v57 = vld [vmem:[#allocation8 + $0x40] ss:$8 sps:$4 sm:$0xff]  }
  0x9d   :  { %396 = vmatprep.mubr.bf16.mxu0 %v170_v59  ;;  %749 = vmatprep.subr.bf16.mxu1 %v1794_v46  ;;  %v1812_v59 = vld [vmem:[#allocation8 + $0x50] ss:$8 sps:$4 sm:$0xff]  }
  0x9e   :  { %1085 = vmatpush1.bf16.msra.mxu0 %v1797_v48 }
  0x9f   :  { %1086 = vmatprep.subr.bf16.mxu0 %v1802_v50 }
  0xa0   :  { %750 = vmatpush1.bf16.msra.mxu1 %v1796_v47 }
  0xa2   :  { %1087 = vmatpush1.bf16.msra.mxu0 %v1800_v51 }
  0xa3   :  { %1088 = vmatprep.subr.bf16.mxu0 %v1805_v52 }
  0xa4   :  { %397 = vmatmul.mubr.bf16.gmra.mrb[4].mxu0 %v169_v3  ;;  %v1824_v3 = vld [vmem:[#allocation8 + $0x90] ss:$8 sps:$4 sm:$0xff]  }
  0xa5   :  { %406 = vmatprep.mubr.bf16.mxu0 %v172_v5  ;;  %v1827_v5 = vld [vmem:[#allocation8 + $0xa0] ss:$8 sps:$4 sm:$0xff]  }
  0xa6   :  { %1089 = vmatpush1.bf16.msra.mxu0 %v1803_v53 }
  0xa7   :  { %1090 = vmatprep.subr.bf16.mxu0 %v1808_v54 }
  0xaa   :  { %1091 = vmatpush1.bf16.msra.mxu0 %v1806_v55 }
  0xab   :  { %1092 = vmatprep.subr.bf16.mxu0 %v1811_v56 }
  0xac   :  { %407 = vmatmul.mubr.bf16.gmra.mrb[8].mxu0 %v171_v12  ;;  %v185_v12 = vshrl.u32 %v184_v9, 7 }
  0xad   :  { %416 = vmatprep.mubr.bf16.mxu0 %v174_v13  ;;  %v1836_v13 = vld [vmem:[#allocation8 + $0xd0] ss:$8 sps:$4 sm:$0xff]  }
  0xae   :  { %1093 = vmatpush1.bf16.msra.mxu0 %v1809_v57  ;;  %v2132_v14 = vsub.s32 0, %v185_v12  ;;  %v2137_v16 = vsub.s32 1, %v185_v12 }
  0xaf   :  { %1094 = vmatprep.subr.bf16.mxu0 %v1814_v58 }
  0xb0   :  { %v2140_v17 = vrot.slane %v166_v15, %v2132_v14  ;;  %v2143_v18 = vrot.slane %v166_v15, %v2137_v16 }
  0xb2   :  { %1095 = vmatpush1.bf16.msra.mxu0 %v1812_v59 }
  0xb3   :  { %1096 = vmatprep.subr.bf16.mxu0 %v1817_v60 }
  0xb4   :  { %417 = vmatmul.mubr.bf16.gmra.mrb[12].mxu0 %v173_v20 }
  0xb5   :  { %426 = vmatprep.mubr.bf16.mxu0 %v176_v21 }
  0xb6   :  { %1097 = vmatpush1.bf16.msra.mxu0 %v1815_v61 }
  0xb7   :  { %1098 = vmatprep.subr.bf16.mxu0 %v1820_v62 }
  0xba   :  { %1099 = vmatpush1.bf16.msra.mxu0 %v1818_v63 }
  0xbb   :  { %1100 = vmatprep.subr.bf16.mxu0 %v1823_v0 }
  0xbc   :  { %427 = vmatmul.mubr.bf16.gmra.mrb[16].mxu0 %v175_v26 }
  0xbd   :  { %436 = vmatprep.mubr.bf16.mxu0 %v178_v27 }
  0xbe   :  { %1101 = vmatpush1.bf16.msra.mxu0 %v1821_v1 }
  0xbf   :  { %1102 = vmatprep.subr.bf16.mxu0 %v1826_v2 }
  0xc2   :  { %1103 = vmatpush1.bf16.msra.mxu0 %v1824_v3 }
  0xc3   :  { %1104 = vmatprep.subr.bf16.mxu0 %v1829_v4 }
  0xc4   :  { %437 = vmatmul.mubr.bf16.gmra.mrb[20].mxu0 %v177_v32 }
  0xc5   :  { %446 = vmatprep.mubr.bf16.mxu0 %v180_v33 }
  0xc6   :  { %1105 = vmatpush1.bf16.msra.mxu0 %v1827_v5 }
  0xc7   :  { %1106 = vmatprep.subr.bf16.mxu0 %v1832_v6 }
  0xca   :  { %1107 = vmatpush1.bf16.msra.mxu0 %v1830_v7 }
  0xcb   :  { %1108 = vmatprep.subr.bf16.mxu0 %v1835_v8 }
  0xcc   :  { %447 = vmatmul.mubr.bf16.gmra.mrb[24].mxu0 %v179_v38 }
  0xcd   :  { %456 = vmatprep.mubr.bf16.mxu0 %v182_v39 }
  0xce   :  { %1109 = vmatpush1.bf16.msra.mxu0 %v1833_v10 }
  0xcf   :  { %1110 = vmatprep.subr.bf16.mxu0 %v1838_v11 }
  0xd2   :  { %1111 = vmatpush1.bf16.msra.mxu0 %v1836_v13 }
  0xd4   :  { %457 = vmatmul.mubr.bf16.gmra.mrb[28].mxu0 %v181_v42 }
 0x16f   :  { %v388_v19 = vpop.f32.mrb[0].mxu0 }
 0x170   :  { %v389_v20 = vadd.f32 %v388_v19, %v2140_v17  ;;  %v390_v21 = vpop.f32.mrb[1].mxu0 }
 0x171   :  { %v391_v22 = vadd.f32 %v390_v21, %v2143_v18  ;;  %v392_v23 = vpop.f32.mrb[2].mxu0 }
 0x172   :  { %v393_v24 = vadd.f32 %v392_v23, %v2140_v17  ;;  %v394_v25 = vpop.f32.mrb[3].mxu0  ;;  %v467_v27 = vmax.f32 %v389_v20, 0.0 }
 0x173   :  { %v395_v26 = vadd.f32 %v394_v25, %v2143_v18  ;;  %v468_v29 = vmax.f32 %v391_v22, 0.0 }
 0x174   :  { %v469_v28 = vmax.f32 %v393_v24, 0.0 }
 0x175   :  { %v470_v30 = vmax.f32 %v395_v26, 0.0 }
 0x176   :  { %v532_v31 = vpack.c.bf16 %v469_v28, %v467_v27 }
 0x177   :  { %v398_v32 = vpop.f32.mrb[4].mxu0  ;;  %v533_v33 = vpack.c.bf16 %v470_v30, %v468_v29 }
 0x178   :  { %v399_v34 = vadd.f32 %v398_v32, %v2140_v17  ;;  %v400_v35 = vpop.f32.mrb[5].mxu0 }
 0x179   :  { %v401_v36 = vadd.f32 %v400_v35, %v2143_v18  ;;  %v402_v37 = vpop.f32.mrb[6].mxu0  ;;  %751 = vmatprep.mubr.bf16.mxu1 %v533_v33 }
 0x17a   :  { %v403_v38 = vadd.f32 %v402_v37, %v2140_v17  ;;  %v404_v39 = vpop.f32.mrb[7].mxu0  ;;  %752 = vmatmul.mubr.bf16.vlgmr.msra.gmra.mrb[0].mxu1 %v532_v31  ;;  %v471_v41 = vmax.f32 %v399_v34, 0.0 }
 0x17b   :  { %v405_v40 = vadd.f32 %v404_v39, %v2143_v18  ;;  %v472_v43 = vmax.f32 %v401_v36, 0.0 }
 0x17c   :  { %v473_v42 = vmax.f32 %v403_v38, 0.0 }
 0x17d   :  { %v474_v44 = vmax.f32 %v405_v40, 0.0 }
 0x17e   :  { %v534_v45 = vpack.c.bf16 %v473_v42, %v471_v41 }
 0x17f   :  { %v535_v46 = vpack.c.bf16 %v474_v44, %v472_v43  ;;  %v408_v47 = vpop.f32.mrb[8].mxu0 }
 0x180   :  { %v409_v48 = vadd.f32 %v408_v47, %v2140_v17  ;;  %v410_v49 = vpop.f32.mrb[9].mxu0 }
 0x181   :  { %v411_v50 = vadd.f32 %v410_v49, %v2143_v18  ;;  %v412_v51 = vpop.f32.mrb[10].mxu0  ;;  %761 = vmatprep.mubr.bf16.mxu1 %v535_v46 }
 0x182   :  { %v413_v52 = vadd.f32 %v412_v51, %v2140_v17  ;;  %v414_v53 = vpop.f32.mrb[11].mxu0  ;;  %762 = vmatmul.mubr.bf16.gmra.mrb[4].mxu1 %v534_v45  ;;  %v475_v55 = vmax.f32 %v409_v48, 0.0 }
 0x183   :  { %v415_v54 = vadd.f32 %v414_v53, %v2143_v18  ;;  %v476_v57 = vmax.f32 %v411_v50, 0.0 }
 0x184   :  { %v477_v56 = vmax.f32 %v413_v52, 0.0 }
 0x185   :  { %v478_v58 = vmax.f32 %v415_v54, 0.0 }
 0x186   :  { %v536_v59 = vpack.c.bf16 %v477_v56, %v475_v55 }
 0x187   :  { %v537_v60 = vpack.c.bf16 %v478_v58, %v476_v57  ;;  %v418_v61 = vpop.f32.mrb[12].mxu0 }
 0x188   :  { %v419_v62 = vadd.f32 %v418_v61, %v2140_v17  ;;  %v420_v63 = vpop.f32.mrb[13].mxu0 }
 0x189   :  { %v421_v0 = vadd.f32 %v420_v63, %v2143_v18  ;;  %v422_v1 = vpop.f32.mrb[14].mxu0  ;;  %771 = vmatprep.mubr.bf16.mxu1 %v537_v60 }
 0x18a   :  { %v423_v2 = vadd.f32 %v422_v1, %v2140_v17  ;;  %v424_v3 = vpop.f32.mrb[15].mxu0  ;;  %772 = vmatmul.mubr.bf16.gmra.mrb[8].mxu1 %v536_v59  ;;  %v479_v5 = vmax.f32 %v419_v62, 0.0 }
 0x18b   :  { %v425_v4 = vadd.f32 %v424_v3, %v2143_v18  ;;  %v480_v7 = vmax.f32 %v421_v0, 0.0 }
 0x18c   :  { %v481_v6 = vmax.f32 %v423_v2, 0.0 }
 0x18d   :  { %v482_v8 = vmax.f32 %v425_v4, 0.0 }
 0x18e   :  { %v538_v9 = vpack.c.bf16 %v481_v6, %v479_v5 }
 0x18f   :  { %v539_v10 = vpack.c.bf16 %v482_v8, %v480_v7  ;;  %v428_v11 = vpop.f32.mrb[16].mxu0  ;;  %v1841_v7 = vld [vmem:[#allocation8 + $0xe4] ss:$8 sps:$4 sm:$0xff]   ;;  %v1839_v8 = vld [vmem:[#allocation8 + $0xe0] ss:$8 sps:$4 sm:$0xff]  }
 0x190   :  { %v429_v12 = vadd.f32 %v428_v11, %v2140_v17  ;;  %v430_v13 = vpop.f32.mrb[17].mxu0  ;;  %1112 = vmatprep.subr.bf16.mxu0 %v1841_v7  ;;  %v1846_v11 = vld [vmem:[#allocation10] sm:$0xff]  }
 0x191   :  { %v431_v15 = vadd.f32 %v430_v13, %v2143_v18  ;;  %v432_v19 = vpop.f32.mrb[18].mxu0  ;;  %781 = vmatprep.mubr.bf16.mxu1 %v539_v10  ;;  %1113 = vmatpush1.bf16.msra.mxu0 %v1839_v8  ;;  %v1842_v10 = vld [vmem:[#allocation8 + $0xf0] ss:$8 sps:$4 sm:$0xff]  }
 0x192   :  { %v433_v20 = vadd.f32 %v432_v19, %v2140_v17  ;;  %v434_v21 = vpop.f32.mrb[19].mxu0  ;;  %782 = vmatmul.mubr.bf16.gmra.mrb[12].mxu1 %v538_v9  ;;  %v483_v23 = vmax.f32 %v429_v12, 0.0  ;;  %v1844_v9 = vld [vmem:[#allocation8 + $0xf4] ss:$8 sps:$4 sm:$0xff]   ;;  %v1847_v12 = vld [vmem:[#allocation10 + $0x48] sm:$0xff]  }
 0x193   :  { %v435_v22 = vadd.f32 %v434_v21, %v2143_v18  ;;  %v484_v25 = vmax.f32 %v431_v15, 0.0  ;;  %1114 = vmatprep.subr.bf16.mxu0 %v1844_v9  ;;  %v1849_v13 = vld [vmem:[#allocation10 + $0x50] sm:$0xff]   ;;  %v1851_v19 = vld [vmem:[#allocation10 + $0x58] sm:$0xff]   ;;  %v1853_v21 = vld [vmem:[#allocation10 + $0x60] sm:$0xff]  }
 0x194   :  { %v485_v24 = vmax.f32 %v433_v20, 0.0  ;;  %v1850_v15 = vld [vmem:[#allocation10 + $0x10] sm:$0xff]   ;;  %v1852_v20 = vld [vmem:[#allocation10 + $0x18] sm:$0xff]  }
 0x195   :  { %v486_v26 = vmax.f32 %v435_v22, 0.0  ;;  %1115 = vmatpush1.bf16.msra.mxu0 %v1842_v10  ;;  %v1854_v22 = vld [vmem:[#allocation10 + $0x20] sm:$0xff]  }
 0x196   :  { %v540_v27 = vpack.c.bf16 %v485_v24, %v483_v23  ;;  %v1855_v23 = vld [vmem:[#allocation10 + $0x68] sm:$0xff]  }
 0x197   :  { %v541_v28 = vpack.c.bf16 %v486_v26, %v484_v25  ;;  %v438_v29 = vpop.f32.mrb[20].mxu0  ;;  %v1856_v24 = vld [vmem:[#allocation10 + $0x28] sm:$0xff]   ;;  %v1857_v25 = vld [vmem:[#allocation10 + $0x70] sm:$0xff]  }
 0x198   :  { %v439_v30 = vadd.f32 %v438_v29, %v2140_v17  ;;  %v440_v31 = vpop.f32.mrb[21].mxu0  ;;  %v1858_v26 = vld [vmem:[#allocation10 + $0x30] sm:$0xff]  }
 0x199   :  { %v441_v32 = vadd.f32 %v440_v31, %v2143_v18  ;;  %v442_v33 = vpop.f32.mrb[22].mxu0  ;;  %791 = vmatprep.mubr.bf16.mxu1 %v541_v28 }
 0x19a   :  { %v443_v34 = vadd.f32 %v442_v33, %v2140_v17  ;;  %v444_v35 = vpop.f32.mrb[23].mxu0  ;;  %792 = vmatmul.mubr.bf16.gmra.mrb[16].mxu1 %v540_v27  ;;  %v487_v37 = vmax.f32 %v439_v30, 0.0  ;;  %v531_v27 = vld [vmem:[%s2299_s4] sm:$0x3] }
 0x19b   :  { %v445_v36 = vadd.f32 %v444_v35, %v2143_v18  ;;  %v488_v39 = vmax.f32 %v441_v32, 0.0  ;;  %v2181_v28 = vrot.slane %v531_v27, %v2132_v14  ;;  %v2184_v29 = vrot.slane %v531_v27, %v2137_v16 }
 0x19c   :  { %v489_v38 = vmax.f32 %v443_v34, 0.0 }
 0x19d   :  { %v490_v40 = vmax.f32 %v445_v36, 0.0 }
 0x19e   :  { %v542_v41 = vpack.c.bf16 %v489_v38, %v487_v37 }
 0x19f   :  { %v543_v42 = vpack.c.bf16 %v490_v40, %v488_v39  ;;  %v448_v43 = vpop.f32.mrb[24].mxu0 }
 0x1a0   :  { %v449_v44 = vadd.f32 %v448_v43, %v2140_v17  ;;  %v450_v45 = vpop.f32.mrb[25].mxu0 }
 0x1a1   :  { %v451_v46 = vadd.f32 %v450_v45, %v2143_v18  ;;  %v452_v47 = vpop.f32.mrb[26].mxu0  ;;  %801 = vmatprep.mubr.bf16.mxu1 %v543_v42 }
 0x1a2   :  { %v453_v48 = vadd.f32 %v452_v47, %v2140_v17  ;;  %v454_v49 = vpop.f32.mrb[27].mxu0  ;;  %802 = vmatmul.mubr.bf16.gmra.mrb[20].mxu1 %v542_v41  ;;  %v491_v51 = vmax.f32 %v449_v44, 0.0 }
 0x1a3   :  { %v455_v50 = vadd.f32 %v454_v49, %v2143_v18  ;;  %v492_v53 = vmax.f32 %v451_v46, 0.0 }
 0x1a4   :  { %v493_v52 = vmax.f32 %v453_v48, 0.0 }
 0x1a5   :  { %v494_v54 = vmax.f32 %v455_v50, 0.0 }
 0x1a6   :  { %v544_v55 = vpack.c.bf16 %v493_v52, %v491_v51 }
 0x1a7   :  { %v545_v56 = vpack.c.bf16 %v494_v54, %v492_v53  ;;  %v458_v57 = vpop.f32.mrb[28].mxu0 }
 0x1a8   :  { %v459_v58 = vadd.f32 %v458_v57, %v2140_v17  ;;  %v460_v59 = vpop.f32.mrb[29].mxu0 }
 0x1a9   :  { %v461_v60 = vadd.f32 %v460_v59, %v2143_v18  ;;  %v462_v61 = vpop.f32.mrb[30].mxu0  ;;  %811 = vmatprep.mubr.bf16.mxu1 %v545_v56 }
 0x1aa   :  { %v463_v62 = vadd.f32 %v462_v61, %v2140_v17  ;;  %v464_v63 = vpop.f32.mrb[31].mxu0  ;;  %812 = vmatmul.mubr.bf16.gmra.mrb[24].mxu1 %v544_v55  ;;  %v495_v1 = vmax.f32 %v459_v58, 0.0  ;;  %v1845_v17 = vld [vmem:[#allocation10 + $0x40] sm:$0xff]  }
 0x1ab   :  { %v465_v0 = vadd.f32 %v464_v63, %v2143_v18  ;;  %v496_v3 = vmax.f32 %v461_v60, 0.0  ;;  %1625 = vmatprep.subr.bf16.mxu1 %v1845_v17  ;;  %v1848_v18 = vld [vmem:[#allocation10 + $0x8] sm:$0xff]  }
 0x1ac   :  { %v497_v2 = vmax.f32 %v463_v62, 0.0  ;;  %1626 = vmatpush3.bf16.msra.mxu1 %v1846_v11 }
 0x1ad   :  { %v498_v4 = vmax.f32 %v465_v0, 0.0  ;;  %1627 = vmatprep.subr.bf16.mxu1 %v1847_v12 }
 0x1ae   :  { %v546_v5 = vpack.c.bf16 %v497_v2, %v495_v1 }
 0x1af   :  { %v547_v6 = vpack.c.bf16 %v498_v4, %v496_v3 }
 0x1b0   :  { %1628 = vmatpush3.bf16.msra.mxu1 %v1848_v18 }
 0x1b1   :  { %821 = vmatprep.mubr.bf16.mxu1 %v547_v6  ;;  %1629 = vmatprep.subr.bf16.mxu1 %v1849_v13 }
 0x1b2   :  { %822 = vmatmul.mubr.bf16.gmra.mrb[28].mxu1 %v546_v5 }
 0x1b4   :  { %1630 = vmatpush3.bf16.msra.mxu1 %v1850_v15 }
 0x1b5   :  { %1631 = vmatprep.subr.bf16.mxu1 %v1851_v19 }
 0x1b8   :  { %1632 = vmatpush3.bf16.msra.mxu1 %v1852_v20 }
 0x1b9   :  { %1633 = vmatprep.subr.bf16.mxu1 %v1853_v21 }
 0x1bc   :  { %1634 = vmatpush3.bf16.msra.mxu1 %v1854_v22 }
 0x1bd   :  { %1635 = vmatprep.subr.bf16.mxu1 %v1855_v23 }
 0x1c0   :  { %1636 = vmatpush3.bf16.msra.mxu1 %v1856_v24 }
 0x1c1   :  { %1637 = vmatprep.subr.bf16.mxu1 %v1857_v25 }
 0x1c4   :  { %1638 = vmatpush3.bf16.msra.mxu1 %v1858_v26 }
 0x24d   :  { %v753_v30 = vpop.f32.mrb[0].mxu1 }
 0x24e   :  { %v754_v31 = vadd.f32 %v753_v30, %v2181_v28  ;;  %v755_v32 = vpop.f32.mrb[1].mxu1 }
 0x24f   :  { %v756_v33 = vadd.f32 %v755_v32, %v2184_v29  ;;  %v757_v34 = vpop.f32.mrb[2].mxu1 }
 0x250   :  { %v758_v35 = vadd.f32 %v757_v34, %v2181_v28  ;;  %v759_v36 = vpop.f32.mrb[3].mxu1  ;;  %v832_v38 = vmax.f32 %v754_v31, 0.0 }
 0x251   :  { %v760_v37 = vadd.f32 %v759_v36, %v2184_v29  ;;  %v833_v40 = vmax.f32 %v756_v33, 0.0 }
 0x252   :  { %v834_v39 = vmax.f32 %v758_v35, 0.0 }
 0x253   :  { %v835_v41 = vmax.f32 %v760_v37, 0.0 }
 0x254   :  { %v897_v42 = vpack.c.bf16 %v834_v39, %v832_v38 }
 0x255   :  { %v898_v43 = vpack.c.bf16 %v835_v41, %v833_v40  ;;  %v763_v44 = vpop.f32.mrb[4].mxu1 }
 0x256   :  { %v764_v45 = vadd.f32 %v763_v44, %v2181_v28  ;;  %v765_v46 = vpop.f32.mrb[5].mxu1 }
 0x257   :  { %v766_v47 = vadd.f32 %v765_v46, %v2184_v29  ;;  %v767_v48 = vpop.f32.mrb[6].mxu1  ;;  %1116 = vmatprep.mubr.bf16.mxu0 %v898_v43 }
 0x258   :  { %v768_v49 = vadd.f32 %v767_v48, %v2181_v28  ;;  %v769_v50 = vpop.f32.mrb[7].mxu1  ;;  %1117 = vmatmul.mubr.bf16.vlgmr.msra.gmra.mrb[32].mxu0 %v897_v42  ;;  %v836_v52 = vmax.f32 %v764_v45, 0.0 }
 0x259   :  { %v770_v51 = vadd.f32 %v769_v50, %v2184_v29  ;;  %v837_v54 = vmax.f32 %v766_v47, 0.0 }
 0x25a   :  { %v838_v53 = vmax.f32 %v768_v49, 0.0 }
 0x25b   :  { %v839_v55 = vmax.f32 %v770_v51, 0.0 }
 0x25c   :  { %v899_v56 = vpack.c.bf16 %v838_v53, %v836_v52 }
 0x25d   :  { %v900_v57 = vpack.c.bf16 %v839_v55, %v837_v54  ;;  %v773_v58 = vpop.f32.mrb[8].mxu1 }
 0x25e   :  { %v774_v59 = vadd.f32 %v773_v58, %v2181_v28  ;;  %v775_v60 = vpop.f32.mrb[9].mxu1 }
 0x25f   :  { %v776_v61 = vadd.f32 %v775_v60, %v2184_v29  ;;  %v777_v62 = vpop.f32.mrb[10].mxu1  ;;  %1126 = vmatprep.mubr.bf16.mxu0 %v900_v57 }
 0x260   :  { %v778_v63 = vadd.f32 %v777_v62, %v2181_v28  ;;  %v779_v0 = vpop.f32.mrb[11].mxu1  ;;  %1127 = vmatmul.mubr.bf16.gmra.mrb[36].mxu0 %v899_v56  ;;  %v840_v2 = vmax.f32 %v774_v59, 0.0 }
 0x261   :  { %v780_v1 = vadd.f32 %v779_v0, %v2184_v29  ;;  %v841_v4 = vmax.f32 %v776_v61, 0.0 }
 0x262   :  { %v842_v3 = vmax.f32 %v778_v63, 0.0 }
 0x263   :  { %v843_v5 = vmax.f32 %v780_v1, 0.0 }
 0x264   :  { %v901_v6 = vpack.c.bf16 %v842_v3, %v840_v2 }
 0x265   :  { %v902_v7 = vpack.c.bf16 %v843_v5, %v841_v4  ;;  %v783_v8 = vpop.f32.mrb[12].mxu1 }
 0x266   :  { %v784_v9 = vadd.f32 %v783_v8, %v2181_v28  ;;  %v785_v10 = vpop.f32.mrb[13].mxu1 }
 0x267   :  { %v786_v17 = vadd.f32 %v785_v10, %v2184_v29  ;;  %v787_v11 = vpop.f32.mrb[14].mxu1  ;;  %1136 = vmatprep.mubr.bf16.mxu0 %v902_v7 }
 0x268   :  { %v788_v12 = vadd.f32 %v787_v11, %v2181_v28  ;;  %v789_v18 = vpop.f32.mrb[15].mxu1  ;;  %1137 = vmatmul.mubr.bf16.gmra.mrb[40].mxu0 %v901_v6  ;;  %v844_v15 = vmax.f32 %v784_v9, 0.0 }
 0x269   :  { %v790_v13 = vadd.f32 %v789_v18, %v2184_v29  ;;  %v845_v20 = vmax.f32 %v786_v17, 0.0 }
 0x26a   :  { %v846_v19 = vmax.f32 %v788_v12, 0.0 }
 0x26b   :  { %v847_v21 = vmax.f32 %v790_v13, 0.0 }
 0x26c   :  { %v903_v22 = vpack.c.bf16 %v846_v19, %v844_v15 }
 0x26d   :  { %v904_v23 = vpack.c.bf16 %v847_v21, %v845_v20  ;;  %v793_v24 = vpop.f32.mrb[16].mxu1  ;;  %v1859_v20 = vld [vmem:[#allocation10 + $0x78] sm:$0xff]  }
 0x26e   :  { %v794_v25 = vadd.f32 %v793_v24, %v2181_v28  ;;  %v795_v26 = vpop.f32.mrb[17].mxu1  ;;  %v1860_v21 = vld [vmem:[#allocation10 + $0x38] sm:$0xff]   ;;  %1639 = vmatprep.subr.bf16.mxu1 %v1859_v20 }
 0x26f   :  { %v796_v27 = vadd.f32 %v795_v26, %v2184_v29  ;;  %v797_v30 = vpop.f32.mrb[18].mxu1  ;;  %1146 = vmatprep.mubr.bf16.mxu0 %v904_v23  ;;  %1640 = vmatpush3.bf16.msra.mxu1 %v1860_v21 }
 0x270   :  { %v798_v31 = vadd.f32 %v797_v30, %v2181_v28  ;;  %v799_v32 = vpop.f32.mrb[19].mxu1  ;;  %1147 = vmatmul.mubr.bf16.gmra.mrb[44].mxu0 %v903_v22  ;;  %v848_v34 = vmax.f32 %v794_v25, 0.0 }
 0x271   :  { %v800_v33 = vadd.f32 %v799_v32, %v2184_v29  ;;  %v849_v36 = vmax.f32 %v796_v27, 0.0 }
 0x272   :  { %v850_v35 = vmax.f32 %v798_v31, 0.0 }
 0x273   :  { %v851_v37 = vmax.f32 %v800_v33, 0.0 }
 0x274   :  { %v905_v38 = vpack.c.bf16 %v850_v35, %v848_v34 }
 0x275   :  { %v906_v39 = vpack.c.bf16 %v851_v37, %v849_v36  ;;  %v803_v40 = vpop.f32.mrb[20].mxu1 }
 0x276   :  { %v804_v41 = vadd.f32 %v803_v40, %v2181_v28  ;;  %v805_v42 = vpop.f32.mrb[21].mxu1 }
 0x277   :  { %v806_v43 = vadd.f32 %v805_v42, %v2184_v29  ;;  %v807_v44 = vpop.f32.mrb[22].mxu1  ;;  %1156 = vmatprep.mubr.bf16.mxu0 %v906_v39 }
 0x278   :  { %v808_v45 = vadd.f32 %v807_v44, %v2181_v28  ;;  %v809_v46 = vpop.f32.mrb[23].mxu1  ;;  %1157 = vmatmul.mubr.bf16.gmra.mrb[48].mxu0 %v905_v38  ;;  %v852_v48 = vmax.f32 %v804_v41, 0.0 }
 0x279   :  { %v810_v47 = vadd.f32 %v809_v46, %v2184_v29  ;;  %v853_v50 = vmax.f32 %v806_v43, 0.0 }
 0x27a   :  { %v854_v49 = vmax.f32 %v808_v45, 0.0 }
 0x27b   :  { %v855_v51 = vmax.f32 %v810_v47, 0.0 }
 0x27c   :  { %v907_v52 = vpack.c.bf16 %v854_v49, %v852_v48 }
 0x27d   :  { %v908_v53 = vpack.c.bf16 %v855_v51, %v853_v50  ;;  %v813_v54 = vpop.f32.mrb[24].mxu1 }
 0x27e   :  { %v814_v55 = vadd.f32 %v813_v54, %v2181_v28  ;;  %v815_v56 = vpop.f32.mrb[25].mxu1 }
 0x27f   :  { %v816_v57 = vadd.f32 %v815_v56, %v2184_v29  ;;  %v817_v58 = vpop.f32.mrb[26].mxu1  ;;  %1166 = vmatprep.mubr.bf16.mxu0 %v908_v53 }
 0x280   :  { %v818_v59 = vadd.f32 %v817_v58, %v2181_v28  ;;  %v819_v60 = vpop.f32.mrb[27].mxu1  ;;  %1167 = vmatmul.mubr.bf16.gmra.mrb[52].mxu0 %v907_v52  ;;  %v856_v62 = vmax.f32 %v814_v55, 0.0 }
 0x281   :  { %v820_v61 = vadd.f32 %v819_v60, %v2184_v29  ;;  %v857_v0 = vmax.f32 %v816_v57, 0.0 }
 0x282   :  { %v858_v63 = vmax.f32 %v818_v59, 0.0 }
 0x283   :  { %v859_v1 = vmax.f32 %v820_v61, 0.0 }
 0x284   :  { %v909_v2 = vpack.c.bf16 %v858_v63, %v856_v62 }
 0x285   :  { %v910_v3 = vpack.c.bf16 %v859_v1, %v857_v0  ;;  %v823_v4 = vpop.f32.mrb[28].mxu1 }
 0x286   :  { %v824_v5 = vadd.f32 %v823_v4, %v2181_v28  ;;  %v825_v6 = vpop.f32.mrb[29].mxu1 }
 0x287   :  { %v826_v7 = vadd.f32 %v825_v6, %v2184_v29  ;;  %v827_v8 = vpop.f32.mrb[30].mxu1  ;;  %1176 = vmatprep.mubr.bf16.mxu0 %v910_v3 }
 0x288   :  { %v828_v9 = vadd.f32 %v827_v8, %v2181_v28  ;;  %v829_v10 = vpop.f32.mrb[31].mxu1  ;;  %1177 = vmatmul.mubr.bf16.gmra.mrb[56].mxu0 %v909_v2  ;;  %v860_v11 = vmax.f32 %v824_v5, 0.0  ;;  %v896_v28 = vld [vmem:[%s2301_s6] sm:$0x3] }
 0x289   :  { %v830_v17 = vadd.f32 %v829_v10, %v2184_v29  ;;  %v861_v18 = vmax.f32 %v826_v7, 0.0  ;;  %v2222_v22 = vrot.slane %v896_v28, %v2132_v14  ;;  %v2225_v29 = vrot.slane %v896_v28, %v2137_v16 }
 0x28a   :  { %v862_v12 = vmax.f32 %v828_v9, 0.0 }
 0x28b   :  { %v863_v13 = vmax.f32 %v830_v17, 0.0 }
 0x28c   :  { %v911_v15 = vpack.c.bf16 %v862_v12, %v860_v11 }
 0x28d   :  { %v912_v19 = vpack.c.bf16 %v863_v13, %v861_v18 }
 0x28f   :  { %1186 = vmatprep.mubr.bf16.mxu0 %v912_v19 }
 0x290   :  { %1187 = vmatmul.mubr.bf16.gmra.mrb[60].mxu0 %v911_v15 }
 0x32b   :  { %v1118_v23 = vpop.f32.mrb[32].mxu0 }
 0x32c   :  { %v1119_v24 = vadd.f32 %v1118_v23, %v2222_v22  ;;  %v1120_v25 = vpop.f32.mrb[33].mxu0 }
 0x32d   :  { %v1121_v26 = vadd.f32 %v1120_v25, %v2225_v29  ;;  %v1122_v27 = vpop.f32.mrb[34].mxu0 }
 0x32e   :  { %v1123_v30 = vadd.f32 %v1122_v27, %v2222_v22  ;;  %v1124_v31 = vpop.f32.mrb[35].mxu0  ;;  %v1197_v33 = vmax.f32 %v1119_v24, 0.0 }
 0x32f   :  { %v1125_v32 = vadd.f32 %v1124_v31, %v2225_v29  ;;  %v1198_v35 = vmax.f32 %v1121_v26, 0.0 }
 0x330   :  { %v1199_v34 = vmax.f32 %v1123_v30, 0.0 }
 0x331   :  { %v1200_v14 = vmax.f32 %v1125_v32, 0.0 }
 0x332   :  { %v1262_v36 = vpack.c.bf16 %v1199_v34, %v1197_v33 }
 0x333   :  { %v1263_v37 = vpack.c.bf16 %v1200_v14, %v1198_v35  ;;  %v1128_v16 = vpop.f32.mrb[36].mxu0 }
 0x334   :  { %v1129_v38 = vadd.f32 %v1128_v16, %v2222_v22  ;;  %v1130_v39 = vpop.f32.mrb[37].mxu0 }
 0x335   :  { %v1131_v40 = vadd.f32 %v1130_v39, %v2225_v29  ;;  %v1132_v41 = vpop.f32.mrb[38].mxu0  ;;  %1412 = vmatprep.mubr.bf16.mxu1 %v1263_v37 }
 0x336   :  { %v1133_v42 = vadd.f32 %v1132_v41, %v2222_v22  ;;  %v1134_v43 = vpop.f32.mrb[39].mxu0  ;;  %1413 = vmatmul.mubr.bf16.vlgmr.msra.gmra.mrb[32].mxu1 %v1262_v36  ;;  %v1201_v45 = vmax.f32 %v1129_v38, 0.0 }
 0x337   :  { %v1135_v44 = vadd.f32 %v1134_v43, %v2225_v29  ;;  %v1202_v47 = vmax.f32 %v1131_v40, 0.0 }
 0x338   :  { %v1203_v46 = vmax.f32 %v1133_v42, 0.0 }
 0x339   :  { %v1204_v48 = vmax.f32 %v1135_v44, 0.0 }
 0x33a   :  { %v1264_v49 = vpack.c.bf16 %v1203_v46, %v1201_v45 }
 0x33b   :  { %v1265_v50 = vpack.c.bf16 %v1204_v48, %v1202_v47  ;;  %v1138_v51 = vpop.f32.mrb[40].mxu0 }
 0x33c   :  { %v1139_v52 = vadd.f32 %v1138_v51, %v2222_v22  ;;  %v1140_v53 = vpop.f32.mrb[41].mxu0 }
 0x33d   :  { %v1141_v54 = vadd.f32 %v1140_v53, %v2225_v29  ;;  %v1142_v55 = vpop.f32.mrb[42].mxu0  ;;  %1420 = vmatprep.mubr.bf16.mxu1 %v1265_v50 }
 0x33e   :  { %v1143_v56 = vadd.f32 %v1142_v55, %v2222_v22  ;;  %v1144_v57 = vpop.f32.mrb[43].mxu0  ;;  %1421 = vmatmul.mubr.bf16.gmra.mrb[36].mxu1 %v1264_v49  ;;  %v1205_v59 = vmax.f32 %v1139_v52, 0.0 }
 0x33f   :  { %v1145_v58 = vadd.f32 %v1144_v57, %v2225_v29  ;;  %v1206_v61 = vmax.f32 %v1141_v54, 0.0 }
 0x340   :  { %v1207_v60 = vmax.f32 %v1143_v56, 0.0 }
 0x341   :  { %v1208_v62 = vmax.f32 %v1145_v58, 0.0 }
 0x342   :  { %v1266_v63 = vpack.c.bf16 %v1207_v60, %v1205_v59 }
 0x343   :  { %v1267_v0 = vpack.c.bf16 %v1208_v62, %v1206_v61  ;;  %v1148_v1 = vpop.f32.mrb[44].mxu0 }
 0x344   :  { %v1149_v2 = vadd.f32 %v1148_v1, %v2222_v22  ;;  %v1150_v3 = vpop.f32.mrb[45].mxu0 }
 0x345   :  { %v1151_v4 = vadd.f32 %v1150_v3, %v2225_v29  ;;  %v1152_v5 = vpop.f32.mrb[46].mxu0  ;;  %1428 = vmatprep.mubr.bf16.mxu1 %v1267_v0 }
 0x346   :  { %v1153_v6 = vadd.f32 %v1152_v5, %v2222_v22  ;;  %v1154_v7 = vpop.f32.mrb[47].mxu0  ;;  %1429 = vmatmul.mubr.bf16.gmra.mrb[40].mxu1 %v1266_v63  ;;  %v1209_v9 = vmax.f32 %v1149_v2, 0.0 }
 0x347   :  { %v1155_v8 = vadd.f32 %v1154_v7, %v2225_v29  ;;  %v1210_v17 = vmax.f32 %v1151_v4, 0.0 }
 0x348   :  { %v1211_v10 = vmax.f32 %v1153_v6, 0.0 }
 0x349   :  { %v1212_v11 = vmax.f32 %v1155_v8, 0.0 }
 0x34a   :  { %v1268_v12 = vpack.c.bf16 %v1211_v10, %v1209_v9  ;;  %v2262_v10 = vld [vmem:[%s2303_s8] ss:$0 sm:$0xff]  ;;  %s2012_s8 = smov [#allocation11]  }
 0x34b   :  { %v1269_v18 = vpack.c.bf16 %v1212_v11, %v1210_v17  ;;  %v1158_v13 = vpop.f32.mrb[48].mxu0  ;;  %s1498_s14 = sshll.u32 %s2012_s8, 4  ;;  %s1499_s14 = int_to_ptr.vmem [resolvable:$true] %s1498_s14 }
 0x34c   :  { %v1159_v15 = vadd.f32 %v1158_v13, %v2222_v22  ;;  %v1160_v19 = vpop.f32.mrb[49].mxu0  ;;  %s1971_s15 = scalar_lea.vmem %s1499_s14, 2048  ;;  %p1976_p13 = scmp.lt.s32.totalorder %s1499_s14, %s1499_s14 }
 0x34d   :  { %v1161_v20 = vadd.f32 %v1160_v19, %v2225_v29  ;;  %v1162_v21 = vpop.f32.mrb[50].mxu0  ;;  %1436 = vmatprep.mubr.bf16.mxu1 %v1269_v18  ;;  %p1972_p12 = scmp.ne.s32.totalorder %s1499_s14, %s1971_s15  ;;  %p1977_p0 = scmp.lt.s32.totalorder %s1971_s15, %s1971_s15 }
 0x34e   :  { %v1163_v28 = vadd.f32 %v1162_v21, %v2222_v22  ;;  %v1164_v23 = vpop.f32.mrb[51].mxu0  ;;  %1437 = vmatmul.mubr.bf16.gmra.mrb[44].mxu1 %v1268_v12  ;;  %v1213_v25 = vmax.f32 %v1159_v15, 0.0 }
 0x34f   :  { %v1165_v24 = vadd.f32 %v1164_v23, %v2225_v29  ;;  %v1214_v27 = vmax.f32 %v1161_v20, 0.0  ;;  %p1978_p1 = por %p1977_p0, %p1976_p13 }
 0x350   :  { %v1215_v26 = vmax.f32 %v1163_v28, 0.0 }
 0x351   :  { %v1216_v30 = vmax.f32 %v1165_v24, 0.0  ;;  %p1979_p2 = pnand %p1978_p1, %p1972_p12 }
 0x352   :  { %v1270_v31 = vpack.c.bf16 %v1215_v26, %v1213_v25 }
 0x353   :  { %v1271_v32 = vpack.c.bf16 %v1216_v30, %v1214_v27  ;;  %v1168_v33 = vpop.f32.mrb[52].mxu0 }
 0x354   :  { %v1169_v34 = vadd.f32 %v1168_v33, %v2222_v22  ;;  %v1170_v35 = vpop.f32.mrb[53].mxu0 }
 0x355   :  { %v1171_v14 = vadd.f32 %v1170_v35, %v2225_v29  ;;  %v1172_v36 = vpop.f32.mrb[54].mxu0  ;;  %1444 = vmatprep.mubr.bf16.mxu1 %v1271_v32 }
 0x356   :  { %v1173_v37 = vadd.f32 %v1172_v36, %v2222_v22  ;;  %v1174_v16 = vpop.f32.mrb[55].mxu0  ;;  %1445 = vmatmul.mubr.bf16.gmra.mrb[48].mxu1 %v1270_v31  ;;  %v1217_v39 = vmax.f32 %v1169_v34, 0.0 }
 0x357   :  { %v1175_v38 = vadd.f32 %v1174_v16, %v2225_v29  ;;  %v1218_v41 = vmax.f32 %v1171_v14, 0.0 }
 0x358   :  { %v1219_v40 = vmax.f32 %v1173_v37, 0.0 }
 0x359   :  { %v1220_v42 = vmax.f32 %v1175_v38, 0.0 }
 0x35a   :  { %v1272_v43 = vpack.c.bf16 %v1219_v40, %v1217_v39 }
 0x35b   :  { %v1273_v44 = vpack.c.bf16 %v1220_v42, %v1218_v41  ;;  %v1178_v45 = vpop.f32.mrb[56].mxu0 }
 0x35c   :  { %v1179_v46 = vadd.f32 %v1178_v45, %v2222_v22  ;;  %v1180_v47 = vpop.f32.mrb[57].mxu0 }
 0x35d   :  { %v1181_v48 = vadd.f32 %v1180_v47, %v2225_v29  ;;  %v1182_v49 = vpop.f32.mrb[58].mxu0  ;;  %1452 = vmatprep.mubr.bf16.mxu1 %v1273_v44 }
 0x35e   :  { %v1183_v50 = vadd.f32 %v1182_v49, %v2222_v22  ;;  %v1184_v51 = vpop.f32.mrb[59].mxu0  ;;  %1453 = vmatmul.mubr.bf16.gmra.mrb[52].mxu1 %v1272_v43  ;;  %v1221_v53 = vmax.f32 %v1179_v46, 0.0 }
 0x35f   :  { %v1185_v52 = vadd.f32 %v1184_v51, %v2225_v29  ;;  %v1222_v55 = vmax.f32 %v1181_v48, 0.0 }
 0x360   :  { %v1223_v54 = vmax.f32 %v1183_v50, 0.0 }
 0x361   :  { %v1224_v56 = vmax.f32 %v1185_v52, 0.0 }
 0x362   :  { %v1274_v57 = vpack.c.bf16 %v1223_v54, %v1221_v53 }
 0x363   :  { %v1275_v58 = vpack.c.bf16 %v1224_v56, %v1222_v55  ;;  %v1188_v59 = vpop.f32.mrb[60].mxu0 }
 0x364   :  { %v1189_v60 = vadd.f32 %v1188_v59, %v2222_v22  ;;  %v1190_v61 = vpop.f32.mrb[61].mxu0 }
 0x365   :  { %v1191_v62 = vadd.f32 %v1190_v61, %v2225_v29  ;;  %v1192_v63 = vpop.f32.mrb[62].mxu0  ;;  %1460 = vmatprep.mubr.bf16.mxu1 %v1275_v58 }
 0x366   :  { %v1193_v0 = vadd.f32 %v1192_v63, %v2222_v22  ;;  %v1194_v1 = vpop.f32.mrb[63].mxu0  ;;  %1461 = vmatmul.mubr.bf16.gmra.mrb[56].mxu1 %v1274_v57  ;;  %v1225_v3 = vmax.f32 %v1189_v60, 0.0 }
 0x367   :  { %v1195_v2 = vadd.f32 %v1194_v1, %v2225_v29  ;;  %v1226_v5 = vmax.f32 %v1191_v62, 0.0 }
 0x368   :  { %v1227_v4 = vmax.f32 %v1193_v0, 0.0 }
 0x369   :  { %v1228_v6 = vmax.f32 %v1195_v2, 0.0 }
 0x36a   :  { %v1276_v7 = vpack.c.bf16 %v1227_v4, %v1225_v3 }
 0x36b   :  { %v1277_v8 = vpack.c.bf16 %v1228_v6, %v1226_v5 }
 0x36d   :  { %1468 = vmatprep.mubr.bf16.mxu1 %v1277_v8 }
 0x36e   :  { %1469 = vmatmul.mubr.bf16.gmra.mrb[60].mxu1 %v1276_v7 }
 0x409   :  { %v1641_v9 = vpop.f32.mrb[32].mxu1 }
 0x40a   :  { %v1642_v17 = vpop.f32.mrb[33].mxu1 }
 0x40b   :  { %v1643_v22 = vadd.f32 %v1642_v17, %v1641_v9  ;;  %v1644_v11 = vpop.f32.mrb[34].mxu1 }
 0x40c   :  { %v1645_v12 = vpop.f32.mrb[35].mxu1 }
 0x40d   :  { %v1415_v29 = vadd.f32 %v1643_v22, %v2262_v10  ;;  %v1646_v18 = vadd.f32 %v1645_v12, %v1644_v11 }
 0x40f   :  { %1477 = vst [vmem:[#allocation11] sm:$0xff] %v1415_v29  ;;  %v1418_v13 = vadd.f32 %v1646_v18, %v2262_v10 }
 0x411   :  { %1478 = vst [vmem:[#allocation11 + $0x8] sm:$0xff] %v1418_v13  ;;  %v1647_v15 = vpop.f32.mrb[36].mxu1 }
 0x412   :  { %v1648_v19 = vpop.f32.mrb[37].mxu1 }
 0x413   :  { %v1649_v20 = vadd.f32 %v1648_v19, %v1647_v15  ;;  %v1650_v21 = vpop.f32.mrb[38].mxu1 }
 0x414   :  { %v1651_v28 = vpop.f32.mrb[39].mxu1 }
 0x415   :  { %v1423_v23 = vadd.f32 %v1649_v20, %v2262_v10  ;;  %v1652_v24 = vadd.f32 %v1651_v28, %v1650_v21 }
 0x417   :  { %1479 = vst [vmem:[#allocation11 + $0x10] sm:$0xff] %v1423_v23  ;;  %v1426_v25 = vadd.f32 %v1652_v24, %v2262_v10 }
 0x419   :  { %1480 = vst [vmem:[#allocation11 + $0x18] sm:$0xff] %v1426_v25  ;;  %v1653_v26 = vpop.f32.mrb[40].mxu1 }
 0x41a   :  { %v1654_v27 = vpop.f32.mrb[41].mxu1 }
 0x41b   :  { %v1655_v30 = vadd.f32 %v1654_v27, %v1653_v26  ;;  %v1656_v31 = vpop.f32.mrb[42].mxu1 }
 0x41c   :  { %v1657_v32 = vpop.f32.mrb[43].mxu1 }
 0x41d   :  { %v1431_v33 = vadd.f32 %v1655_v30, %v2262_v10  ;;  %v1658_v34 = vadd.f32 %v1657_v32, %v1656_v31 }
 0x41f   :  { %1481 = vst [vmem:[#allocation11 + $0x20] sm:$0xff] %v1431_v33  ;;  %v1434_v35 = vadd.f32 %v1658_v34, %v2262_v10 }
 0x421   :  { %1482 = vst [vmem:[#allocation11 + $0x28] sm:$0xff] %v1434_v35  ;;  %v1659_v14 = vpop.f32.mrb[44].mxu1 }
 0x422   :  { %v1660_v36 = vpop.f32.mrb[45].mxu1 }
 0x423   :  { %v1661_v37 = vadd.f32 %v1660_v36, %v1659_v14  ;;  %v1662_v16 = vpop.f32.mrb[46].mxu1 }
 0x424   :  { %v1663_v38 = vpop.f32.mrb[47].mxu1 }
 0x425   :  { %v1439_v39 = vadd.f32 %v1661_v37, %v2262_v10  ;;  %v1664_v40 = vadd.f32 %v1663_v38, %v1662_v16 }
 0x427   :  { %1483 = vst [vmem:[#allocation11 + $0x30] sm:$0xff] %v1439_v39  ;;  %v1442_v41 = vadd.f32 %v1664_v40, %v2262_v10 }
 0x429   :  { %1484 = vst [vmem:[#allocation11 + $0x38] sm:$0xff] %v1442_v41  ;;  %v1665_v42 = vpop.f32.mrb[48].mxu1 }
 0x42a   :  { %v1666_v43 = vpop.f32.mrb[49].mxu1 }
 0x42b   :  { %v1667_v44 = vadd.f32 %v1666_v43, %v1665_v42  ;;  %v1668_v45 = vpop.f32.mrb[50].mxu1 }
 0x42c   :  { %v1669_v46 = vpop.f32.mrb[51].mxu1 }
 0x42d   :  { %v1447_v47 = vadd.f32 %v1667_v44, %v2262_v10  ;;  %v1670_v48 = vadd.f32 %v1669_v46, %v1668_v45 }
 0x42f   :  { %1485 = vst [vmem:[#allocation11 + $0x40] sm:$0xff] %v1447_v47  ;;  %v1450_v49 = vadd.f32 %v1670_v48, %v2262_v10 }
 0x431   :  { %1486 = vst [vmem:[#allocation11 + $0x48] sm:$0xff] %v1450_v49  ;;  %v1671_v50 = vpop.f32.mrb[52].mxu1 }
 0x432   :  { %v1672_v51 = vpop.f32.mrb[53].mxu1 }
 0x433   :  { %v1673_v52 = vadd.f32 %v1672_v51, %v1671_v50  ;;  %v1674_v53 = vpop.f32.mrb[54].mxu1 }
 0x434   :  { %v1675_v54 = vpop.f32.mrb[55].mxu1 }
 0x435   :  { %v1455_v55 = vadd.f32 %v1673_v52, %v2262_v10  ;;  %v1676_v56 = vadd.f32 %v1675_v54, %v1674_v53 }
 0x437   :  { %1487 = vst [vmem:[#allocation11 + $0x50] sm:$0xff] %v1455_v55  ;;  %v1458_v57 = vadd.f32 %v1676_v56, %v2262_v10 }
 0x439   :  { %1488 = vst [vmem:[#allocation11 + $0x58] sm:$0xff] %v1458_v57  ;;  %v1677_v58 = vpop.f32.mrb[56].mxu1 }
 0x43a   :  { %v1678_v59 = vpop.f32.mrb[57].mxu1 }
 0x43b   :  { %v1679_v60 = vadd.f32 %v1678_v59, %v1677_v58  ;;  %v1680_v61 = vpop.f32.mrb[58].mxu1 }
 0x43c   :  { %v1681_v62 = vpop.f32.mrb[59].mxu1 }
 0x43d   :  { %v1463_v63 = vadd.f32 %v1679_v60, %v2262_v10  ;;  %v1682_v0 = vadd.f32 %v1681_v62, %v1680_v61 }
 0x43f   :  { %1489 = vst [vmem:[#allocation11 + $0x60] sm:$0xff] %v1463_v63  ;;  %v1466_v1 = vadd.f32 %v1682_v0, %v2262_v10 }
 0x441   :  { %1490 = vst [vmem:[#allocation11 + $0x68] sm:$0xff] %v1466_v1  ;;  %v1683_v2 = vpop.f32.mrb[60].mxu1 }
 0x442   :  { %v1684_v3 = vpop.f32.mrb[61].mxu1 }
 0x443   :  { %v1685_v4 = vadd.f32 %v1684_v3, %v1683_v2  ;;  %v1686_v5 = vpop.f32.mrb[62].mxu1 }
 0x444   :  { %v1687_v6 = vpop.f32.mrb[63].mxu1 }
 0x445   :  { %v1471_v7 = vadd.f32 %v1685_v4, %v2262_v10  ;;  %v1688_v8 = vadd.f32 %v1687_v6, %v1686_v5 }
 0x447   :  { %1491 = vst [vmem:[#allocation11 + $0x70] sm:$0xff] %v1471_v7  ;;  %v1474_v9 = vadd.f32 %v1688_v8, %v2262_v10 }
 0x449   :  { %1492 = vst [vmem:[#allocation11 + $0x78] sm:$0xff] %v1474_v9 }
 0x44a   :  { %1982 = shalt.err (!%p1979_p2)
}
 0x44b   :  { %s1983_s0 = scalar_lea.hbm %s2304_s9, 2048 }
 0x44c   :  { %p1984_p3 = scmp.ne.s32.totalorder %s2304_s9, %s1983_s0  ;;  %p1987_p4 = scmp.lt.u32.totalorder %s1983_s0, %s2304_s9 }
 0x44e   :  { %p1989_p5 = pnand %p1987_p4, %p1984_p3 }
 0x450   :  { %1992 = shalt.err (!%p1989_p5)
}
 0x451   :  { %1504 = dma.vmem_to_hbm [thread:$0]  %s1499_s14, 2048, %s2304_s9, [#allocation4], %s2002_s19, %s2002_s19, %s2003_s20  }
 0x452   :  { %1999 = dma.done.wait [#allocation4], 2048  }
 0x453   :  { %2000 = vsyncadd [#allocation4], 4294965248 }
 0x454   :  { %1508 = vsyncpa [#allocation3], 1 }
 0x455   :  { %1509 = vsyncpa [#allocation6], 1 }
 0x456   :  { %1510 = vsyncpa [#allocation9], 1 }
 0x457   :  { %1511 = vsyncpa [#allocation4], 1 }

// kernel: tpu_custom_call.1
= control target key start
LH: loop header
LB: loop body
LE: loop exit
PB: predicated region body
PF: predicated region fallthrough
CT: control target
= control target key end

     0   :  { %14 = vsyncpa [#allocation3], 0  ;;  %s2295_s0 = inlined_call_operand.hbm [shape: f32[128,256], index: 0, kind: input, shape index: {}]   ;;  %s2296_s1 = inlined_call_operand.hbm [shape: bf16[256,256], index: 1, kind: input, shape index: {}]   ;;  %s2297_s2 = inlined_call_operand.vmem [shape: f32[1,256], index: 2, kind: input, shape index: {}]   ;;  %s2298_s3 = inlined_call_operand.hbm [shape: bf16[256,256], index: 3, kind: input, shape index: {}]   ;;  %s2299_s4 = inlined_call_operand.vmem [shape: f32[1,256], index: 4, kind: input, shape index: {}]   ;;  %s2300_s5 = inlined_call_operand.hbm [shape: bf16[256,256], index: 5, kind: input, shape index: {}]   ;;  %s2301_s6 = inlined_call_operand.vmem [shape: f32[1,256], index: 6, kind: input, shape index: {}]   ;;  %s2302_s7 = inlined_call_operand.hbm [shape: bf16[256,128], index: 7, kind: input, shape index: {}]   ;;  %s2303_s8 = inlined_call_operand.vmem [shape: f32[1,128], index: 8, kind: input, shape index: {}]   ;;  %s2304_s9 = inlined_call_operand.hbm [shape: f32[128,128], index: 9, kind: output, shape index: {}]  }
   0x1   :  { %15 = vsyncpa [#allocation6], 0 }
   0x2   :  { %16 = vsyncpa [#allocation9], 0 }
   0x3   :  { %17 = vsyncpa [#allocation4], 0  ;;  %s2001_s30 = smov [#allocation5]   ;;  %s1861_s13 = scalar_lea.hbm %s2296_s1, 4096 }
   0x4   :  { %s35_s10 = sshll.u32 %s2001_s30, 4  ;;  %p1862_p0 = scmp.ne.s32.totalorder %s2296_s1, %s1861_s13  ;;  %s36_s10 = int_to_ptr.vmem [resolvable:$true] %s35_s10 }
   0x5   :  { %p1865_p1 = scmp.lt.u32.totalorder %s1861_s13, %s2296_s1 }
   0x7   :  { %p1867_p2 = pnand %p1865_p1, %p1862_p0 }
   0x9   :  { %1870 = shalt.err (!%p1867_p2)
}
   0xa   :  { %s1871_s18 = scalar_lea.vmem %s36_s10, 4096  ;;  %p1876_p4 = scmp.lt.s32.totalorder %s36_s10, %s36_s10 }
   0xb   :  { %p1872_p3 = scmp.ne.s32.totalorder %s36_s10, %s1871_s18  ;;  %p1877_p5 = scmp.lt.s32.totalorder %s1871_s18, %s1871_s18 }
   0xd   :  { %p1878_p6 = por %p1877_p5, %p1876_p4 }
   0xf   :  { %p1879_p7 = pnand %p1878_p6, %p1872_p3 }
  0x11   :  { %1882 = shalt.err (!%p1879_p7)
}
  0x12   :  { %s2002_s19 = smov 128   ;;  %s2003_s20 = smov 8  }
  0x13   :  { %41 = dma.hbm_to_vmem [thread:$0]  %s2296_s1, 4096, %s36_s10, [#allocation6], %s2002_s19, %s2002_s19, %s2003_s20  }
  0x14   :  { %s2004_s23 = smov [#allocation8]   ;;  %s2005_s25 = smov [#allocation2]  }
  0x15   :  { %s63_s24 = sshll.u32 %s2004_s23, 4  ;;  %s23_s26 = sshll.u32 %s2005_s25, 4  ;;  %s64_s24 = int_to_ptr.vmem [resolvable:$true] %s63_s24  ;;  %s24_s26 = int_to_ptr.vmem [resolvable:$true] %s23_s26 }
  0x16   :  { %s1883_s29 = scalar_lea.hbm %s2300_s5, 4096 }
  0x17   :  { %p1884_p8 = scmp.ne.s32.totalorder %s2300_s5, %s1883_s29  ;;  %p1887_p9 = scmp.lt.u32.totalorder %s1883_s29, %s2300_s5 }
  0x19   :  { %p1889_p10 = pnand %p1887_p9, %p1884_p8 }
  0x1b   :  { %1892 = shalt.err (!%p1889_p10)
}
  0x1c   :  { %s1893_s1 = scalar_lea.vmem %s64_s24, 4096  ;;  %p1898_p12 = scmp.lt.s32.totalorder %s64_s24, %s64_s24 }
  0x1d   :  { %p1894_p11 = scmp.ne.s32.totalorder %s64_s24, %s1893_s1  ;;  %p1899_p13 = scmp.lt.s32.totalorder %s1893_s1, %s1893_s1 }
  0x1f   :  { %p1900_p0 = por %p1899_p13, %p1898_p12 }
  0x21   :  { %p1901_p1 = pnand %p1900_p0, %p1894_p11 }
  0x23   :  { %1904 = shalt.err (!%p1901_p1)
}
  0x24   :  { %69 = dma.hbm_to_vmem [thread:$0]  %s2300_s5, 4096, %s64_s24, [#allocation9], %s2002_s19, %s2002_s19, %s2003_s20  }
  0x25   :  { %s1905_s17 = scalar_lea.hbm %s2295_s0, 4096 }
  0x26   :  { %p1906_p2 = scmp.ne.s32.totalorder %s2295_s0, %s1905_s17  ;;  %p1909_p3 = scmp.lt.u32.totalorder %s1905_s17, %s2295_s0 }
  0x28   :  { %p1911_p4 = pnand %p1909_p3, %p1906_p2 }
  0x2a   :  { %1914 = shalt.err (!%p1911_p4)
}
  0x2b   :  { %s1915_s25 = scalar_lea.vmem %s24_s26, 4096  ;;  %p1920_p6 = scmp.lt.s32.totalorder %s24_s26, %s24_s26 }
  0x2c   :  { %p1916_p5 = scmp.ne.s32.totalorder %s24_s26, %s1915_s25  ;;  %p1921_p7 = scmp.lt.s32.totalorder %s1915_s25, %s1915_s25 }
  0x2e   :  { %p1922_p8 = por %p1921_p7, %p1920_p6 }
  0x30   :  { %p1923_p9 = pnand %p1922_p8, %p1916_p5 }
  0x32   :  { %1926 = shalt.err (!%p1923_p9)
}
  0x33   :  { %s2006_s5 = smov 256   ;;  %s2007_s24 = smov 16  }
  0x34   :  { %29 = dma.hbm_to_vmem [thread:$0]  %s2295_s0, 4096, %s24_s26, [#allocation3], %s2006_s5, %s2006_s5, %s2007_s24  }
  0x35   :  { %s2008_s29 = smov [#allocation7]   ;;  %s2009_s11 = smov [#allocation10]  }
  0x36   :  { %s49_s30 = sshll.u32 %s2008_s29, 4  ;;  %s77_s12 = sshll.u32 %s2009_s11, 4  ;;  %s50_s30 = int_to_ptr.vmem [resolvable:$true] %s49_s30  ;;  %s78_s12 = int_to_ptr.vmem [resolvable:$true] %s77_s12 }
  0x37   :  { %s1927_s10 = scalar_lea.hbm %s2298_s3, 4096 }
  0x38   :  { %p1928_p10 = scmp.ne.s32.totalorder %s2298_s3, %s1927_s10  ;;  %p1931_p11 = scmp.lt.u32.totalorder %s1927_s10, %s2298_s3 }
  0x3a   :  { %p1933_p12 = pnand %p1931_p11, %p1928_p10 }
  0x3c   :  { %1936 = shalt.err (!%p1933_p12)
}
  0x3d   :  { %s1937_s0 = scalar_lea.vmem %s50_s30, 4096  ;;  %p1942_p0 = scmp.lt.s32.totalorder %s50_s30, %s50_s30 }
  0x3e   :  { %p1938_p13 = scmp.ne.s32.totalorder %s50_s30, %s1937_s0  ;;  %p1943_p1 = scmp.lt.s32.totalorder %s1937_s0, %s1937_s0 }
  0x40   :  { %p1944_p2 = por %p1943_p1, %p1942_p0 }
  0x42   :  { %p1945_p3 = pnand %p1944_p2, %p1938_p13 }
  0x44   :  { %1948 = shalt.err (!%p1945_p3)
}
  0x45   :  { %55 = dma.hbm_to_vmem [thread:$0]  %s2298_s3, 4096, %s50_s30, [#allocation6], %s2002_s19, %s2002_s19, %s2003_s20  }
  0x46   :  { %s1949_s23 = scalar_lea.hbm %s2302_s7, 2048 }
  0x47   :  { %p1950_p4 = scmp.ne.s32.totalorder %s2302_s7, %s1949_s23  ;;  %p1953_p5 = scmp.lt.u32.totalorder %s1949_s23, %s2302_s7 }
  0x49   :  { %p1955_p6 = pnand %p1953_p5, %p1950_p4 }
  0x4b   :  { %1958 = shalt.err (!%p1955_p6)
}
  0x4c   :  { %s1959_s28 = scalar_lea.vmem %s78_s12, 2048  ;;  %p1964_p8 = scmp.lt.s32.totalorder %s78_s12, %s78_s12 }
  0x4d   :  { %p1960_p7 = scmp.ne.s32.totalorder %s78_s12, %s1959_s28  ;;  %p1965_p9 = scmp.lt.s32.totalorder %s1959_s28, %s1959_s28 }
  0x4f   :  { %p1966_p10 = por %p1965_p9, %p1964_p8 }
  0x51   :  { %p1967_p11 = pnand %p1966_p10, %p1960_p7 }
  0x53   :  { %1970 = shalt.err (!%p1967_p11)
}
  0x54   :  { %s2010_s3 = smov 64   ;;  %s2011_s29 = smov 4  }
  0x55   :  { %83 = dma.hbm_to_vmem [thread:$0]  %s2302_s7, 2048, %s78_s12, [#allocation9], %s2010_s3, %s2010_s3, %s2011_s29  }
  0x56   :  { %1993 = dma.done.wait [#allocation3], 4096  }
  0x57   :  { %1994 = vsyncadd [#allocation3], 4294963200 }
  0x58   :  { %1995 = dma.done.wait [#allocation6], 8192  }
  0x59   :  { %1996 = vsyncadd [#allocation6], 4294959104 }
  0x5a   :  { %1997 = dma.done.wait [#allocation9], 6144  }
  0x5b   :  { %1998 = vsyncadd [#allocation9], 4294961152  ;;  %v1701_v0 = vld [vmem:[#allocation5 + $0x4] ss:$8 sps:$4 sm:$0xff]   ;;  %v1703_v1 = vld [vmem:[#allocation5] ss:$8 sps:$4 sm:$0xff]  }
  0x5c   :  { %354 = vmatprep.subr.bf16.mxu0 %v1701_v0  ;;  %v1704_v2 = vld [vmem:[#allocation5 + $0x14] ss:$8 sps:$4 sm:$0xff]   ;;  %v1706_v3 = vld [vmem:[#allocation5 + $0x10] ss:$8 sps:$4 sm:$0xff]   ;;  %v1707_v4 = vld [vmem:[#allocation5 + $0x24] ss:$8 sps:$4 sm:$0xff]  }
  0x5d   :  { %355 = vmatpush1.bf16.msra.mxu0 %v1703_v1  ;;  %v1709_v5 = vld [vmem:[#allocation5 + $0x20] ss:$8 sps:$4 sm:$0xff]   ;;  %v1710_v6 = vld [vmem:[#allocation5 + $0x34] ss:$8 sps:$4 sm:$0xff]   ;;  %v1712_v7 = vld [vmem:[#allocation5 + $0x30] ss:$8 sps:$4 sm:$0xff]  }
  0x5e   :  { %356 = vmatprep.subr.bf16.mxu0 %v1704_v2  ;;  %v1713_v8 = vld [vmem:[#allocation5 + $0x44] ss:$8 sps:$4 sm:$0xff]   ;;  %v1715_v9 = vld [vmem:[#allocation5 + $0x40] ss:$8 sps:$4 sm:$0xff]   ;;  %v1716_v10 = vld [vmem:[#allocation5 + $0x54] ss:$8 sps:$4 sm:$0xff]  }
  0x5f   :  { %v1718_v11 = vld [vmem:[#allocation5 + $0x50] ss:$8 sps:$4 sm:$0xff]   ;;  %v1719_v12 = vld [vmem:[#allocation5 + $0x64] ss:$8 sps:$4 sm:$0xff]   ;;  %v1721_v16 = vld [vmem:[#allocation5 + $0x60] ss:$8 sps:$4 sm:$0xff]  }
  0x60   :  { %v103_v13 = vld [vmem:[#allocation2 + $0x8] sm:$0xff]  ;;  %v105_v14 = vld [vmem:[#allocation2 + $0x18] sm:$0xff]  ;;  %v102_v50 = vld [vmem:[#allocation2] sm:$0xff] }
  0x61   :  { %357 = vmatpush1.bf16.msra.mxu0 %v1706_v3  ;;  %v168_v15 = vpack.c.bf16 %v105_v14, %v103_v13  ;;  %v1722_v17 = vld [vmem:[#allocation5 + $0x74] ss:$8 sps:$4 sm:$0xff]   ;;  %v1724_v18 = vld [vmem:[#allocation5 + $0x70] ss:$8 sps:$4 sm:$0xff]   ;;  %v1725_v19 = vld [vmem:[#allocation5 + $0x84] ss:$8 sps:$4 sm:$0xff]  }
  0x62   :  { %358 = vmatprep.subr.bf16.mxu0 %v1707_v4  ;;  %v1727_v20 = vld [vmem:[#allocation5 + $0x80] ss:$8 sps:$4 sm:$0xff]   ;;  %v1728_v21 = vld [vmem:[#allocation5 + $0x94] ss:$8 sps:$4 sm:$0xff]   ;;  %v1749_v22 = vld [vmem:[#allocation7 + $0x4] ss:$8 sps:$4 sm:$0xff]  }
  0x63   :  { %386 = vmatprep.mubr.bf16.mxu0 %v168_v15  ;;  %v1751_v23 = vld [vmem:[#allocation7] ss:$8 sps:$4 sm:$0xff]   ;;  %v1730_v24 = vld [vmem:[#allocation5 + $0x90] ss:$8 sps:$4 sm:$0xff]   ;;  %719 = vmatprep.subr.bf16.mxu1 %v1749_v22  ;;  %v1752_v25 = vld [vmem:[#allocation7 + $0x14] ss:$8 sps:$4 sm:$0xff]  }
  0x64   :  { %v1731_v26 = vld [vmem:[#allocation5 + $0xa4] ss:$8 sps:$4 sm:$0xff]   ;;  %720 = vmatpush1.bf16.msra.mxu1 %v1751_v23  ;;  %v1754_v27 = vld [vmem:[#allocation7 + $0x10] ss:$8 sps:$4 sm:$0xff]   ;;  %v1733_v29 = vld [vmem:[#allocation5 + $0xa0] ss:$8 sps:$4 sm:$0xff]  }
  0x65   :  { %359 = vmatpush1.bf16.msra.mxu0 %v1709_v5  ;;  %721 = vmatprep.subr.bf16.mxu1 %v1752_v25  ;;  %v1755_v28 = vld [vmem:[#allocation7 + $0x24] ss:$8 sps:$4 sm:$0xff]   ;;  %v1734_v30 = vld [vmem:[#allocation5 + $0xb4] ss:$8 sps:$4 sm:$0xff]   ;;  %v1757_v31 = vld [vmem:[#allocation7 + $0x20] ss:$8 sps:$4 sm:$0xff]  }
  0x66   :  { %360 = vmatprep.subr.bf16.mxu0 %v1710_v6  ;;  %v1758_v32 = vld [vmem:[#allocation7 + $0x34] ss:$8 sps:$4 sm:$0xff]   ;;  %v1736_v33 = vld [vmem:[#allocation5 + $0xb0] ss:$8 sps:$4 sm:$0xff]   ;;  %v1737_v34 = vld [vmem:[#allocation5 + $0xc4] ss:$8 sps:$4 sm:$0xff]  }
  0x67   :  { %v1760_v35 = vld [vmem:[#allocation7 + $0x30] ss:$8 sps:$4 sm:$0xff]   ;;  %v1761_v36 = vld [vmem:[#allocation7 + $0x44] ss:$8 sps:$4 sm:$0xff]   ;;  %v1739_v37 = vld [vmem:[#allocation5 + $0xc0] ss:$8 sps:$4 sm:$0xff]  }
  0x68   :  { %722 = vmatpush1.bf16.msra.mxu1 %v1754_v27  ;;  %v1740_v38 = vld [vmem:[#allocation5 + $0xd4] ss:$8 sps:$4 sm:$0xff]   ;;  %v1763_v39 = vld [vmem:[#allocation7 + $0x40] ss:$8 sps:$4 sm:$0xff]   ;;  %v1742_v41 = vld [vmem:[#allocation5 + $0xd0] ss:$8 sps:$4 sm:$0xff]  }
  0x69   :  { %361 = vmatpush1.bf16.msra.mxu0 %v1712_v7  ;;  %723 = vmatprep.subr.bf16.mxu1 %v1755_v28  ;;  %v1764_v40 = vld [vmem:[#allocation7 + $0x54] ss:$8 sps:$4 sm:$0xff]   ;;  %v1743_v42 = vld [vmem:[#allocation5 + $0xe4] ss:$8 sps:$4 sm:$0xff]   ;;  %v1766_v43 = vld [vmem:[#allocation7 + $0x50] ss:$8 sps:$4 sm:$0xff]  }
  0x6a   :  { %362 = vmatprep.subr.bf16.mxu0 %v1713_v8  ;;  %v1767_v44 = vld [vmem:[#allocation7 + $0x64] ss:$8 sps:$4 sm:$0xff]   ;;  %v1745_v45 = vld [vmem:[#allocation5 + $0xe0] ss:$8 sps:$4 sm:$0xff]   ;;  %v1746_v47 = vld [vmem:[#allocation5 + $0xf4] ss:$8 sps:$4 sm:$0xff]  }
  0x6b   :  { %v1769_v46 = vld [vmem:[#allocation7 + $0x60] ss:$8 sps:$4 sm:$0xff]   ;;  %v1770_v48 = vld [vmem:[#allocation7 + $0x74] ss:$8 sps:$4 sm:$0xff]   ;;  %v1748_v49 = vld [vmem:[#allocation5 + $0xf0] ss:$8 sps:$4 sm:$0xff]  }
  0x6c   :  { %724 = vmatpush1.bf16.msra.mxu1 %v1757_v31  ;;  %v104_v51 = vld [vmem:[#allocation2 + $0x10] sm:$0xff]  ;;  %v107_v53 = vld [vmem:[#allocation2 + $0x28] sm:$0xff]  ;;  %v109_v54 = vld [vmem:[#allocation2 + $0x38] sm:$0xff] }
  0x6d   :  { %363 = vmatpush1.bf16.msra.mxu0 %v1715_v9  ;;  %725 = vmatprep.subr.bf16.mxu1 %v1758_v32  ;;  %v1772_v52 = vld [vmem:[#allocation7 + $0x70] ss:$8 sps:$4 sm:$0xff]   ;;  %v1773_v55 = vld [vmem:[#allocation7 + $0x84] ss:$8 sps:$4 sm:$0xff]   ;;  %v1775_v56 = vld [vmem:[#allocation7 + $0x80] ss:$8 sps:$4 sm:$0xff]   ;;  %v167_v57 = vpack.c.bf16 %v104_v51, %v102_v50  ;;  %v170_v59 = vpack.c.bf16 %v109_v54, %v107_v53 }
  0x6e   :  { %364 = vmatprep.subr.bf16.mxu0 %v1716_v10  ;;  %v1776_v58 = vld [vmem:[#allocation7 + $0x94] ss:$8 sps:$4 sm:$0xff]   ;;  %v106_v60 = vld [vmem:[#allocation2 + $0x20] sm:$0xff]  ;;  %v1778_v62 = vld [vmem:[#allocation7 + $0x90] ss:$8 sps:$4 sm:$0xff]  }
  0x6f   :  { %v108_v61 = vld [vmem:[#allocation2 + $0x30] sm:$0xff]  ;;  %v111_v63 = vld [vmem:[#allocation2 + $0x48] sm:$0xff]  ;;  %v113_v0 = vld [vmem:[#allocation2 + $0x58] sm:$0xff] }
  0x70   :  { %726 = vmatpush1.bf16.msra.mxu1 %v1760_v35  ;;  %v1779_v1 = vld [vmem:[#allocation7 + $0xa4] ss:$8 sps:$4 sm:$0xff]   ;;  %v1781_v2 = vld [vmem:[#allocation7 + $0xa0] ss:$8 sps:$4 sm:$0xff]   ;;  %v169_v3 = vpack.c.bf16 %v108_v61, %v106_v60  ;;  %v1782_v4 = vld [vmem:[#allocation7 + $0xb4] ss:$8 sps:$4 sm:$0xff]   ;;  %v172_v5 = vpack.c.bf16 %v113_v0, %v111_v63 }
  0x71   :  { %365 = vmatpush1.bf16.msra.mxu0 %v1718_v11  ;;  %727 = vmatprep.subr.bf16.mxu1 %v1761_v36  ;;  %v110_v6 = vld [vmem:[#allocation2 + $0x40] sm:$0xff]  ;;  %v112_v7 = vld [vmem:[#allocation2 + $0x50] sm:$0xff]  ;;  %v115_v9 = vld [vmem:[#allocation2 + $0x68] sm:$0xff] }
  0x72   :  { %366 = vmatprep.subr.bf16.mxu0 %v1719_v12  ;;  %v1784_v8 = vld [vmem:[#allocation7 + $0xb0] ss:$8 sps:$4 sm:$0xff]   ;;  %v1785_v11 = vld [vmem:[#allocation7 + $0xc4] ss:$8 sps:$4 sm:$0xff]   ;;  %v171_v12 = vpack.c.bf16 %v112_v7, %v110_v6  ;;  %v1787_v14 = vld [vmem:[#allocation7 + $0xc0] ss:$8 sps:$4 sm:$0xff]  }
  0x73   :  { %v117_v10 = vld [vmem:[#allocation2 + $0x78] sm:$0xff]  ;;  %v118_v22 = vld [vmem:[#allocation2 + $0x80] sm:$0xff]  ;;  %v120_v23 = vld [vmem:[#allocation2 + $0x90] sm:$0xff] }
  0x74   :  { %728 = vmatpush1.bf16.msra.mxu1 %v1763_v39  ;;  %v174_v13 = vpack.c.bf16 %v117_v10, %v115_v9  ;;  %v1788_v15 = vld [vmem:[#allocation7 + $0xd4] ss:$8 sps:$4 sm:$0xff]   ;;  %v122_v28 = vld [vmem:[#allocation2 + $0xa0] sm:$0xff]  ;;  %v131_v36 = vld [vmem:[#allocation2 + $0xe8] sm:$0xff]  ;;  %v184_v9 = vlaneseq }
  0x75   :  { %367 = vmatpush1.bf16.msra.mxu0 %v1721_v16  ;;  %729 = vmatprep.subr.bf16.mxu1 %v1764_v40  ;;  %v114_v16 = vld [vmem:[#allocation2 + $0x60] sm:$0xff]  ;;  %v125_v25 = vld [vmem:[#allocation2 + $0xb8] sm:$0xff]  ;;  %v128_v35 = vld [vmem:[#allocation2 + $0xd0] sm:$0xff] }
  0x76   :  { %368 = vmatprep.subr.bf16.mxu0 %v1722_v17  ;;  %v116_v17 = vld [vmem:[#allocation2 + $0x70] sm:$0xff]  ;;  %v129_v31 = vld [vmem:[#allocation2 + $0xd8] sm:$0xff]  ;;  %v130_v40 = vld [vmem:[#allocation2 + $0xe0] sm:$0xff] }
  0x77   :  { %v1802_v50 = vld [vmem:[#allocation8 + $0x14] ss:$8 sps:$4 sm:$0xff]   ;;  %v1800_v51 = vld [vmem:[#allocation8 + $0x10] ss:$8 sps:$4 sm:$0xff]   ;;  %v1803_v53 = vld [vmem:[#allocation8 + $0x20] ss:$8 sps:$4 sm:$0xff]  }
  0x78   :  { %730 = vmatpush1.bf16.msra.mxu1 %v1766_v43  ;;  %v1790_v43 = vld [vmem:[#allocation7 + $0xd0] ss:$8 sps:$4 sm:$0xff]   ;;  %v1808_v54 = vld [vmem:[#allocation8 + $0x34] ss:$8 sps:$4 sm:$0xff]   ;;  %v1817_v60 = vld [vmem:[#allocation8 + $0x64] ss:$8 sps:$4 sm:$0xff]  }
  0x79   :  { %369 = vmatpush1.bf16.msra.mxu0 %v1724_v18  ;;  %731 = vmatprep.subr.bf16.mxu1 %v1767_v44  ;;  %v119_v18 = vld [vmem:[#allocation2 + $0x88] sm:$0xff]  ;;  %v1818_v63 = vld [vmem:[#allocation8 + $0x70] ss:$8 sps:$4 sm:$0xff]   ;;  %v1832_v6 = vld [vmem:[#allocation8 + $0xb4] ss:$8 sps:$4 sm:$0xff]  }
  0x7a   :  { %370 = vmatprep.subr.bf16.mxu0 %v1725_v19  ;;  %v121_v19 = vld [vmem:[#allocation2 + $0x98] sm:$0xff]  ;;  %v1791_v44 = vld [vmem:[#allocation7 + $0xe4] ss:$8 sps:$4 sm:$0xff]   ;;  %v1815_v61 = vld [vmem:[#allocation8 + $0x60] ss:$8 sps:$4 sm:$0xff]  }
  0x7b   :  { %v1823_v0 = vld [vmem:[#allocation8 + $0x84] ss:$8 sps:$4 sm:$0xff]   ;;  %v1830_v7 = vld [vmem:[#allocation8 + $0xb0] ss:$8 sps:$4 sm:$0xff]   ;;  %v1833_v10 = vld [vmem:[#allocation8 + $0xc0] ss:$8 sps:$4 sm:$0xff]  }
  0x7c   :  { %732 = vmatpush1.bf16.msra.mxu1 %v1769_v46  ;;  %v1794_v46 = vld [vmem:[#allocation7 + $0xf4] ss:$8 sps:$4 sm:$0xff]  }
  0x7d   :  { %371 = vmatpush1.bf16.msra.mxu0 %v1727_v20  ;;  %733 = vmatprep.subr.bf16.mxu1 %v1770_v48  ;;  %v173_v20 = vpack.c.bf16 %v116_v17, %v114_v16  ;;  %v1797_v48 = vld [vmem:[#allocation8] ss:$8 sps:$4 sm:$0xff]  }
  0x7e   :  { %372 = vmatprep.subr.bf16.mxu0 %v1728_v21  ;;  %v176_v21 = vpack.c.bf16 %v121_v19, %v119_v18 }
  0x80   :  { %734 = vmatpush1.bf16.msra.mxu1 %v1772_v52  ;;  %v1805_v52 = vld [vmem:[#allocation8 + $0x24] ss:$8 sps:$4 sm:$0xff]  }
  0x81   :  { %373 = vmatpush1.bf16.msra.mxu0 %v1730_v24  ;;  %735 = vmatprep.subr.bf16.mxu1 %v1773_v55  ;;  %v123_v24 = vld [vmem:[#allocation2 + $0xa8] sm:$0xff]  ;;  %v1806_v55 = vld [vmem:[#allocation8 + $0x30] ss:$8 sps:$4 sm:$0xff]  }
  0x82   :  { %374 = vmatprep.subr.bf16.mxu0 %v1731_v26  ;;  %v175_v26 = vpack.c.bf16 %v120_v23, %v118_v22  ;;  %v178_v27 = vpack.c.bf16 %v125_v25, %v123_v24 }
  0x84   :  { %736 = vmatpush1.bf16.msra.mxu1 %v1775_v56  ;;  %v1811_v56 = vld [vmem:[#allocation8 + $0x44] ss:$8 sps:$4 sm:$0xff]  }
  0x85   :  { %375 = vmatpush1.bf16.msra.mxu0 %v1733_v29  ;;  %737 = vmatprep.subr.bf16.mxu1 %v1776_v58  ;;  %v124_v29 = vld [vmem:[#allocation2 + $0xb0] sm:$0xff] }
  0x86   :  { %376 = vmatprep.subr.bf16.mxu0 %v1734_v30  ;;  %v127_v30 = vld [vmem:[#allocation2 + $0xc8] sm:$0xff]  ;;  %v177_v32 = vpack.c.bf16 %v124_v29, %v122_v28  ;;  %v1814_v58 = vld [vmem:[#allocation8 + $0x54] ss:$8 sps:$4 sm:$0xff]  }
  0x88   :  { %738 = vmatpush1.bf16.msra.mxu1 %v1778_v62  ;;  %v1820_v62 = vld [vmem:[#allocation8 + $0x74] ss:$8 sps:$4 sm:$0xff]  }
  0x89   :  { %377 = vmatpush1.bf16.msra.mxu0 %v1736_v33  ;;  %739 = vmatprep.subr.bf16.mxu1 %v1779_v1  ;;  %v180_v33 = vpack.c.bf16 %v129_v31, %v127_v30  ;;  %v1821_v1 = vld [vmem:[#allocation8 + $0x80] ss:$8 sps:$4 sm:$0xff]  }
  0x8a   :  { %378 = vmatprep.subr.bf16.mxu0 %v1737_v34  ;;  %v126_v34 = vld [vmem:[#allocation2 + $0xc0] sm:$0xff] }
  0x8c   :  { %740 = vmatpush1.bf16.msra.mxu1 %v1781_v2  ;;  %v1826_v2 = vld [vmem:[#allocation8 + $0x94] ss:$8 sps:$4 sm:$0xff]  }
  0x8d   :  { %379 = vmatpush1.bf16.msra.mxu0 %v1739_v37  ;;  %741 = vmatprep.subr.bf16.mxu1 %v1782_v4  ;;  %v133_v37 = vld [vmem:[#allocation2 + $0xf8] sm:$0xff]  ;;  %v1829_v4 = vld [vmem:[#allocation8 + $0xa4] ss:$8 sps:$4 sm:$0xff]  }
  0x8e   :  { %380 = vmatprep.subr.bf16.mxu0 %v1740_v38  ;;  %v179_v38 = vpack.c.bf16 %v128_v35, %v126_v34  ;;  %v182_v39 = vpack.c.bf16 %v133_v37, %v131_v36 }
  0x90   :  { %742 = vmatpush1.bf16.msra.mxu1 %v1784_v8  ;;  %v1835_v8 = vld [vmem:[#allocation8 + $0xc4] ss:$8 sps:$4 sm:$0xff]  }
  0x91   :  { %381 = vmatpush1.bf16.msra.mxu0 %v1742_v41  ;;  %743 = vmatprep.subr.bf16.mxu1 %v1785_v11  ;;  %v132_v41 = vld [vmem:[#allocation2 + $0xf0] sm:$0xff] }
  0x92   :  { %382 = vmatprep.subr.bf16.mxu0 %v1743_v42  ;;  %v181_v42 = vpack.c.bf16 %v132_v41, %v130_v40  ;;  %v1838_v11 = vld [vmem:[#allocation8 + $0xd4] ss:$8 sps:$4 sm:$0xff]  }
  0x94   :  { %744 = vmatpush1.bf16.msra.mxu1 %v1787_v14 }
  0x95   :  { %383 = vmatpush1.bf16.msra.mxu0 %v1745_v45  ;;  %745 = vmatprep.subr.bf16.mxu1 %v1788_v15  ;;  %v1793_v45 = vld [vmem:[#allocation7 + $0xe0] ss:$8 sps:$4 sm:$0xff]  }
  0x96   :  { %384 = vmatprep.subr.bf16.mxu0 %v1746_v47  ;;  %v1796_v47 = vld [vmem:[#allocation7 + $0xf0] ss:$8 sps:$4 sm:$0xff]   ;;  %v166_v15 = vld [vmem:[%s2297_s2] sm:$0x3] }
  0x98   :  { %746 = vmatpush1.bf16.msra.mxu1 %v1790_v43 }
  0x99   :  { %385 = vmatpush1.bf16.msra.mxu0 %v1748_v49  ;;  %747 = vmatprep.subr.bf16.mxu1 %v1791_v44  ;;  %v1799_v49 = vld [vmem:[#allocation8 + $0x4] ss:$8 sps:$4 sm:$0xff]  }
  0x9a   :  { %1084 = vmatprep.subr.bf16.mxu0 %v1799_v49 }
  0x9c   :  { %387 = vmatmul.mubr.bf16.vlgmr.msra.gmra.mrb[0].mxu0 %v167_v57  ;;  %748 = vmatpush1.bf16.msra.mxu1 %v1793_v45  ;;  %v1809_v57 = vld [vmem:[#allocation8 + $0x40] ss:$8 sps:$4 sm:$0xff]  }
  0x9d   :  { %396 = vmatprep.mubr.bf16.mxu0 %v170_v59  ;;  %749 = vmatprep.subr.bf16.mxu1 %v1794_v46  ;;  %v1812_v59 = vld [vmem:[#allocation8 + $0x50] ss:$8 sps:$4 sm:$0xff]  }
  0x9e   :  { %1085 = vmatpush1.bf16.msra.mxu0 %v1797_v48 }
  0x9f   :  { %1086 = vmatprep.subr.bf16.mxu0 %v1802_v50 }
  0xa0   :  { %750 = vmatpush1.bf16.msra.mxu1 %v1796_v47 }
  0xa2   :  { %1087 = vmatpush1.bf16.msra.mxu0 %v1800_v51 }
  0xa3   :  { %1088 = vmatprep.subr.bf16.mxu0 %v1805_v52 }
  0xa4   :  { %397 = vmatmul.mubr.bf16.gmra.mrb[4].mxu0 %v169_v3  ;;  %v1824_v3 = vld [vmem:[#allocation8 + $0x90] ss:$8 sps:$4 sm:$0xff]  }
  0xa5   :  { %406 = vmatprep.mubr.bf16.mxu0 %v172_v5  ;;  %v1827_v5 = vld [vmem:[#allocation8 + $0xa0] ss:$8 sps:$4 sm:$0xff]  }
  0xa6   :  { %1089 = vmatpush1.bf16.msra.mxu0 %v1803_v53 }
  0xa7   :  { %1090 = vmatprep.subr.bf16.mxu0 %v1808_v54 }
  0xaa   :  { %1091 = vmatpush1.bf16.msra.mxu0 %v1806_v55 }
  0xab   :  { %1092 = vmatprep.subr.bf16.mxu0 %v1811_v56 }
  0xac   :  { %407 = vmatmul.mubr.bf16.gmra.mrb[8].mxu0 %v171_v12  ;;  %v185_v12 = vshrl.u32 %v184_v9, 7 }
  0xad   :  { %416 = vmatprep.mubr.bf16.mxu0 %v174_v13  ;;  %v1836_v13 = vld [vmem:[#allocation8 + $0xd0] ss:$8 sps:$4 sm:$0xff]  }
  0xae   :  { %1093 = vmatpush1.bf16.msra.mxu0 %v1809_v57  ;;  %v2132_v14 = vsub.s32 0, %v185_v12  ;;  %v2137_v16 = vsub.s32 1, %v185_v12 }
  0xaf   :  { %1094 = vmatprep.subr.bf16.mxu0 %v1814_v58 }
  0xb0   :  { %v2140_v17 = vrot.slane %v166_v15, %v2132_v14  ;;  %v2143_v18 = vrot.slane %v166_v15, %v2137_v16 }
  0xb2   :  { %1095 = vmatpush1.bf16.msra.mxu0 %v1812_v59 }
  0xb3   :  { %1096 = vmatprep.subr.bf16.mxu0 %v1817_v60 }
  0xb4   :  { %417 = vmatmul.mubr.bf16.gmra.mrb[12].mxu0 %v173_v20 }
  0xb5   :  { %426 = vmatprep.mubr.bf16.mxu0 %v176_v21 }
  0xb6   :  { %1097 = vmatpush1.bf16.msra.mxu0 %v1815_v61 }
  0xb7   :  { %1098 = vmatprep.subr.bf16.mxu0 %v1820_v62 }
  0xba   :  { %1099 = vmatpush1.bf16.msra.mxu0 %v1818_v63 }
  0xbb   :  { %1100 = vmatprep.subr.bf16.mxu0 %v1823_v0 }
  0xbc   :  { %427 = vmatmul.mubr.bf16.gmra.mrb[16].mxu0 %v175_v26 }
  0xbd   :  { %436 = vmatprep.mubr.bf16.mxu0 %v178_v27 }
  0xbe   :  { %1101 = vmatpush1.bf16.msra.mxu0 %v1821_v1 }
  0xbf   :  { %1102 = vmatprep.subr.bf16.mxu0 %v1826_v2 }
  0xc2   :  { %1103 = vmatpush1.bf16.msra.mxu0 %v1824_v3 }
  0xc3   :  { %1104 = vmatprep.subr.bf16.mxu0 %v1829_v4 }
  0xc4   :  { %437 = vmatmul.mubr.bf16.gmra.mrb[20].mxu0 %v177_v32 }
  0xc5   :  { %446 = vmatprep.mubr.bf16.mxu0 %v180_v33 }
  0xc6   :  { %1105 = vmatpush1.bf16.msra.mxu0 %v1827_v5 }
  0xc7   :  { %1106 = vmatprep.subr.bf16.mxu0 %v1832_v6 }
  0xca   :  { %1107 = vmatpush1.bf16.msra.mxu0 %v1830_v7 }
  0xcb   :  { %1108 = vmatprep.subr.bf16.mxu0 %v1835_v8 }
  0xcc   :  { %447 = vmatmul.mubr.bf16.gmra.mrb[24].mxu0 %v179_v38 }
  0xcd   :  { %456 = vmatprep.mubr.bf16.mxu0 %v182_v39 }
  0xce   :  { %1109 = vmatpush1.bf16.msra.mxu0 %v1833_v10 }
  0xcf   :  { %1110 = vmatprep.subr.bf16.mxu0 %v1838_v11 }
  0xd2   :  { %1111 = vmatpush1.bf16.msra.mxu0 %v1836_v13 }
  0xd4   :  { %457 = vmatmul.mubr.bf16.gmra.mrb[28].mxu0 %v181_v42 }
 0x16f   :  { %v388_v19 = vpop.f32.mrb[0].mxu0 }
 0x170   :  { %v389_v20 = vadd.f32 %v388_v19, %v2140_v17  ;;  %v390_v21 = vpop.f32.mrb[1].mxu0 }
 0x171   :  { %v391_v22 = vadd.f32 %v390_v21, %v2143_v18  ;;  %v392_v23 = vpop.f32.mrb[2].mxu0 }
 0x172   :  { %v393_v24 = vadd.f32 %v392_v23, %v2140_v17  ;;  %v394_v25 = vpop.f32.mrb[3].mxu0  ;;  %v467_v27 = vmax.f32 %v389_v20, 0.0 }
 0x173   :  { %v395_v26 = vadd.f32 %v394_v25, %v2143_v18  ;;  %v468_v29 = vmax.f32 %v391_v22, 0.0 }
 0x174   :  { %v469_v28 = vmax.f32 %v393_v24, 0.0 }
 0x175   :  { %v470_v30 = vmax.f32 %v395_v26, 0.0 }
 0x176   :  { %v532_v31 = vpack.c.bf16 %v469_v28, %v467_v27 }
 0x177   :  { %v398_v32 = vpop.f32.mrb[4].mxu0  ;;  %v533_v33 = vpack.c.bf16 %v470_v30, %v468_v29 }
 0x178   :  { %v399_v34 = vadd.f32 %v398_v32, %v2140_v17  ;;  %v400_v35 = vpop.f32.mrb[5].mxu0 }
 0x179   :  { %v401_v36 = vadd.f32 %v400_v35, %v2143_v18  ;;  %v402_v37 = vpop.f32.mrb[6].mxu0  ;;  %751 = vmatprep.mubr.bf16.mxu1 %v533_v33 }
 0x17a   :  { %v403_v38 = vadd.f32 %v402_v37, %v2140_v17  ;;  %v404_v39 = vpop.f32.mrb[7].mxu0  ;;  %752 = vmatmul.mubr.bf16.vlgmr.msra.gmra.mrb[0].mxu1 %v532_v31  ;;  %v471_v41 = vmax.f32 %v399_v34, 0.0 }
 0x17b   :  { %v405_v40 = vadd.f32 %v404_v39, %v2143_v18  ;;  %v472_v43 = vmax.f32 %v401_v36, 0.0 }
 0x17c   :  { %v473_v42 = vmax.f32 %v403_v38, 0.0 }
 0x17d   :  { %v474_v44 = vmax.f32 %v405_v40, 0.0 }
 0x17e   :  { %v534_v45 = vpack.c.bf16 %v473_v42, %v471_v41 }
 0x17f   :  { %v535_v46 = vpack.c.bf16 %v474_v44, %v472_v43  ;;  %v408_v47 = vpop.f32.mrb[8].mxu0 }
 0x180   :  { %v409_v48 = vadd.f32 %v408_v47, %v2140_v17  ;;  %v410_v49 = vpop.f32.mrb[9].mxu0 }
 0x181   :  { %v411_v50 = vadd.f32 %v410_v49, %v2143_v18  ;;  %v412_v51 = vpop.f32.mrb[10].mxu0  ;;  %761 = vmatprep.mubr.bf16.mxu1 %v535_v46 }
 0x182   :  { %v413_v52 = vadd.f32 %v412_v51, %v2140_v17  ;;  %v414_v53 = vpop.f32.mrb[11].mxu0  ;;  %762 = vmatmul.mubr.bf16.gmra.mrb[4].mxu1 %v534_v45  ;;  %v475_v55 = vmax.f32 %v409_v48, 0.0 }
 0x183   :  { %v415_v54 = vadd.f32 %v414_v53, %v2143_v18  ;;  %v476_v57 = vmax.f32 %v411_v50, 0.0 }
 0x184   :  { %v477_v56 = vmax.f32 %v413_v52, 0.0 }
 0x185   :  { %v478_v58 = vmax.f32 %v415_v54, 0.0 }
 0x186   :  { %v536_v59 = vpack.c.bf16 %v477_v56, %v475_v55 }
 0x187   :  { %v537_v60 = vpack.c.bf16 %v478_v58, %v476_v57  ;;  %v418_v61 = vpop.f32.mrb[12].mxu0 }
 0x188   :  { %v419_v62 = vadd.f32 %v418_v61, %v2140_v17  ;;  %v420_v63 = vpop.f32.mrb[13].mxu0 }
 0x189   :  { %v421_v0 = vadd.f32 %v420_v63, %v2143_v18  ;;  %v422_v1 = vpop.f32.mrb[14].mxu0  ;;  %771 = vmatprep.mubr.bf16.mxu1 %v537_v60 }
 0x18a   :  { %v423_v2 = vadd.f32 %v422_v1, %v2140_v17  ;;  %v424_v3 = vpop.f32.mrb[15].mxu0  ;;  %772 = vmatmul.mubr.bf16.gmra.mrb[8].mxu1 %v536_v59  ;;  %v479_v5 = vmax.f32 %v419_v62, 0.0 }
 0x18b   :  { %v425_v4 = vadd.f32 %v424_v3, %v2143_v18  ;;  %v480_v7 = vmax.f32 %v421_v0, 0.0 }
 0x18c   :  { %v481_v6 = vmax.f32 %v423_v2, 0.0 }
 0x18d   :  { %v482_v8 = vmax.f32 %v425_v4, 0.0 }
 0x18e   :  { %v538_v9 = vpack.c.bf16 %v481_v6, %v479_v5 }
 0x18f   :  { %v539_v10 = vpack.c.bf16 %v482_v8, %v480_v7  ;;  %v428_v11 = vpop.f32.mrb[16].mxu0  ;;  %v1841_v7 = vld [vmem:[#allocation8 + $0xe4] ss:$8 sps:$4 sm:$0xff]   ;;  %v1839_v8 = vld [vmem:[#allocation8 + $0xe0] ss:$8 sps:$4 sm:$0xff]  }
 0x190   :  { %v429_v12 = vadd.f32 %v428_v11, %v2140_v17  ;;  %v430_v13 = vpop.f32.mrb[17].mxu0  ;;  %1112 = vmatprep.subr.bf16.mxu0 %v1841_v7  ;;  %v1846_v11 = vld [vmem:[#allocation10] sm:$0xff]  }
 0x191   :  { %v431_v15 = vadd.f32 %v430_v13, %v2143_v18  ;;  %v432_v19 = vpop.f32.mrb[18].mxu0  ;;  %781 = vmatprep.mubr.bf16.mxu1 %v539_v10  ;;  %1113 = vmatpush1.bf16.msra.mxu0 %v1839_v8  ;;  %v1842_v10 = vld [vmem:[#allocation8 + $0xf0] ss:$8 sps:$4 sm:$0xff]  }
 0x192   :  { %v433_v20 = vadd.f32 %v432_v19, %v2140_v17  ;;  %v434_v21 = vpop.f32.mrb[19].mxu0  ;;  %782 = vmatmul.mubr.bf16.gmra.mrb[12].mxu1 %v538_v9  ;;  %v483_v23 = vmax.f32 %v429_v12, 0.0  ;;  %v1844_v9 = vld [vmem:[#allocation8 + $0xf4] ss:$8 sps:$4 sm:$0xff]   ;;  %v1847_v12 = vld [vmem:[#allocation10 + $0x48] sm:$0xff]  }
 0x193   :  { %v435_v22 = vadd.f32 %v434_v21, %v2143_v18  ;;  %v484_v25 = vmax.f32 %v431_v15, 0.0  ;;  %1114 = vmatprep.subr.bf16.mxu0 %v1844_v9  ;;  %v1849_v13 = vld [vmem:[#allocation10 + $0x50] sm:$0xff]   ;;  %v1851_v19 = vld [vmem:[#allocation10 + $0x58] sm:$0xff]   ;;  %v1853_v21 = vld [vmem:[#allocation10 + $0x60] sm:$0xff]  }
 0x194   :  { %v485_v24 = vmax.f32 %v433_v20, 0.0  ;;  %v1850_v15 = vld [vmem:[#allocation10 + $0x10] sm:$0xff]   ;;  %v1852_v20 = vld [vmem:[#allocation10 + $0x18] sm:$0xff]  }
 0x195   :  { %v486_v26 = vmax.f32 %v435_v22, 0.0  ;;  %1115 = vmatpush1.bf16.msra.mxu0 %v1842_v10  ;;  %v1854_v22 = vld [vmem:[#allocation10 + $0x20] sm:$0xff]  }
 0x196   :  { %v540_v27 = vpack.c.bf16 %v485_v24, %v483_v23  ;;  %v1855_v23 = vld [vmem:[#allocation10 + $0x68] sm:$0xff]  }
 0x197   :  { %v541_v28 = vpack.c.bf16 %v486_v26, %v484_v25  ;;  %v438_v29 = vpop.f32.mrb[20].mxu0  ;;  %v1856_v24 = vld [vmem:[#allocation10 + $0x28] sm:$0xff]   ;;  %v1857_v25 = vld [vmem:[#allocation10 + $0x70] sm:$0xff]  }
 0x198   :  { %v439_v30 = vadd.f32 %v438_v29, %v2140_v17  ;;  %v440_v31 = vpop.f32.mrb[21].mxu0  ;;  %v1858_v26 = vld [vmem:[#allocation10 + $0x30] sm:$0xff]  }
 0x199   :  { %v441_v32 = vadd.f32 %v440_v31, %v2143_v18  ;;  %v442_v33 = vpop.f32.mrb[22].mxu0  ;;  %791 = vmatprep.mubr.bf16.mxu1 %v541_v28 }
 0x19a   :  { %v443_v34 = vadd.f32 %v442_v33, %v2140_v17  ;;  %v444_v35 = vpop.f32.mrb[23].mxu0  ;;  %792 = vmatmul.mubr.bf16.gmra.mrb[16].mxu1 %v540_v27  ;;  %v487_v37 = vmax.f32 %v439_v30, 0.0  ;;  %v531_v27 = vld [vmem:[%s2299_s4] sm:$0x3] }
 0x19b   :  { %v445_v36 = vadd.f32 %v444_v35, %v2143_v18  ;;  %v488_v39 = vmax.f32 %v441_v32, 0.0  ;;  %v2181_v28 = vrot.slane %v531_v27, %v2132_v14  ;;  %v2184_v29 = vrot.slane %v531_v27, %v2137_v16 }
 0x19c   :  { %v489_v38 = vmax.f32 %v443_v34, 0.0 }
 0x19d   :  { %v490_v40 = vmax.f32 %v445_v36, 0.0 }
 0x19e   :  { %v542_v41 = vpack.c.bf16 %v489_v38, %v487_v37 }
 0x19f   :  { %v543_v42 = vpack.c.bf16 %v490_v40, %v488_v39  ;;  %v448_v43 = vpop.f32.mrb[24].mxu0 }
 0x1a0   :  { %v449_v44 = vadd.f32 %v448_v43, %v2140_v17  ;;  %v450_v45 = vpop.f32.mrb[25].mxu0 }
 0x1a1   :  { %v451_v46 = vadd.f32 %v450_v45, %v2143_v18  ;;  %v452_v47 = vpop.f32.mrb[26].mxu0  ;;  %801 = vmatprep.mubr.bf16.mxu1 %v543_v42 }
 0x1a2   :  { %v453_v48 = vadd.f32 %v452_v47, %v2140_v17  ;;  %v454_v49 = vpop.f32.mrb[27].mxu0  ;;  %802 = vmatmul.mubr.bf16.gmra.mrb[20].mxu1 %v542_v41  ;;  %v491_v51 = vmax.f32 %v449_v44, 0.0 }
 0x1a3   :  { %v455_v50 = vadd.f32 %v454_v49, %v2143_v18  ;;  %v492_v53 = vmax.f32 %v451_v46, 0.0 }
 0x1a4   :  { %v493_v52 = vmax.f32 %v453_v48, 0.0 }
 0x1a5   :  { %v494_v54 = vmax.f32 %v455_v50, 0.0 }
 0x1a6   :  { %v544_v55 = vpack.c.bf16 %v493_v52, %v491_v51 }
 0x1a7   :  { %v545_v56 = vpack.c.bf16 %v494_v54, %v492_v53  ;;  %v458_v57 = vpop.f32.mrb[28].mxu0 }
 0x1a8   :  { %v459_v58 = vadd.f32 %v458_v57, %v2140_v17  ;;  %v460_v59 = vpop.f32.mrb[29].mxu0 }
 0x1a9   :  { %v461_v60 = vadd.f32 %v460_v59, %v2143_v18  ;;  %v462_v61 = vpop.f32.mrb[30].mxu0  ;;  %811 = vmatprep.mubr.bf16.mxu1 %v545_v56 }
 0x1aa   :  { %v463_v62 = vadd.f32 %v462_v61, %v2140_v17  ;;  %v464_v63 = vpop.f32.mrb[31].mxu0  ;;  %812 = vmatmul.mubr.bf16.gmra.mrb[24].mxu1 %v544_v55  ;;  %v495_v1 = vmax.f32 %v459_v58, 0.0  ;;  %v1845_v17 = vld [vmem:[#allocation10 + $0x40] sm:$0xff]  }
 0x1ab   :  { %v465_v0 = vadd.f32 %v464_v63, %v2143_v18  ;;  %v496_v3 = vmax.f32 %v461_v60, 0.0  ;;  %1625 = vmatprep.subr.bf16.mxu1 %v1845_v17  ;;  %v1848_v18 = vld [vmem:[#allocation10 + $0x8] sm:$0xff]  }
 0x1ac   :  { %v497_v2 = vmax.f32 %v463_v62, 0.0  ;;  %1626 = vmatpush3.bf16.msra.mxu1 %v1846_v11 }
 0x1ad   :  { %v498_v4 = vmax.f32 %v465_v0, 0.0  ;;  %1627 = vmatprep.subr.bf16.mxu1 %v1847_v12 }
 0x1ae   :  { %v546_v5 = vpack.c.bf16 %v497_v2, %v495_v1 }
 0x1af   :  { %v547_v6 = vpack.c.bf16 %v498_v4, %v496_v3 }
 0x1b0   :  { %1628 = vmatpush3.bf16.msra.mxu1 %v1848_v18 }
 0x1b1   :  { %821 = vmatprep.mubr.bf16.mxu1 %v547_v6  ;;  %1629 = vmatprep.subr.bf16.mxu1 %v1849_v13 }
 0x1b2   :  { %822 = vmatmul.mubr.bf16.gmra.mrb[28].mxu1 %v546_v5 }
 0x1b4   :  { %1630 = vmatpush3.bf16.msra.mxu1 %v1850_v15 }
 0x1b5   :  { %1631 = vmatprep.subr.bf16.mxu1 %v1851_v19 }
 0x1b8   :  { %1632 = vmatpush3.bf16.msra.mxu1 %v1852_v20 }
 0x1b9   :  { %1633 = vmatprep.subr.bf16.mxu1 %v1853_v21 }
 0x1bc   :  { %1634 = vmatpush3.bf16.msra.mxu1 %v1854_v22 }
 0x1bd   :  { %1635 = vmatprep.subr.bf16.mxu1 %v1855_v23 }
 0x1c0   :  { %1636 = vmatpush3.bf16.msra.mxu1 %v1856_v24 }
 0x1c1   :  { %1637 = vmatprep.subr.bf16.mxu1 %v1857_v25 }
 0x1c4   :  { %1638 = vmatpush3.bf16.msra.mxu1 %v1858_v26 }
 0x24d   :  { %v753_v30 = vpop.f32.mrb[0].mxu1 }
 0x24e   :  { %v754_v31 = vadd.f32 %v753_v30, %v2181_v28  ;;  %v755_v32 = vpop.f32.mrb[1].mxu1 }
 0x24f   :  { %v756_v33 = vadd.f32 %v755_v32, %v2184_v29  ;;  %v757_v34 = vpop.f32.mrb[2].mxu1 }
 0x250   :  { %v758_v35 = vadd.f32 %v757_v34, %v2181_v28  ;;  %v759_v36 = vpop.f32.mrb[3].mxu1  ;;  %v832_v38 = vmax.f32 %v754_v31, 0.0 }
 0x251   :  { %v760_v37 = vadd.f32 %v759_v36, %v2184_v29  ;;  %v833_v40 = vmax.f32 %v756_v33, 0.0 }
 0x252   :  { %v834_v39 = vmax.f32 %v758_v35, 0.0 }
 0x253   :  { %v835_v41 = vmax.f32 %v760_v37, 0.0 }
 0x254   :  { %v897_v42 = vpack.c.bf16 %v834_v39, %v832_v38 }
 0x255   :  { %v898_v43 = vpack.c.bf16 %v835_v41, %v833_v40  ;;  %v763_v44 = vpop.f32.mrb[4].mxu1 }
 0x256   :  { %v764_v45 = vadd.f32 %v763_v44, %v2181_v28  ;;  %v765_v46 = vpop.f32.mrb[5].mxu1 }
 0x257   :  { %v766_v47 = vadd.f32 %v765_v46, %v2184_v29  ;;  %v767_v48 = vpop.f32.mrb[6].mxu1  ;;  %1116 = vmatprep.mubr.bf16.mxu0 %v898_v43 }
 0x258   :  { %v768_v49 = vadd.f32 %v767_v48, %v2181_v28  ;;  %v769_v50 = vpop.f32.mrb[7].mxu1  ;;  %1117 = vmatmul.mubr.bf16.vlgmr.msra.gmra.mrb[32].mxu0 %v897_v42  ;;  %v836_v52 = vmax.f32 %v764_v45, 0.0 }
 0x259   :  { %v770_v51 = vadd.f32 %v769_v50, %v2184_v29  ;;  %v837_v54 = vmax.f32 %v766_v47, 0.0 }
 0x25a   :  { %v838_v53 = vmax.f32 %v768_v49, 0.0 }
 0x25b   :  { %v839_v55 = vmax.f32 %v770_v51, 0.0 }
 0x25c   :  { %v899_v56 = vpack.c.bf16 %v838_v53, %v836_v52 }
 0x25d   :  { %v900_v57 = vpack.c.bf16 %v839_v55, %v837_v54  ;;  %v773_v58 = vpop.f32.mrb[8].mxu1 }
 0x25e   :  { %v774_v59 = vadd.f32 %v773_v58, %v2181_v28  ;;  %v775_v60 = vpop.f32.mrb[9].mxu1 }
 0x25f   :  { %v776_v61 = vadd.f32 %v775_v60, %v2184_v29  ;;  %v777_v62 = vpop.f32.mrb[10].mxu1  ;;  %1126 = vmatprep.mubr.bf16.mxu0 %v900_v57 }
 0x260   :  { %v778_v63 = vadd.f32 %v777_v62, %v2181_v28  ;;  %v779_v0 = vpop.f32.mrb[11].mxu1  ;;  %1127 = vmatmul.mubr.bf16.gmra.mrb[36].mxu0 %v899_v56  ;;  %v840_v2 = vmax.f32 %v774_v59, 0.0 }
 0x261   :  { %v780_v1 = vadd.f32 %v779_v0, %v2184_v29  ;;  %v841_v4 = vmax.f32 %v776_v61, 0.0 }
 0x262   :  { %v842_v3 = vmax.f32 %v778_v63, 0.0 }
 0x263   :  { %v843_v5 = vmax.f32 %v780_v1, 0.0 }
 0x264   :  { %v901_v6 = vpack.c.bf16 %v842_v3, %v840_v2 }
 0x265   :  { %v902_v7 = vpack.c.bf16 %v843_v5, %v841_v4  ;;  %v783_v8 = vpop.f32.mrb[12].mxu1 }
 0x266   :  { %v784_v9 = vadd.f32 %v783_v8, %v2181_v28  ;;  %v785_v10 = vpop.f32.mrb[13].mxu1 }
 0x267   :  { %v786_v17 = vadd.f32 %v785_v10, %v2184_v29  ;;  %v787_v11 = vpop.f32.mrb[14].mxu1  ;;  %1136 = vmatprep.mubr.bf16.mxu0 %v902_v7 }
 0x268   :  { %v788_v12 = vadd.f32 %v787_v11, %v2181_v28  ;;  %v789_v18 = vpop.f32.mrb[15].mxu1  ;;  %1137 = vmatmul.mubr.bf16.gmra.mrb[40].mxu0 %v901_v6  ;;  %v844_v15 = vmax.f32 %v784_v9, 0.0 }
 0x269   :  { %v790_v13 = vadd.f32 %v789_v18, %v2184_v29  ;;  %v845_v20 = vmax.f32 %v786_v17, 0.0 }
 0x26a   :  { %v846_v19 = vmax.f32 %v788_v12, 0.0 }
 0x26b   :  { %v847_v21 = vmax.f32 %v790_v13, 0.0 }
 0x26c   :  { %v903_v22 = vpack.c.bf16 %v846_v19, %v844_v15 }
 0x26d   :  { %v904_v23 = vpack.c.bf16 %v847_v21, %v845_v20  ;;  %v793_v24 = vpop.f32.mrb[16].mxu1  ;;  %v1859_v20 = vld [vmem:[#allocation10 + $0x78] sm:$0xff]  }
 0x26e   :  { %v794_v25 = vadd.f32 %v793_v24, %v2181_v28  ;;  %v795_v26 = vpop.f32.mrb[17].mxu1  ;;  %v1860_v21 = vld [vmem:[#allocation10 + $0x38] sm:$0xff]   ;;  %1639 = vmatprep.subr.bf16.mxu1 %v1859_v20 }
 0x26f   :  { %v796_v27 = vadd.f32 %v795_v26, %v2184_v29  ;;  %v797_v30 = vpop.f32.mrb[18].mxu1  ;;  %1146 = vmatprep.mubr.bf16.mxu0 %v904_v23  ;;  %1640 = vmatpush3.bf16.msra.mxu1 %v1860_v21 }
 0x270   :  { %v798_v31 = vadd.f32 %v797_v30, %v2181_v28  ;;  %v799_v32 = vpop.f32.mrb[19].mxu1  ;;  %1147 = vmatmul.mubr.bf16.gmra.mrb[44].mxu0 %v903_v22  ;;  %v848_v34 = vmax.f32 %v794_v25, 0.0 }
 0x271   :  { %v800_v33 = vadd.f32 %v799_v32, %v2184_v29  ;;  %v849_v36 = vmax.f32 %v796_v27, 0.0 }
 0x272   :  { %v850_v35 = vmax.f32 %v798_v31, 0.0 }
 0x273   :  { %v851_v37 = vmax.f32 %v800_v33, 0.0 }
 0x274   :  { %v905_v38 = vpack.c.bf16 %v850_v35, %v848_v34 }
 0x275   :  { %v906_v39 = vpack.c.bf16 %v851_v37, %v849_v36  ;;  %v803_v40 = vpop.f32.mrb[20].mxu1 }
 0x276   :  { %v804_v41 = vadd.f32 %v803_v40, %v2181_v28  ;;  %v805_v42 = vpop.f32.mrb[21].mxu1 }
 0x277   :  { %v806_v43 = vadd.f32 %v805_v42, %v2184_v29  ;;  %v807_v44 = vpop.f32.mrb[22].mxu1  ;;  %1156 = vmatprep.mubr.bf16.mxu0 %v906_v39 }
 0x278   :  { %v808_v45 = vadd.f32 %v807_v44, %v2181_v28  ;;  %v809_v46 = vpop.f32.mrb[23].mxu1  ;;  %1157 = vmatmul.mubr.bf16.gmra.mrb[48].mxu0 %v905_v38  ;;  %v852_v48 = vmax.f32 %v804_v41, 0.0 }
 0x279   :  { %v810_v47 = vadd.f32 %v809_v46, %v2184_v29  ;;  %v853_v50 = vmax.f32 %v806_v43, 0.0 }
 0x27a   :  { %v854_v49 = vmax.f32 %v808_v45, 0.0 }
 0x27b   :  { %v855_v51 = vmax.f32 %v810_v47, 0.0 }
 0x27c   :  { %v907_v52 = vpack.c.bf16 %v854_v49, %v852_v48 }
 0x27d   :  { %v908_v53 = vpack.c.bf16 %v855_v51, %v853_v50  ;;  %v813_v54 = vpop.f32.mrb[24].mxu1 }
 0x27e   :  { %v814_v55 = vadd.f32 %v813_v54, %v2181_v28  ;;  %v815_v56 = vpop.f32.mrb[25].mxu1 }
 0x27f   :  { %v816_v57 = vadd.f32 %v815_v56, %v2184_v29  ;;  %v817_v58 = vpop.f32.mrb[26].mxu1  ;;  %1166 = vmatprep.mubr.bf16.mxu0 %v908_v53 }
 0x280   :  { %v818_v59 = vadd.f32 %v817_v58, %v2181_v28  ;;  %v819_v60 = vpop.f32.mrb[27].mxu1  ;;  %1167 = vmatmul.mubr.bf16.gmra.mrb[52].mxu0 %v907_v52  ;;  %v856_v62 = vmax.f32 %v814_v55, 0.0 }
 0x281   :  { %v820_v61 = vadd.f32 %v819_v60, %v2184_v29  ;;  %v857_v0 = vmax.f32 %v816_v57, 0.0 }
 0x282   :  { %v858_v63 = vmax.f32 %v818_v59, 0.0 }
 0x283   :  { %v859_v1 = vmax.f32 %v820_v61, 0.0 }
 0x284   :  { %v909_v2 = vpack.c.bf16 %v858_v63, %v856_v62 }
 0x285   :  { %v910_v3 = vpack.c.bf16 %v859_v1, %v857_v0  ;;  %v823_v4 = vpop.f32.mrb[28].mxu1 }
 0x286   :  { %v824_v5 = vadd.f32 %v823_v4, %v2181_v28  ;;  %v825_v6 = vpop.f32.mrb[29].mxu1 }
 0x287   :  { %v826_v7 = vadd.f32 %v825_v6, %v2184_v29  ;;  %v827_v8 = vpop.f32.mrb[30].mxu1  ;;  %1176 = vmatprep.mubr.bf16.mxu0 %v910_v3 }
 0x288   :  { %v828_v9 = vadd.f32 %v827_v8, %v2181_v28  ;;  %v829_v10 = vpop.f32.mrb[31].mxu1  ;;  %1177 = vmatmul.mubr.bf16.gmra.mrb[56].mxu0 %v909_v2  ;;  %v860_v11 = vmax.f32 %v824_v5, 0.0  ;;  %v896_v28 = vld [vmem:[%s2301_s6] sm:$0x3] }
 0x289   :  { %v830_v17 = vadd.f32 %v829_v10, %v2184_v29  ;;  %v861_v18 = vmax.f32 %v826_v7, 0.0  ;;  %v2222_v22 = vrot.slane %v896_v28, %v2132_v14  ;;  %v2225_v29 = vrot.slane %v896_v28, %v2137_v16 }
 0x28a   :  { %v862_v12 = vmax.f32 %v828_v9, 0.0 }
 0x28b   :  { %v863_v13 = vmax.f32 %v830_v17, 0.0 }
 0x28c   :  { %v911_v15 = vpack.c.bf16 %v862_v12, %v860_v11 }
 0x28d   :  { %v912_v19 = vpack.c.bf16 %v863_v13, %v861_v18 }
 0x28f   :  { %1186 = vmatprep.mubr.bf16.mxu0 %v912_v19 }
 0x290   :  { %1187 = vmatmul.mubr.bf16.gmra.mrb[60].mxu0 %v911_v15 }
 0x32b   :  { %v1118_v23 = vpop.f32.mrb[32].mxu0 }
 0x32c   :  { %v1119_v24 = vadd.f32 %v1118_v23, %v2222_v22  ;;  %v1120_v25 = vpop.f32.mrb[33].mxu0 }
 0x32d   :  { %v1121_v26 = vadd.f32 %v1120_v25, %v2225_v29  ;;  %v1122_v27 = vpop.f32.mrb[34].mxu0 }
 0x32e   :  { %v1123_v30 = vadd.f32 %v1122_v27, %v2222_v22  ;;  %v1124_v31 = vpop.f32.mrb[35].mxu0  ;;  %v1197_v33 = vmax.f32 %v1119_v24, 0.0 }
 0x32f   :  { %v1125_v32 = vadd.f32 %v1124_v31, %v2225_v29  ;;  %v1198_v35 = vmax.f32 %v1121_v26, 0.0 }
 0x330   :  { %v1199_v34 = vmax.f32 %v1123_v30, 0.0 }
 0x331   :  { %v1200_v14 = vmax.f32 %v1125_v32, 0.0 }
 0x332   :  { %v1262_v36 = vpack.c.bf16 %v1199_v34, %v1197_v33 }
 0x333   :  { %v1263_v37 = vpack.c.bf16 %v1200_v14, %v1198_v35  ;;  %v1128_v16 = vpop.f32.mrb[36].mxu0 }
 0x334   :  { %v1129_v38 = vadd.f32 %v1128_v16, %v2222_v22  ;;  %v1130_v39 = vpop.f32.mrb[37].mxu0 }
 0x335   :  { %v1131_v40 = vadd.f32 %v1130_v39, %v2225_v29  ;;  %v1132_v41 = vpop.f32.mrb[38].mxu0  ;;  %1412 = vmatprep.mubr.bf16.mxu1 %v1263_v37 }
 0x336   :  { %v1133_v42 = vadd.f32 %v1132_v41, %v2222_v22  ;;  %v1134_v43 = vpop.f32.mrb[39].mxu0  ;;  %1413 = vmatmul.mubr.bf16.vlgmr.msra.gmra.mrb[32].mxu1 %v1262_v36  ;;  %v1201_v45 = vmax.f32 %v1129_v38, 0.0 }
 0x337   :  { %v1135_v44 = vadd.f32 %v1134_v43, %v2225_v29  ;;  %v1202_v47 = vmax.f32 %v1131_v40, 0.0 }
 0x338   :  { %v1203_v46 = vmax.f32 %v1133_v42, 0.0 }
 0x339   :  { %v1204_v48 = vmax.f32 %v1135_v44, 0.0 }
 0x33a   :  { %v1264_v49 = vpack.c.bf16 %v1203_v46, %v1201_v45 }
 0x33b   :  { %v1265_v50 = vpack.c.bf16 %v1204_v48, %v1202_v47  ;;  %v1138_v51 = vpop.f32.mrb[40].mxu0 }
 0x33c   :  { %v1139_v52 = vadd.f32 %v1138_v51, %v2222_v22  ;;  %v1140_v53 = vpop.f32.mrb[41].mxu0 }
 0x33d   :  { %v1141_v54 = vadd.f32 %v1140_v53, %v2225_v29  ;;  %v1142_v55 = vpop.f32.mrb[42].mxu0  ;;  %1420 = vmatprep.mubr.bf16.mxu1 %v1265_v50 }
 0x33e   :  { %v1143_v56 = vadd.f32 %v1142_v55, %v2222_v22  ;;  %v1144_v57 = vpop.f32.mrb[43].mxu0  ;;  %1421 = vmatmul.mubr.bf16.gmra.mrb[36].mxu1 %v1264_v49  ;;  %v1205_v59 = vmax.f32 %v1139_v52, 0.0 }
 0x33f   :  { %v1145_v58 = vadd.f32 %v1144_v57, %v2225_v29  ;;  %v1206_v61 = vmax.f32 %v1141_v54, 0.0 }
 0x340   :  { %v1207_v60 = vmax.f32 %v1143_v56, 0.0 }
 0x341   :  { %v1208_v62 = vmax.f32 %v1145_v58, 0.0 }
 0x342   :  { %v1266_v63 = vpack.c.bf16 %v1207_v60, %v1205_v59 }
 0x343   :  { %v1267_v0 = vpack.c.bf16 %v1208_v62, %v1206_v61  ;;  %v1148_v1 = vpop.f32.mrb[44].mxu0 }
 0x344   :  { %v1149_v2 = vadd.f32 %v1148_v1, %v2222_v22  ;;  %v1150_v3 = vpop.f32.mrb[45].mxu0 }
 0x345   :  { %v1151_v4 = vadd.f32 %v1150_v3, %v2225_v29  ;;  %v1152_v5 = vpop.f32.mrb[46].mxu0  ;;  %1428 = vmatprep.mubr.bf16.mxu1 %v1267_v0 }
 0x346   :  { %v1153_v6 = vadd.f32 %v1152_v5, %v2222_v22  ;;  %v1154_v7 = vpop.f32.mrb[47].mxu0  ;;  %1429 = vmatmul.mubr.bf16.gmra.mrb[40].mxu1 %v1266_v63  ;;  %v1209_v9 = vmax.f32 %v1149_v2, 0.0 }
 0x347   :  { %v1155_v8 = vadd.f32 %v1154_v7, %v2225_v29  ;;  %v1210_v17 = vmax.f32 %v1151_v4, 0.0 }
 0x348   :  { %v1211_v10 = vmax.f32 %v1153_v6, 0.0 }
 0x349   :  { %v1212_v11 = vmax.f32 %v1155_v8, 0.0 }
 0x34a   :  { %v1268_v12 = vpack.c.bf16 %v1211_v10, %v1209_v9  ;;  %v2262_v10 = vld [vmem:[%s2303_s8] ss:$0 sm:$0xff]  ;;  %s2012_s8 = smov [#allocation11]  }
 0x34b   :  { %v1269_v18 = vpack.c.bf16 %v1212_v11, %v1210_v17  ;;  %v1158_v13 = vpop.f32.mrb[48].mxu0  ;;  %s1498_s14 = sshll.u32 %s2012_s8, 4  ;;  %s1499_s14 = int_to_ptr.vmem [resolvable:$true] %s1498_s14 }
 0x34c   :  { %v1159_v15 = vadd.f32 %v1158_v13, %v2222_v22  ;;  %v1160_v19 = vpop.f32.mrb[49].mxu0  ;;  %s1971_s15 = scalar_lea.vmem %s1499_s14, 2048  ;;  %p1976_p13 = scmp.lt.s32.totalorder %s1499_s14, %s1499_s14 }
 0x34d   :  { %v1161_v20 = vadd.f32 %v1160_v19, %v2225_v29  ;;  %v1162_v21 = vpop.f32.mrb[50].mxu0  ;;  %1436 = vmatprep.mubr.bf16.mxu1 %v1269_v18  ;;  %p1972_p12 = scmp.ne.s32.totalorder %s1499_s14, %s1971_s15  ;;  %p1977_p0 = scmp.lt.s32.totalorder %s1971_s15, %s1971_s15 }
 0x34e   :  { %v1163_v28 = vadd.f32 %v1162_v21, %v2222_v22  ;;  %v1164_v23 = vpop.f32.mrb[51].mxu0  ;;  %1437 = vmatmul.mubr.bf16.gmra.mrb[44].mxu1 %v1268_v12  ;;  %v1213_v25 = vmax.f32 %v1159_v15, 0.0 }
 0x34f   :  { %v1165_v24 = vadd.f32 %v1164_v23, %v2225_v29  ;;  %v1214_v27 = vmax.f32 %v1161_v20, 0.0  ;;  %p1978_p1 = por %p1977_p0, %p1976_p13 }
 0x350   :  { %v1215_v26 = vmax.f32 %v1163_v28, 0.0 }
 0x351   :  { %v1216_v30 = vmax.f32 %v1165_v24, 0.0  ;;  %p1979_p2 = pnand %p1978_p1, %p1972_p12 }
 0x352   :  { %v1270_v31 = vpack.c.bf16 %v1215_v26, %v1213_v25 }
 0x353   :  { %v1271_v32 = vpack.c.bf16 %v1216_v30, %v1214_v27  ;;  %v1168_v33 = vpop.f32.mrb[52].mxu0 }
 0x354   :  { %v1169_v34 = vadd.f32 %v1168_v33, %v2222_v22  ;;  %v1170_v35 = vpop.f32.mrb[53].mxu0 }
 0x355   :  { %v1171_v14 = vadd.f32 %v1170_v35, %v2225_v29  ;;  %v1172_v36 = vpop.f32.mrb[54].mxu0  ;;  %1444 = vmatprep.mubr.bf16.mxu1 %v1271_v32 }
 0x356   :  { %v1173_v37 = vadd.f32 %v1172_v36, %v2222_v22  ;;  %v1174_v16 = vpop.f32.mrb[55].mxu0  ;;  %1445 = vmatmul.mubr.bf16.gmra.mrb[48].mxu1 %v1270_v31  ;;  %v1217_v39 = vmax.f32 %v1169_v34, 0.0 }
 0x357   :  { %v1175_v38 = vadd.f32 %v1174_v16, %v2225_v29  ;;  %v1218_v41 = vmax.f32 %v1171_v14, 0.0 }
 0x358   :  { %v1219_v40 = vmax.f32 %v1173_v37, 0.0 }
 0x359   :  { %v1220_v42 = vmax.f32 %v1175_v38, 0.0 }
 0x35a   :  { %v1272_v43 = vpack.c.bf16 %v1219_v40, %v1217_v39 }
 0x35b   :  { %v1273_v44 = vpack.c.bf16 %v1220_v42, %v1218_v41  ;;  %v1178_v45 = vpop.f32.mrb[56].mxu0 }
 0x35c   :  { %v1179_v46 = vadd.f32 %v1178_v45, %v2222_v22  ;;  %v1180_v47 = vpop.f32.mrb[57].mxu0 }
 0x35d   :  { %v1181_v48 = vadd.f32 %v1180_v47, %v2225_v29  ;;  %v1182_v49 = vpop.f32.mrb[58].mxu0  ;;  %1452 = vmatprep.mubr.bf16.mxu1 %v1273_v44 }
 0x35e   :  { %v1183_v50 = vadd.f32 %v1182_v49, %v2222_v22  ;;  %v1184_v51 = vpop.f32.mrb[59].mxu0  ;;  %1453 = vmatmul.mubr.bf16.gmra.mrb[52].mxu1 %v1272_v43  ;;  %v1221_v53 = vmax.f32 %v1179_v46, 0.0 }
 0x35f   :  { %v1185_v52 = vadd.f32 %v1184_v51, %v2225_v29  ;;  %v1222_v55 = vmax.f32 %v1181_v48, 0.0 }
 0x360   :  { %v1223_v54 = vmax.f32 %v1183_v50, 0.0 }
 0x361   :  { %v1224_v56 = vmax.f32 %v1185_v52, 0.0 }
 0x362   :  { %v1274_v57 = vpack.c.bf16 %v1223_v54, %v1221_v53 }
 0x363   :  { %v1275_v58 = vpack.c.bf16 %v1224_v56, %v1222_v55  ;;  %v1188_v59 = vpop.f32.mrb[60].mxu0 }
 0x364   :  { %v1189_v60 = vadd.f32 %v1188_v59, %v2222_v22  ;;  %v1190_v61 = vpop.f32.mrb[61].mxu0 }
 0x365   :  { %v1191_v62 = vadd.f32 %v1190_v61, %v2225_v29  ;;  %v1192_v63 = vpop.f32.mrb[62].mxu0  ;;  %1460 = vmatprep.mubr.bf16.mxu1 %v1275_v58 }
 0x366   :  { %v1193_v0 = vadd.f32 %v1192_v63, %v2222_v22  ;;  %v1194_v1 = vpop.f32.mrb[63].mxu0  ;;  %1461 = vmatmul.mubr.bf16.gmra.mrb[56].mxu1 %v1274_v57  ;;  %v1225_v3 = vmax.f32 %v1189_v60, 0.0 }
 0x367   :  { %v1195_v2 = vadd.f32 %v1194_v1, %v2225_v29  ;;  %v1226_v5 = vmax.f32 %v1191_v62, 0.0 }
 0x368   :  { %v1227_v4 = vmax.f32 %v1193_v0, 0.0 }
 0x369   :  { %v1228_v6 = vmax.f32 %v1195_v2, 0.0 }
 0x36a   :  { %v1276_v7 = vpack.c.bf16 %v1227_v4, %v1225_v3 }
 0x36b   :  { %v1277_v8 = vpack.c.bf16 %v1228_v6, %v1226_v5 }
 0x36d   :  { %1468 = vmatprep.mubr.bf16.mxu1 %v1277_v8 }
 0x36e   :  { %1469 = vmatmul.mubr.bf16.gmra.mrb[60].mxu1 %v1276_v7 }
 0x409   :  { %v1641_v9 = vpop.f32.mrb[32].mxu1 }
 0x40a   :  { %v1642_v17 = vpop.f32.mrb[33].mxu1 }
 0x40b   :  { %v1643_v22 = vadd.f32 %v1642_v17, %v1641_v9  ;;  %v1644_v11 = vpop.f32.mrb[34].mxu1 }
 0x40c   :  { %v1645_v12 = vpop.f32.mrb[35].mxu1 }
 0x40d   :  { %v1415_v29 = vadd.f32 %v1643_v22, %v2262_v10  ;;  %v1646_v18 = vadd.f32 %v1645_v12, %v1644_v11 }
 0x40f   :  { %1477 = vst [vmem:[#allocation11] sm:$0xff] %v1415_v29  ;;  %v1418_v13 = vadd.f32 %v1646_v18, %v2262_v10 }
 0x411   :  { %1478 = vst [vmem:[#allocation11 + $0x8] sm:$0xff] %v1418_v13  ;;  %v1647_v15 = vpop.f32.mrb[36].mxu1 }
 0x412   :  { %v1648_v19 = vpop.f32.mrb[37].mxu1 }
 0x413   :  { %v1649_v20 = vadd.f32 %v1648_v19, %v1647_v15  ;;  %v1650_v21 = vpop.f32.mrb[38].mxu1 }
 0x414   :  { %v1651_v28 = vpop.f32.mrb[39].mxu1 }
 0x415   :  { %v1423_v23 = vadd.f32 %v1649_v20, %v2262_v10  ;;  %v1652_v24 = vadd.f32 %v1651_v28, %v1650_v21 }
 0x417   :  { %1479 = vst [vmem:[#allocation11 + $0x10] sm:$0xff] %v1423_v23  ;;  %v1426_v25 = vadd.f32 %v1652_v24, %v2262_v10 }
 0x419   :  { %1480 = vst [vmem:[#allocation11 + $0x18] sm:$0xff] %v1426_v25  ;;  %v1653_v26 = vpop.f32.mrb[40].mxu1 }
 0x41a   :  { %v1654_v27 = vpop.f32.mrb[41].mxu1 }
 0x41b   :  { %v1655_v30 = vadd.f32 %v1654_v27, %v1653_v26  ;;  %v1656_v31 = vpop.f32.mrb[42].mxu1 }
 0x41c   :  { %v1657_v32 = vpop.f32.mrb[43].mxu1 }
 0x41d   :  { %v1431_v33 = vadd.f32 %v1655_v30, %v2262_v10  ;;  %v1658_v34 = vadd.f32 %v1657_v32, %v1656_v31 }
 0x41f   :  { %1481 = vst [vmem:[#allocation11 + $0x20] sm:$0xff] %v1431_v33  ;;  %v1434_v35 = vadd.f32 %v1658_v34, %v2262_v10 }
 0x421   :  { %1482 = vst [vmem:[#allocation11 + $0x28] sm:$0xff] %v1434_v35  ;;  %v1659_v14 = vpop.f32.mrb[44].mxu1 }
 0x422   :  { %v1660_v36 = vpop.f32.mrb[45].mxu1 }
 0x423   :  { %v1661_v37 = vadd.f32 %v1660_v36, %v1659_v14  ;;  %v1662_v16 = vpop.f32.mrb[46].mxu1 }
 0x424   :  { %v1663_v38 = vpop.f32.mrb[47].mxu1 }
 0x425   :  { %v1439_v39 = vadd.f32 %v1661_v37, %v2262_v10  ;;  %v1664_v40 = vadd.f32 %v1663_v38, %v1662_v16 }
 0x427   :  { %1483 = vst [vmem:[#allocation11 + $0x30] sm:$0xff] %v1439_v39  ;;  %v1442_v41 = vadd.f32 %v1664_v40, %v2262_v10 }
 0x429   :  { %1484 = vst [vmem:[#allocation11 + $0x38] sm:$0xff] %v1442_v41  ;;  %v1665_v42 = vpop.f32.mrb[48].mxu1 }
 0x42a   :  { %v1666_v43 = vpop.f32.mrb[49].mxu1 }
 0x42b   :  { %v1667_v44 = vadd.f32 %v1666_v43, %v1665_v42  ;;  %v1668_v45 = vpop.f32.mrb[50].mxu1 }
 0x42c   :  { %v1669_v46 = vpop.f32.mrb[51].mxu1 }
 0x42d   :  { %v1447_v47 = vadd.f32 %v1667_v44, %v2262_v10  ;;  %v1670_v48 = vadd.f32 %v1669_v46, %v1668_v45 }
 0x42f   :  { %1485 = vst [vmem:[#allocation11 + $0x40] sm:$0xff] %v1447_v47  ;;  %v1450_v49 = vadd.f32 %v1670_v48, %v2262_v10 }
 0x431   :  { %1486 = vst [vmem:[#allocation11 + $0x48] sm:$0xff] %v1450_v49  ;;  %v1671_v50 = vpop.f32.mrb[52].mxu1 }
 0x432   :  { %v1672_v51 = vpop.f32.mrb[53].mxu1 }
 0x433   :  { %v1673_v52 = vadd.f32 %v1672_v51, %v1671_v50  ;;  %v1674_v53 = vpop.f32.mrb[54].mxu1 }
 0x434   :  { %v1675_v54 = vpop.f32.mrb[55].mxu1 }
 0x435   :  { %v1455_v55 = vadd.f32 %v1673_v52, %v2262_v10  ;;  %v1676_v56 = vadd.f32 %v1675_v54, %v1674_v53 }
 0x437   :  { %1487 = vst [vmem:[#allocation11 + $0x50] sm:$0xff] %v1455_v55  ;;  %v1458_v57 = vadd.f32 %v1676_v56, %v2262_v10 }
 0x439   :  { %1488 = vst [vmem:[#allocation11 + $0x58] sm:$0xff] %v1458_v57  ;;  %v1677_v58 = vpop.f32.mrb[56].mxu1 }
 0x43a   :  { %v1678_v59 = vpop.f32.mrb[57].mxu1 }
 0x43b   :  { %v1679_v60 = vadd.f32 %v1678_v59, %v1677_v58  ;;  %v1680_v61 = vpop.f32.mrb[58].mxu1 }
 0x43c   :  { %v1681_v62 = vpop.f32.mrb[59].mxu1 }
 0x43d   :  { %v1463_v63 = vadd.f32 %v1679_v60, %v2262_v10  ;;  %v1682_v0 = vadd.f32 %v1681_v62, %v1680_v61 }
 0x43f   :  { %1489 = vst [vmem:[#allocation11 + $0x60] sm:$0xff] %v1463_v63  ;;  %v1466_v1 = vadd.f32 %v1682_v0, %v2262_v10 }
 0x441   :  { %1490 = vst [vmem:[#allocation11 + $0x68] sm:$0xff] %v1466_v1  ;;  %v1683_v2 = vpop.f32.mrb[60].mxu1 }
 0x442   :  { %v1684_v3 = vpop.f32.mrb[61].mxu1 }
 0x443   :  { %v1685_v4 = vadd.f32 %v1684_v3, %v1683_v2  ;;  %v1686_v5 = vpop.f32.mrb[62].mxu1 }
 0x444   :  { %v1687_v6 = vpop.f32.mrb[63].mxu1 }
 0x445   :  { %v1471_v7 = vadd.f32 %v1685_v4, %v2262_v10  ;;  %v1688_v8 = vadd.f32 %v1687_v6, %v1686_v5 }
 0x447   :  { %1491 = vst [vmem:[#allocation11 + $0x70] sm:$0xff] %v1471_v7  ;;  %v1474_v9 = vadd.f32 %v1688_v8, %v2262_v10 }
 0x449   :  { %1492 = vst [vmem:[#allocation11 + $0x78] sm:$0xff] %v1474_v9 }
 0x44a   :  { %1982 = shalt.err (!%p1979_p2)
}
 0x44b   :  { %s1983_s0 = scalar_lea.hbm %s2304_s9, 2048 }
 0x44c   :  { %p1984_p3 = scmp.ne.s32.totalorder %s2304_s9, %s1983_s0  ;;  %p1987_p4 = scmp.lt.u32.totalorder %s1983_s0, %s2304_s9 }
 0x44e   :  { %p1989_p5 = pnand %p1987_p4, %p1984_p3 }
 0x450   :  { %1992 = shalt.err (!%p1989_p5)
}
 0x451   :  { %1504 = dma.vmem_to_hbm [thread:$0]  %s1499_s14, 2048, %s2304_s9, [#allocation4], %s2002_s19, %s2002_s19, %s2003_s20  }
 0x452   :  { %1999 = dma.done.wait [#allocation4], 2048  }
 0x453   :  { %2000 = vsyncadd [#allocation4], 4294965248 }
 0x454   :  { %1508 = vsyncpa [#allocation3], 1 }
 0x455   :  { %1509 = vsyncpa [#allocation6], 1 }
 0x456   :  { %1510 = vsyncpa [#allocation9], 1 }
 0x457   :  { %1511 = vsyncpa [#allocation4], 1 }

</bundles_post_ra>
